<compile_context>
chip_gen: v7x
topology: tpu7x:2x2x1
jax: 0.10.0
libtpu: 0.0.40
codegen_flags: <defaults>
</compile_context>

<pallas_src>
import math
from functools import partial

import jax
import jax.numpy as jnp
from jax.experimental import pallas as pl
from jax.experimental.pallas import tpu as pltpu


# --------------------------------------------------------------------------
# Model spec (same schema as the reference build_blocks()).
# --------------------------------------------------------------------------
MODEL_SPECS = {
    "MNV4ConvTiny": {
        "conv0":  {"block_name": "convbn",   "num_blocks": 1,
                   "block_specs": [[4, 8, 3, 2]]},
        "layer1": {"block_name": "convbn",   "num_blocks": 2,
                   "block_specs": [[8, 8, 3, 2], [8, 8, 1, 1]]},
        "layer2": {"block_name": "fused_ib", "num_blocks": 1,
                   "block_specs": [[8, 16, 2, 2.0, True]]},
        "layer3": {"block_name": "uib",      "num_blocks": 1,
                   "block_specs": [[16, 16, 3, 3, True, 1, 2.0]]},
        "layer4": {"block_name": "uib",      "num_blocks": 1,
                   "block_specs": [[16, 24, 0, 3, True, 2, 2.0]]},
    }
}

_VMEM_LIMIT = 32 * 1024 * 1024


def make_divisible(value, divisor, min_value=None, round_down_protect=True):
    if min_value is None:
        min_value = divisor
    new_value = max(min_value, int(value + divisor / 2) // divisor * divisor)
    if round_down_protect and new_value < 0.9 * value:
        new_value += divisor
    return int(new_value)


def _mosaic(*sems):
    return pltpu.CompilerParams(dimension_semantics=sems,
                                vmem_limit_bytes=_VMEM_LIMIT)


def _full_spec(a):
    nd = a.ndim
    return pl.BlockSpec(a.shape, lambda *_, nd=nd: (0,) * nd)


# --------------------------------------------------------------------------
# Pallas kernels
# --------------------------------------------------------------------------
def _matmul_chain_kernel(*refs, acts, has_res):
    """Fused chain of channel-major matmuls: h = W_i @ h + b_i (-> ReLU).

    Inputs/weights arrive in bf16 (MXU 2x throughput, half the DMA bytes);
    accumulation, bias, ReLU and the optional residual stay in f32.
    """
    nst = len(acts)
    h = refs[0][...]
    for i in range(nst):
        w = refs[1 + 2 * i][...]
        b = refs[2 + 2 * i][...]
        h = jnp.dot(w, h.astype(w.dtype), preferred_element_type=jnp.float32) + b
        if acts[i]:
            h = jnp.maximum(h, 0.0)
    if has_res:
        h = h + refs[1 + 2 * nst][...].astype(jnp.float32)
    o_ref = refs[-1]
    o_ref[...] = h.astype(o_ref.dtype)


def _uib_kernel(*refs, k1, k2, s, Hc, Wc, p2, Ho, Wo, Ce, oup, eps,
                has_start, has_res):
    """One whole UniversalInvertedBottleneckBlock (multi-branch) per image.

    Grid is over the batch (parallel).  Stages, all on VMEM scratch:
      1. optional start depthwise (both branches share the single padded
         input; weight halves are indexed in-kernel -- no HBM duplication),
         then the two expand 1x1 convs + ReLU, written into a zero-padded
         scratch ready for the middle depthwise.
      2. both middle depthwise branches fused over concatenated 2*Ce channels
         (the smaller kernel is zero-padded/centered to the larger one),
         + bias + ReLU.
      3. per-branch 1x1 projections (BN + LayerScale folded),
         ChannelSelfAttention (pool -> LayerNorm -> length-1 MHA ==
         out_proj(v_proj(x)) -> Linear+Sigmoid gates -> channel mix) and the
         optional residual, stored once to the output block.
    """
    it = iter(refs)
    x_ref = next(it)
    if has_start:
        ws_ref = next(it); bs_ref = next(it)
        we1_ref = next(it); be1_ref = next(it)
        we2_ref = next(it); be2_ref = next(it)
    else:
        we_ref = next(it); be_ref = next(it)
    wm_ref = next(it); bm_ref = next(it)
    wp1_ref = next(it); bp1_ref = next(it)
    wp2_ref = next(it); bp2_ref = next(it)
    g1_ref = next(it); gb1_ref = next(it); g2_ref = next(it); gb2_ref = next(it)
    wva_ref = next(it); wvb_ref = next(it); bv_ref = next(it)
    wo_ref = next(it); bo_ref = next(it)
    wl1_ref = next(it); bl1_ref = next(it); wl2_ref = next(it); bl2_ref = next(it)
    short_ref = next(it) if has_res else None
    o_ref = next(it)
    xe_ref = next(it)      # VMEM scratch (Hc+2*p2, Wc+2*p2, 2*Ce), pre-padded
    mid_ref = next(it)     # VMEM scratch (Ho*Wo, 2*Ce)

    # ---- stage 1: [start dw] + expand 1x1 + ReLU into padded scratch ------
    xe_ref[...] = jnp.zeros(xe_ref.shape, xe_ref.dtype)
    if has_start:
        a1 = None
        a2 = None
        for kh in range(k1):
            for kw in range(k1):
                t = kh * k1 + kw
                tap = x_ref[0, kh:kh + Hc, kw:kw + Wc, :]          # (Hc, Wc, Cin)
                p1_ = tap * ws_ref[t, 0:1, :]
                p2_ = tap * ws_ref[t, 1:2, :]
                a1 = p1_ if a1 is None else a1 + p1_
                a2 = p2_ if a2 is None else a2 + p2_
        s1 = a1 + bs_ref[0:1, :]                                   # act=False
        s2 = a2 + bs_ref[1:2, :]
        for h in range(Hc):
            r1 = jnp.dot(s1[h], we1_ref[...],
                         preferred_element_type=jnp.float32) + be1_ref[...]
            r2 = jnp.dot(s2[h], we2_ref[...],
                         preferred_element_type=jnp.float32) + be2_ref[...]
            r = jnp.maximum(jnp.concatenate([r1, r2], axis=-1), 0.0)
            xe_ref[p2 + h, p2:p2 + Wc, :] = r
    else:
        for h in range(Hc):
            row = x_ref[0, h, :, :]                                # (Wc, Cin)
            r = jnp.dot(row, we_ref[...],
                        preferred_element_type=jnp.float32) + be_ref[...]
            xe_ref[p2 + h, p2:p2 + Wc, :] = jnp.maximum(r, 0.0)

    # ---- stage 2: fused dual-branch middle depthwise (+bias, ReLU) --------
    if s == 1:
        acc = None
        for kh in range(k2):
            for kw in range(k2):
                tap = xe_ref[kh:kh + Ho, kw:kw + Wo, :]            # (Ho, Wo, 2Ce)
                tv = tap * wm_ref[kh, kw:kw + 1, :]
                acc = tv if acc is None else acc + tv
        v = jnp.maximum(acc + bm_ref[...], 0.0)
        for h in range(Ho):
            mid_ref[h * Wo:(h + 1) * Wo, :] = v[h]
    else:
        # TODO(synk): small-spatial unroll over output positions; fine for
        # MNV4ConvTiny (2x2) but would need a tiled variant at large spatial.
        w3 = wm_ref[...]
        for oh in range(Ho):
            for ow in range(Wo):
                win = xe_ref[s * oh:s * oh + k2, s * ow:s * ow + k2, :]
                r = jnp.sum(win * w3, axis=0)
                r = jnp.sum(r, axis=0, keepdims=True)              # (1, 2Ce)
                pos = oh * Wo + ow
                mid_ref[pos:pos + 1, :] = jnp.maximum(r + bm_ref[...], 0.0)

    # ---- stage 3: projections + ChannelSelfAttention + residual -----------
    midv = mid_ref[...]                                            # (HW, 2Ce)
    y1 = jnp.dot(midv[:, :Ce], wp1_ref[...],
                 preferred_element_type=jnp.float32) + bp1_ref[...]
    y2 = jnp.dot(midv[:, Ce:], wp2_ref[...],
                 preferred_element_type=jnp.float32) + bp2_ref[...]

    s1m = jnp.mean(y1, axis=0, keepdims=True)                      # (1, oup)
    s2m = jnp.mean(y2, axis=0, keepdims=True)
    two_c = 2.0 * oup
    mu = (jnp.sum(s1m) + jnp.sum(s2m)) / two_c
    var = (jnp.sum((s1m - mu) ** 2) + jnp.sum((s2m - mu) ** 2)) / two_c
    inv = jax.lax.rsqrt(var + eps)
    n1 = (s1m - mu) * inv * g1_ref[...] + gb1_ref[...]
    n2 = (s2m - mu) * inv * g2_ref[...] + gb2_ref[...]
    # MHA on a length-1 sequence: softmax over one key == 1 -> out_proj(v_proj(x))
    vv = (jnp.dot(n1, wva_ref[...], preferred_element_type=jnp.float32)
          + jnp.dot(n2, wvb_ref[...], preferred_element_type=jnp.float32)
          + bv_ref[...])
    at = jnp.dot(vv, wo_ref[...], preferred_element_type=jnp.float32) + bo_ref[...]
    a1 = jax.nn.sigmoid(
        jnp.dot(at, wl1_ref[...], preferred_element_type=jnp.float32) + bl1_ref[...])
    a2 = jax.nn.sigmoid(
        jnp.dot(at, wl2_ref[...], preferred_element_type=jnp.float32) + bl2_ref[...])

    out = y1 * a1 + y2 * a2
    if has_res:
        out = out + short_ref[0]
    o_ref[0] = out.astype(o_ref.dtype)


# --------------------------------------------------------------------------
# pallas_call wrappers
# --------------------------------------------------------------------------
def _pick_tile(m):
    """Largest lane-dense tile <= 512 dividing M, preferring >=2 grid blocks
    (v7x megacore) when M allows; full M otherwise."""
    for t in (512, 256, 128):
        if m > t and m % t == 0:
            return t
    return m


def conv_chain_cm(cols, stages, residual=None):
    """Stem conv chain in channel-major layout: cols (K, M) -> stacked
    (BN-folded W @ h + b, ReLU) stages, tiled over the lane-dense M axis."""
    K, M = cols.shape
    TM = _pick_tile(M)
    grid = (M // TM,)
    acts = tuple(bool(a) for (_, _, a) in stages)
    args = [cols.astype(jnp.bfloat16)]
    in_specs = [pl.BlockSpec((K, TM), lambda m: (0, m))]
    for (w, b, _) in stages:
        wc = w.astype(jnp.bfloat16)
        args.append(wc)
        in_specs.append(pl.BlockSpec(wc.shape, lambda m: (0, 0)))
        args.append(b.reshape(-1, 1).astype(jnp.float32))
        in_specs.append(pl.BlockSpec((w.shape[0], 1), lambda m: (0, 0)))
    has_res = residual is not None
    if has_res:
        args.append(residual)
        in_specs.append(pl.BlockSpec((residual.shape[0], TM), lambda m: (0, m)))
    cn = stages[-1][0].shape[0]
    return pl.pallas_call(
        partial(_matmul_chain_kernel, acts=acts, has_res=has_res),
        out_shape=jax.ShapeDtypeStruct((cn, M), jnp.float32),
        grid=grid,
        in_specs=in_specs,
        out_specs=pl.BlockSpec((cn, TM), lambda m: (0, m)),
        compiler_params=_mosaic("parallel"),
    )(*args)


def apply_uib(x_nhwc, p):
    """Whole UIB block as a single pallas_call, gridded over the batch."""
    assert p["kind"] == "uib"
    N, H, W, Cin = x_nhwc.shape
    Ce, oup = p["Ce"], p["oup"]
    k1 = p["start_k"]
    k2 = p["mid_k2"]
    p2 = (k2 - 1) // 2
    s = p["mid_stride"]
    Hc, Wc = H, W                      # start dw (if any) has stride 1 here
    Hp2, Wp2 = Hc + 2 * p2, Wc + 2 * p2
    Ho = (Hc + 2 * p2 - k2) // s + 1
    Wo = (Wc + 2 * p2 - k2) // s + 1
    csa = p["csa"]
    has_res = p["use_res_connect"]

    if k1:
        p1 = (k1 - 1) // 2
        xin = jnp.pad(x_nhwc, ((0, 0), (p1, p1), (p1, p1), (0, 0)))
        args = [xin, p["start_w"], p["start_b"],
                p["exp_w1"], p["exp_b1"], p["exp_w2"], p["exp_b2"]]
    else:
        xin = x_nhwc
        args = [xin, p["exp_w"], p["exp_b"]]
    args += [p["mid_w"], p["mid_b"],
             p["proj1"]["w"], p["proj1"]["b"], p["proj2"]["w"], p["proj2"]["b"],
             csa["g1"], csa["gb1"], csa["g2"], csa["gb2"],
             csa["wva"], csa["wvb"], csa["bv"], csa["wo"], csa["bo"],
             csa["wl1"], csa["bl1"], csa["wl2"], csa["bl2"]]

    in_specs = [pl.BlockSpec((1,) + xin.shape[1:], lambda n: (n, 0, 0, 0))]
    in_specs += [_full_spec(a) for a in args[1:]]
    if has_res:
        args.append(x_nhwc.reshape(N, H * W, Cin))
        in_specs.append(pl.BlockSpec((1, H * W, Cin), lambda n: (n, 0, 0)))

    out = pl.pallas_call(
        partial(_uib_kernel, k1=k1, k2=k2, s=s, Hc=Hc, Wc=Wc, p2=p2,
                Ho=Ho, Wo=Wo, Ce=Ce, oup=oup, eps=1e-5,
                has_start=bool(k1), has_res=has_res),
        out_shape=jax.ShapeDtypeStruct((N, Ho * Wo, oup), jnp.float32),
        grid=(N,),
        in_specs=in_specs,
        out_specs=pl.BlockSpec((1, Ho * Wo, oup), lambda n: (n, 0, 0)),
        scratch_shapes=[pltpu.VMEM((Hp2, Wp2, 2 * Ce), jnp.float32),
                        pltpu.VMEM((Ho * Wo, 2 * Ce), jnp.float32)],
        compiler_params=_mosaic("parallel"),
    )(*args)
    return out.reshape(N, Ho, Wo, oup)


# --------------------------------------------------------------------------
# Deterministic parameter construction (mirrors conv_2d / the nn.Module init;
# eval-mode BatchNorm is folded into conv weights/biases).
# --------------------------------------------------------------------------
class _Keys:
    def __init__(self, seed):
        self._k = jax.random.PRNGKey(seed)

    def __call__(self):
        self._k, sub = jax.random.split(self._k)
        return sub


def _bn_fold(kg, cout):
    gamma = jax.random.uniform(kg(), (cout,), jnp.float32, 0.5, 1.5)
    beta = 0.1 * jax.random.normal(kg(), (cout,), jnp.float32)
    mean = 0.1 * jax.random.normal(kg(), (cout,), jnp.float32)
    var = jax.random.uniform(kg(), (cout,), jnp.float32, 0.5, 1.5)
    scale = gamma / jnp.sqrt(var + 1e-5)
    return scale, beta - mean * scale


def make_dense_conv(kg, inp, oup, kernel_size=3, stride=1, norm=True, act=True):
    k = kernel_size
    w = jax.random.normal(kg(), (k, k, inp, oup), jnp.float32) / math.sqrt(k * k * inp)
    if norm:
        scale, bias = _bn_fold(kg, oup)
    else:
        scale = jnp.ones((oup,), jnp.float32)
        bias = jnp.zeros((oup,), jnp.float32)
    w = w * scale                                   # fold eval-mode BN
    w2d = w.reshape(k * k * inp, oup).T             # (oup, k*k*inp)
    return dict(kind="conv", k=k, stride=stride, act=bool(act), w2d=w2d, bias=bias)


def make_dw_conv(kg, ch, kernel_size, stride, norm=True, act=True):
    k = kernel_size
    w = jax.random.normal(kg(), (k, k, ch), jnp.float32) / math.sqrt(k * k)
    if norm:
        scale, bias = _bn_fold(kg, ch)
    else:
        scale = jnp.ones((ch,), jnp.float32)
        bias = jnp.zeros((ch,), jnp.float32)
    w = w * scale
    return dict(kind="dw", k=k, stride=stride, act=bool(act),
                w=w.reshape(k * k, ch), bias=bias)


def make_channel_self_attention(kg, oup):
    c = 2 * oup

    def lin_t(nin, nout):                           # stores W^T (in, out)
        w = jax.random.normal(kg(), (nin, nout), jnp.float32) / math.sqrt(nin)
        b = 0.1 * jax.random.normal(kg(), (nout,), jnp.float32)
        return w, b.reshape(1, nout)

    ln_g = jax.random.uniform(kg(), (c,), jnp.float32, 0.5, 1.5)
    ln_b = 0.1 * jax.random.normal(kg(), (c,), jnp.float32)
    wv, bv = lin_t(c, c)      # MHA value projection
    wo, bo = lin_t(c, c)      # MHA output projection
    wl, bl = lin_t(c, c)      # proj Linear (+ Sigmoid)
    return dict(g1=ln_g[:oup].reshape(1, -1), g2=ln_g[oup:].reshape(1, -1),
                gb1=ln_b[:oup].reshape(1, -1), gb2=ln_b[oup:].reshape(1, -1),
                wva=wv[:oup, :], wvb=wv[oup:, :], bv=bv,
                wo=wo, bo=bo,
                wl1=wl[:, :oup], bl1=bl[:, :oup],
                wl2=wl[:, oup:], bl2=bl[:, oup:])


def make_uib(kg, inp, oup, start_dw_kernel_size, middle_dw_kernel_size,
             middle_dw_downsample, stride, expand_ratio, use_layer_scale=False):
    Ce = make_divisible(inp * expand_ratio, 8)
    assert middle_dw_kernel_size > 0
    k1 = start_dw_kernel_size
    kmid1 = middle_dw_kernel_size
    kmid2 = min(middle_dw_kernel_size + 2, 7)
    k2 = max(kmid1, kmid2)
    s_start = stride if not middle_dw_downsample else 1
    s_mid = stride if middle_dw_downsample else 1

    def branch(mid_k):
        b = {}
        if k1:
            b["start"] = make_dw_conv(kg, inp, k1, s_start, act=False)
        b["exp"] = make_dense_conv(kg, inp, Ce, 1, 1)
        b["mid"] = make_dw_conv(kg, Ce, mid_k, s_mid, act=True)
        b["proj"] = make_dense_conv(kg, Ce, oup, 1, 1, act=False)
        return b

    b1 = branch(kmid1)
    b2 = branch(kmid2)

    p = dict(kind="uib", inp=inp, oup=oup, Ce=Ce,
             start_k=k1, start_s=s_start, mid_k2=k2, mid_stride=s_mid,
             use_res_connect=(inp == oup and stride == 1))
    if k1:
        # TODO(synk): strided start-dw (middle_dw_downsample=False, stride>1)
        # is not exercised by MNV4ConvTiny.
        assert s_start == 1
        p["start_w"] = jnp.stack([b1["start"]["w"], b2["start"]["w"]], axis=1)   # (k1*k1, 2, inp)
        p["start_b"] = jnp.stack([b1["start"]["bias"], b2["start"]["bias"]], axis=0)  # (2, inp)
        p["exp_w1"] = b1["exp"]["w2d"].T                                         # (inp, Ce)
        p["exp_b1"] = b1["exp"]["bias"].reshape(1, -1)
        p["exp_w2"] = b2["exp"]["w2d"].T
        p["exp_b2"] = b2["exp"]["bias"].reshape(1, -1)
    else:
        p["exp_w"] = jnp.concatenate([b1["exp"]["w2d"].T, b2["exp"]["w2d"].T], axis=1)  # (inp, 2Ce)
        p["exp_b"] = jnp.concatenate([b1["exp"]["bias"], b2["exp"]["bias"]]).reshape(1, -1)

    # Middle dw: zero-pad branch1's kernel to k2 x k2 (centered -> identical
    # conv with the larger padding) and concatenate channels so both branches
    # share one tap loop over 2*Ce lanes.
    def mid3d(br, kk):
        w = br["mid"]["w"].reshape(kk, kk, Ce)
        off = (k2 - kk) // 2
        wfull = jnp.zeros((k2, k2, Ce), jnp.float32)
        wfull = wfull.at[off:off + kk, off:off + kk, :].set(w)
        return wfull

    p["mid_w"] = jnp.concatenate([mid3d(b1, kmid1), mid3d(b2, kmid2)], axis=-1)  # (k2,k2,2Ce)
    p["mid_b"] = jnp.concatenate([b1["mid"]["bias"], b2["mid"]["bias"]]).reshape(1, -1)

    def proj_params(br):
        w = br["proj"]["w2d"].T                               # (Ce, oup)
        b = br["proj"]["bias"]
        if use_layer_scale:                                   # fold MNV4LayerScale
            g = 1e-5 * jnp.ones((oup,), jnp.float32)
            w = w * g[None, :]
            b = b * g
        return dict(w=w, b=b.reshape(1, -1))

    p["proj1"], p["proj2"] = proj_params(b1), proj_params(b2)
    p["csa"] = make_channel_self_attention(kg, oup)
    return p


def make_fused_ib(kg, inp, oup, stride, expand_ratio, act=False):
    hidden = int(round(inp * expand_ratio))
    convs = []
    if expand_ratio != 1:
        convs.append(make_dense_conv(kg, inp, hidden, 3, stride))
    # TODO(synk): squeeze_excitation branch of InvertedResidual is never enabled by build_blocks.
    convs.append(make_dense_conv(kg, hidden, oup, 1, 1, act=act))
    return dict(kind="fused_ib", convs=convs,
                use_res_connect=(stride == 1 and inp == oup))


def build_blocks_params(kg, layer_spec):
    if not layer_spec.get("block_name"):
        return []
    name = layer_spec["block_name"]
    blocks = []
    if name == "convbn":
        for i in range(layer_spec["num_blocks"]):
            specs = layer_spec["block_specs"][i]
            if isinstance(specs, list):
                inp, oup, k, stride = specs
                c = make_dense_conv(kg, inp, oup, k, stride)
                if (blocks and blocks[-1]["kind"] == "convchain"
                        and c["k"] == 1 and c["stride"] == 1):
                    blocks[-1]["convs"].append(c)      # fuse trailing 1x1 convs
                else:
                    blocks.append(dict(kind="convchain", convs=[c]))
            elif specs == "AdaptiveAvgPool2d":
                blocks.append(dict(kind="gap"))
            else:
                raise NotImplementedError
    elif name == "uib":
        schema = ["inp", "oup", "start_dw_kernel_size", "middle_dw_kernel_size",
                  "middle_dw_downsample", "stride", "expand_ratio",
                  "use_layer_scale", "mhsa"]
        for i in range(layer_spec["num_blocks"]):
            args = dict(zip(schema, layer_spec["block_specs"][i]))
            args.pop("mhsa", None)
            # TODO(synk): mhsa / MultiQueryAttention path is not exercised by MNV4ConvTiny.
            blocks.append(make_uib(kg, **args))
    elif name == "fused_ib":
        schema = ["inp", "oup", "stride", "expand_ratio", "act"]
        for i in range(layer_spec["num_blocks"]):
            blocks.append(make_fused_ib(kg, **dict(zip(schema, layer_spec["block_specs"][i]))))
    else:
        raise NotImplementedError
    return blocks


# --------------------------------------------------------------------------
# Forward glue.  Stem state = (x_cm (C, N*H*W), N, H, W); UIBs flow NHWC.
# --------------------------------------------------------------------------
def _im2col_cm(x_cm, N, H, W, k, s):
    # TODO(synk): the 3 small stem kxk convs still form their taps via XLA
    # (<=75 KB total); UIB depthwise taps are formed in-kernel.
    C = x_cm.shape[0]
    p = (k - 1) // 2
    Ho = (H + 2 * p - k) // s + 1
    Wo = (W + 2 * p - k) // s + 1
    x4 = x_cm.reshape(C, N, H, W)
    xp = jnp.pad(x4, ((0, 0), (0, 0), (p, p), (p, p)))
    taps = [xp[:, :, kh:kh + s * (Ho - 1) + 1:s, kw:kw + s * (Wo - 1) + 1:s]
            .reshape(C, N * Ho * Wo)
            for kh in range(k) for kw in range(k)]
    return jnp.concatenate(taps, axis=0), Ho, Wo


def apply_convchain(state, convs, residual_cm=None):
    x_cm, N, H, W = state
    for c in convs[1:]:
        assert c["k"] == 1 and c["stride"] == 1
    c0 = convs[0]
    if c0["k"] == 1 and c0["stride"] == 1:
        cols, Ho, Wo = x_cm, H, W
    else:
        cols, Ho, Wo = _im2col_cm(x_cm, N, H, W, c0["k"], c0["stride"])
    stages = [(c["w2d"], c["bias"], c["act"]) for c in convs]
    y = conv_chain_cm(cols, stages, residual=residual_cm)
    return (y, N, Ho, Wo)


def apply_stem_block(state, blk):
    kind = blk["kind"]
    if kind == "convchain":
        return apply_convchain(state, blk["convs"])
    if kind == "fused_ib":
        res = state[0] if blk["use_res_connect"] else None
        return apply_convchain(state, blk["convs"], residual_cm=res)
    if kind == "gap":
        x_cm, N, H, W = state
        # TODO(synk): AdaptiveAvgPool2d convbn entry not exercised by MNV4ConvTiny; plain-JAX mean.
        pooled = jnp.mean(x_cm.reshape(x_cm.shape[0], N, H * W), axis=-1)
        return (pooled, N, 1, 1)
    raise NotImplementedError(kind)


def init_mobilenet_v4(model="MNV4ConvTiny", seed=0):
    assert model in MODEL_SPECS
    kg = _Keys(seed)
    spec = MODEL_SPECS[model]
    return {name: build_blocks_params(kg, spec[name])
            for name in ("conv0", "layer1", "layer2", "layer3", "layer4")}


def mobilenet_v4_forward(params, x_nchw):
    Nb, Cin, H, W = x_nchw.shape
    x_cm = jnp.transpose(x_nchw.astype(jnp.float32),
                         (1, 0, 2, 3)).reshape(Cin, Nb * H * W)

    s0 = (x_cm, Nb, H, W)
    for blk in params["conv0"]:
        s0 = apply_stem_block(s0, blk)
    s1 = s0
    for blk in params["layer1"]:
        s1 = apply_stem_block(s1, blk)
    s2 = s1
    for blk in params["layer2"]:
        s2 = apply_stem_block(s2, blk)

    # single tiny relayout at the stem -> UIB boundary
    cm2, n2, h2, w2 = s2
    x_nhwc = jnp.transpose(cm2.reshape(cm2.shape[0], n2, h2, w2), (1, 2, 3, 0))

    x3 = x_nhwc
    for blk in params["layer3"]:
        x3 = apply_uib(x3, blk)
    x4 = x3
    for blk in params["layer4"]:
        x4 = apply_uib(x4, blk)

    def cm_to_nchw(st):
        cm, n, h, w = st
        return jnp.transpose(cm.reshape(cm.shape[0], n, h, w), (1, 0, 2, 3))

    return (cm_to_nchw(s1), cm_to_nchw(s2),
            jnp.transpose(x3, (0, 3, 1, 2)), jnp.transpose(x4, (0, 3, 1, 2)))


if __name__ == "__main__":
    params = init_mobilenet_v4("MNV4ConvTiny", seed=0)
    x = jax.random.normal(jax.random.PRNGKey(0), (2, 4, 32, 32), jnp.float32)

    fwd = jax.jit(lambda inp: mobilenet_v4_forward(params, inp))
    outs = jax.block_until_ready(fwd(x))

    assert outs[0].shape == (2, 8, 8, 8)
    assert outs[1].shape == (2, 16, 4, 4)
    assert outs[2].shape == (2, 16, 4, 4)
    assert outs[3].shape == (2, 24, 2, 2)
    assert all(bool(jnp.all(jnp.isfinite(o))) for o in outs)
    print("KERNEL_OK")
</pallas_src>

<mosaic_0001>
module attributes {stable_mosaic.version = 11 : i64} {
  func.func @_matmul_chain_kernel(%arg0: i32, %arg1: memref<36x256xbf16, #tpu.memory_space<vmem>>, %arg2: memref<8x36xbf16, #tpu.memory_space<vmem>>, %arg3: memref<8x1xf32, #tpu.memory_space<vmem>>, %arg4: memref<8x256xf32, #tpu.memory_space<vmem>>) attributes {dimension_semantics = [#tpu.dimension_semantics<parallel>], iteration_bounds = array<i64: 2>, scalar_prefetch = 0 : i64, scratch_operands = 0 : i64, tpu.core_type = #tpu.core_type<tc>, window_params = [{transform_indices = @transform_0, window_bounds = array<i64: 36, 256>}, {pipeline_mode = #tpu.pipeline_mode<synchronous>, transform_indices = @transform_1, window_bounds = array<i64: 8, 36>}, {pipeline_mode = #tpu.pipeline_mode<synchronous>, transform_indices = @transform_2, window_bounds = array<i64: 8, 1>}, {transform_indices = @transform_3, window_bounds = array<i64: 8, 256>}]} {
    %c0 = arith.constant 0 : index
    %c0_0 = arith.constant 0 : index
    %0 = vector.load %arg1[%c0, %c0_0] : memref<36x256xbf16, #tpu.memory_space<vmem>>, vector<36x256xbf16>
    %c0_1 = arith.constant 0 : index
    %c0_2 = arith.constant 0 : index
    %1 = vector.load %arg2[%c0_1, %c0_2] : memref<8x36xbf16, #tpu.memory_space<vmem>>, vector<8x36xbf16>
    %c0_3 = arith.constant 0 : index
    %c0_4 = arith.constant 0 : index
    %2 = vector.load %arg3[%c0_3, %c0_4] : memref<8x1xf32, #tpu.memory_space<vmem>>, vector<8x1xf32>
    %cst = arith.constant dense<0.000000e+00> : vector<8x256xf32>
    %3 = tpu.matmul %1, %0, %cst {dimension_numbers = #tpu.dot_dimension_numbers<[1], [0], [0], [1], [0, 0, 1, 1], [], []>} : vector<8x36xbf16>, vector<36x256xbf16>, vector<8x256xf32> -> vector<8x256xf32>
    %4 = vector.broadcast %2 : vector<8x1xf32> to vector<8x256xf32>
    %5 = arith.addf %3, %4 : vector<8x256xf32>
    %cst_5 = arith.constant 0.000000e+00 : f32
    %6 = vector.broadcast %cst_5 : f32 to vector<8x256xf32>
    %7 = arith.maximumf %5, %6 : vector<8x256xf32>
    %c0_6 = arith.constant 0 : index
    %c0_7 = arith.constant 0 : index
    %8 = vector.load %arg4[%c0_6, %c0_7] : memref<8x256xf32, #tpu.memory_space<vmem>>, vector<8x256xf32>
    tpu.vector_store %arg4[%c0_6, %c0_7], %7 {strides = array<i32>} : memref<8x256xf32, #tpu.memory_space<vmem>>, vector<8x256xf32>,
    return
  }
  func.func @transform_0(%arg0: i32) -> (i32, i32) {
    %c0_i32 = arith.constant 0 : i32
    %c0_i32_0 = arith.constant 0 : i32
    return %c0_i32, %arg0 : i32, i32
  }
  func.func @transform_1(%arg0: i32) -> (i32, i32) {
    %c0_i32 = arith.constant 0 : i32
    %c0_i32_0 = arith.constant 0 : i32
    %c0_i32_1 = arith.constant 0 : i32
    return %c0_i32, %c0_i32_0 : i32, i32
  }
  func.func @transform_2(%arg0: i32) -> (i32, i32) {
    %c0_i32 = arith.constant 0 : i32
    %c0_i32_0 = arith.constant 0 : i32
    %c0_i32_1 = arith.constant 0 : i32
    return %c0_i32, %c0_i32_0 : i32, i32
  }
  func.func @transform_3(%arg0: i32) -> (i32, i32) {
    %c0_i32 = arith.constant 0 : i32
    %c0_i32_0 = arith.constant 0 : i32
    return %c0_i32, %arg0 : i32, i32
  }
}

module attributes {stable_mosaic.version = 11 : i64} {
  func.func @_matmul_chain_kernel(%arg0: i32, %arg1: memref<72x128xbf16, #tpu.memory_space<vmem>>, %arg2: memref<8x72xbf16, #tpu.memory_space<vmem>>, %arg3: memref<8x1xf32, #tpu.memory_space<vmem>>, %arg4: memref<8x8xbf16, #tpu.memory_space<vmem>>, %arg5: memref<8x1xf32, #tpu.memory_space<vmem>>, %arg6: memref<8x128xf32, #tpu.memory_space<vmem>>) attributes {dimension_semantics = [#tpu.dimension_semantics<parallel>], iteration_bounds = array<i64: 1>, scalar_prefetch = 0 : i64, scratch_operands = 0 : i64, tpu.core_type = #tpu.core_type<tc>, window_params = [{transform_indices = @transform_0, window_bounds = array<i64: 72, 128>}, {pipeline_mode = #tpu.pipeline_mode<synchronous>, transform_indices = @transform_1, window_bounds = array<i64: 8, 72>}, {pipeline_mode = #tpu.pipeline_mode<synchronous>, transform_indices = @transform_2, window_bounds = array<i64: 8, 1>}, {pipeline_mode = #tpu.pipeline_mode<synchronous>, transform_indices = @transform_3, window_bounds = array<i64: 8, 8>}, {pipeline_mode = #tpu.pipeline_mode<synchronous>, transform_indices = @transform_4, window_bounds = array<i64: 8, 1>}, {transform_indices = @transform_5, window_bounds = array<i64: 8, 128>}]} {
    %c0 = arith.constant 0 : index
    %c0_0 = arith.constant 0 : index
    %0 = vector.load %arg1[%c0, %c0_0] : memref<72x128xbf16, #tpu.memory_space<vmem>>, vector<72x128xbf16>
    %c0_1 = arith.constant 0 : index
    %c0_2 = arith.constant 0 : index
    %1 = vector.load %arg2[%c0_1, %c0_2] : memref<8x72xbf16, #tpu.memory_space<vmem>>, vector<8x72xbf16>
    %c0_3 = arith.constant 0 : index
    %c0_4 = arith.constant 0 : index
    %2 = vector.load %arg3[%c0_3, %c0_4] : memref<8x1xf32, #tpu.memory_space<vmem>>, vector<8x1xf32>
    %cst = arith.constant dense<0.000000e+00> : vector<8x128xf32>
    %3 = tpu.matmul %1, %0, %cst {dimension_numbers = #tpu.dot_dimension_numbers<[1], [0], [0], [1], [0, 0, 1, 1], [], []>} : vector<8x72xbf16>, vector<72x128xbf16>, vector<8x128xf32> -> vector<8x128xf32>
    %4 = vector.broadcast %2 : vector<8x1xf32> to vector<8x128xf32>
    %5 = arith.addf %3, %4 : vector<8x128xf32>
    %cst_5 = arith.constant 0.000000e+00 : f32
    %6 = vector.broadcast %cst_5 : f32 to vector<8x128xf32>
    %7 = arith.maximumf %5, %6 : vector<8x128xf32>
    %c0_6 = arith.constant 0 : index
    %c0_7 = arith.constant 0 : index
    %8 = vector.load %arg4[%c0_6, %c0_7] : memref<8x8xbf16, #tpu.memory_space<vmem>>, vector<8x8xbf16>
    %c0_8 = arith.constant 0 : index
    %c0_9 = arith.constant 0 : index
    %9 = vector.load %arg5[%c0_8, %c0_9] : memref<8x1xf32, #tpu.memory_space<vmem>>, vector<8x1xf32>
    %10 = arith.truncf %7 : vector<8x128xf32> to vector<8x128xbf16>
    %cst_10 = arith.constant dense<0.000000e+00> : vector<8x128xf32>
    %11 = tpu.matmul %8, %10, %cst_10 {dimension_numbers = #tpu.dot_dimension_numbers<[1], [0], [0], [1], [0, 0, 1, 1], [], []>} : vector<8x8xbf16>, vector<8x128xbf16>, vector<8x128xf32> -> vector<8x128xf32>
    %12 = vector.broadcast %9 : vector<8x1xf32> to vector<8x128xf32>
    %13 = arith.addf %11, %12 : vector<8x128xf32>
    %cst_11 = arith.constant 0.000000e+00 : f32
    %14 = vector.broadcast %cst_11 : f32 to vector<8x128xf32>
    %15 = arith.maximumf %13, %14 : vector<8x128xf32>
    %c0_12 = arith.constant 0 : index
    %c0_13 = arith.constant 0 : index
    %16 = vector.load %arg6[%c0_12, %c0_13] : memref<8x128xf32, #tpu.memory_space<vmem>>, vector<8x128xf32>
    tpu.vector_store %arg6[%c0_12, %c0_13], %15 {strides = array<i32>} : memref<8x128xf32, #tpu.memory_space<vmem>>, vector<8x128xf32>,
    return
  }
  func.func @transform_0(%arg0: i32) -> (i32, i32) {
    %c0_i32 = arith.constant 0 : i32
    %c0_i32_0 = arith.constant 0 : i32
    return %c0_i32, %arg0 : i32, i32
  }
  func.func @transform_1(%arg0: i32) -> (i32, i32) {
    %c0_i32 = arith.constant 0 : i32
    %c0_i32_0 = arith.constant 0 : i32
    %c0_i32_1 = arith.constant 0 : i32
    return %c0_i32, %c0_i32_0 : i32, i32
  }
  func.func @transform_2(%arg0: i32) -> (i32, i32) {
    %c0_i32 = arith.constant 0 : i32
    %c0_i32_0 = arith.constant 0 : i32
    %c0_i32_1 = arith.constant 0 : i32
    return %c0_i32, %c0_i32_0 : i32, i32
  }
  func.func @transform_3(%arg0: i32) -> (i32, i32) {
    %c0_i32 = arith.constant 0 : i32
    %c0_i32_0 = arith.constant 0 : i32
    %c0_i32_1 = arith.constant 0 : i32
    return %c0_i32, %c0_i32_0 : i32, i32
  }
  func.func @transform_4(%arg0: i32) -> (i32, i32) {
    %c0_i32 = arith.constant 0 : i32
    %c0_i32_0 = arith.constant 0 : i32
    %c0_i32_1 = arith.constant 0 : i32
    return %c0_i32, %c0_i32_0 : i32, i32
  }
  func.func @transform_5(%arg0: i32) -> (i32, i32) {
    %c0_i32 = arith.constant 0 : i32
    %c0_i32_0 = arith.constant 0 : i32
    return %c0_i32, %arg0 : i32, i32
  }
}

module attributes {stable_mosaic.version = 11 : i64} {
  func.func @_matmul_chain_kernel(%arg0: i32, %arg1: memref<72x32xbf16, #tpu.memory_space<vmem>>, %arg2: memref<16x72xbf16, #tpu.memory_space<vmem>>, %arg3: memref<16x1xf32, #tpu.memory_space<vmem>>, %arg4: memref<16x16xbf16, #tpu.memory_space<vmem>>, %arg5: memref<16x1xf32, #tpu.memory_space<vmem>>, %arg6: memref<16x32xf32, #tpu.memory_space<vmem>>) attributes {dimension_semantics = [#tpu.dimension_semantics<parallel>], iteration_bounds = array<i64: 1>, scalar_prefetch = 0 : i64, scratch_operands = 0 : i64, tpu.core_type = #tpu.core_type<tc>, window_params = [{transform_indices = @transform_0, window_bounds = array<i64: 72, 32>}, {pipeline_mode = #tpu.pipeline_mode<synchronous>, transform_indices = @transform_1, window_bounds = array<i64: 16, 72>}, {pipeline_mode = #tpu.pipeline_mode<synchronous>, transform_indices = @transform_2, window_bounds = array<i64: 16, 1>}, {pipeline_mode = #tpu.pipeline_mode<synchronous>, transform_indices = @transform_3, window_bounds = array<i64: 16, 16>}, {pipeline_mode = #tpu.pipeline_mode<synchronous>, transform_indices = @transform_4, window_bounds = array<i64: 16, 1>}, {transform_indices = @transform_5, window_bounds = array<i64: 16, 32>}]} {
    %c0 = arith.constant 0 : index
    %c0_0 = arith.constant 0 : index
    %0 = vector.load %arg1[%c0, %c0_0] : memref<72x32xbf16, #tpu.memory_space<vmem>>, vector<72x32xbf16>
    %c0_1 = arith.constant 0 : index
    %c0_2 = arith.constant 0 : index
    %1 = vector.load %arg2[%c0_1, %c0_2] : memref<16x72xbf16, #tpu.memory_space<vmem>>, vector<16x72xbf16>
    %c0_3 = arith.constant 0 : index
    %c0_4 = arith.constant 0 : index
    %2 = vector.load %arg3[%c0_3, %c0_4] : memref<16x1xf32, #tpu.memory_space<vmem>>, vector<16x1xf32>
    %cst = arith.constant dense<0.000000e+00> : vector<16x32xf32>
    %3 = tpu.matmul %1, %0, %cst {dimension_numbers = #tpu.dot_dimension_numbers<[1], [0], [0], [1], [0, 0, 1, 1], [], []>} : vector<16x72xbf16>, vector<72x32xbf16>, vector<16x32xf32> -> vector<16x32xf32>
    %4 = vector.broadcast %2 : vector<16x1xf32> to vector<16x32xf32>
    %5 = arith.addf %3, %4 : vector<16x32xf32>
    %cst_5 = arith.constant 0.000000e+00 : f32
    %6 = vector.broadcast %cst_5 : f32 to vector<16x32xf32>
    %7 = arith.maximumf %5, %6 : vector<16x32xf32>
    %c0_6 = arith.constant 0 : index
    %c0_7 = arith.constant 0 : index
    %8 = vector.load %arg4[%c0_6, %c0_7] : memref<16x16xbf16, #tpu.memory_space<vmem>>, vector<16x16xbf16>
    %c0_8 = arith.constant 0 : index
    %c0_9 = arith.constant 0 : index
    %9 = vector.load %arg5[%c0_8, %c0_9] : memref<16x1xf32, #tpu.memory_space<vmem>>, vector<16x1xf32>
    %10 = arith.truncf %7 : vector<16x32xf32> to vector<16x32xbf16>
    %cst_10 = arith.constant dense<0.000000e+00> : vector<16x32xf32>
    %11 = tpu.matmul %8, %10, %cst_10 {dimension_numbers = #tpu.dot_dimension_numbers<[1], [0], [0], [1], [0, 0, 1, 1], [], []>} : vector<16x16xbf16>, vector<16x32xbf16>, vector<16x32xf32> -> vector<16x32xf32>
    %12 = vector.broadcast %9 : vector<16x1xf32> to vector<16x32xf32>
    %13 = arith.addf %11, %12 : vector<16x32xf32>
    %cst_11 = arith.constant 0.000000e+00 : f32
    %14 = vector.broadcast %cst_11 : f32 to vector<16x32xf32>
    %15 = arith.maximumf %13, %14 : vector<16x32xf32>
    %c0_12 = arith.constant 0 : index
    %c0_13 = arith.constant 0 : index
    %16 = vector.load %arg6[%c0_12, %c0_13] : memref<16x32xf32, #tpu.memory_space<vmem>>, vector<16x32xf32>
    tpu.vector_store %arg6[%c0_12, %c0_13], %15 {strides = array<i32>} : memref<16x32xf32, #tpu.memory_space<vmem>>, vector<16x32xf32>,
    return
  }
  func.func @transform_0(%arg0: i32) -> (i32, i32) {
    %c0_i32 = arith.constant 0 : i32
    %c0_i32_0 = arith.constant 0 : i32
    return %c0_i32, %arg0 : i32, i32
  }
  func.func @transform_1(%arg0: i32) -> (i32, i32) {
    %c0_i32 = arith.constant 0 : i32
    %c0_i32_0 = arith.constant 0 : i32
    %c0_i32_1 = arith.constant 0 : i32
    return %c0_i32, %c0_i32_0 : i32, i32
  }
  func.func @transform_2(%arg0: i32) -> (i32, i32) {
    %c0_i32 = arith.constant 0 : i32
    %c0_i32_0 = arith.constant 0 : i32
    %c0_i32_1 = arith.constant 0 : i32
    return %c0_i32, %c0_i32_0 : i32, i32
  }
  func.func @transform_3(%arg0: i32) -> (i32, i32) {
    %c0_i32 = arith.constant 0 : i32
    %c0_i32_0 = arith.constant 0 : i32
    %c0_i32_1 = arith.constant 0 : i32
    return %c0_i32, %c0_i32_0 : i32, i32
  }
  func.func @transform_4(%arg0: i32) -> (i32, i32) {
    %c0_i32 = arith.constant 0 : i32
    %c0_i32_0 = arith.constant 0 : i32
    %c0_i32_1 = arith.constant 0 : i32
    return %c0_i32, %c0_i32_0 : i32, i32
  }
  func.func @transform_5(%arg0: i32) -> (i32, i32) {
    %c0_i32 = arith.constant 0 : i32
    %c0_i32_0 = arith.constant 0 : i32
    return %c0_i32, %arg0 : i32, i32
  }
}

module attributes {stable_mosaic.version = 11 : i64} {
  func.func @_uib_kernel(%arg0: i32, %arg1: memref<1x4x4x16xf32, #tpu.memory_space<vmem>>, %arg2: memref<16x64xf32, #tpu.memory_space<vmem>>, %arg3: memref<1x64xf32, #tpu.memory_space<vmem>>, %arg4: memref<5x5x64xf32, #tpu.memory_space<vmem>>, %arg5: memref<1x64xf32, #tpu.memory_space<vmem>>, %arg6: memref<32x24xf32, #tpu.memory_space<vmem>>, %arg7: memref<1x24xf32, #tpu.memory_space<vmem>>, %arg8: memref<32x24xf32, #tpu.memory_space<vmem>>, %arg9: memref<1x24xf32, #tpu.memory_space<vmem>>, %arg10: memref<1x24xf32, #tpu.memory_space<vmem>>, %arg11: memref<1x24xf32, #tpu.memory_space<vmem>>, %arg12: memref<1x24xf32, #tpu.memory_space<vmem>>, %arg13: memref<1x24xf32, #tpu.memory_space<vmem>>, %arg14: memref<24x48xf32, #tpu.memory_space<vmem>>, %arg15: memref<24x48xf32, #tpu.memory_space<vmem>>, %arg16: memref<1x48xf32, #tpu.memory_space<vmem>>, %arg17: memref<48x48xf32, #tpu.memory_space<vmem>>, %arg18: memref<1x48xf32, #tpu.memory_space<vmem>>, %arg19: memref<48x24xf32, #tpu.memory_space<vmem>>, %arg20: memref<1x24xf32, #tpu.memory_space<vmem>>, %arg21: memref<48x24xf32, #tpu.memory_space<vmem>>, %arg22: memref<1x24xf32, #tpu.memory_space<vmem>>, %arg23: memref<1x4x24xf32, #tpu.memory_space<vmem>>, %arg24: memref<8x8x64xf32, #tpu.memory_space<vmem>>, %arg25: memref<4x64xf32, #tpu.memory_space<vmem>>) attributes {dimension_semantics = [#tpu.dimension_semantics<parallel>], iteration_bounds = array<i64: 2>, scalar_prefetch = 0 : i64, scratch_operands = 2 : i64, tpu.core_type = #tpu.core_type<tc>, window_params = [{transform_indices = @transform_0, window_bounds = array<i64: 1, 4, 4, 16>}, {pipeline_mode = #tpu.pipeline_mode<synchronous>, transform_indices = @transform_1, window_bounds = array<i64: 16, 64>}, {pipeline_mode = #tpu.pipeline_mode<synchronous>, transform_indices = @transform_2, window_bounds = array<i64: 1, 64>}, {pipeline_mode = #tpu.pipeline_mode<synchronous>, transform_indices = @transform_3, window_bounds = array<i64: 5, 5, 64>}, {pipeline_mode = #tpu.pipeline_mode<synchronous>, transform_indices = @transform_4, window_bounds = array<i64: 1, 64>}, {pipeline_mode = #tpu.pipeline_mode<synchronous>, transform_indices = @transform_5, window_bounds = array<i64: 32, 24>}, {pipeline_mode = #tpu.pipeline_mode<synchronous>, transform_indices = @transform_6, window_bounds = array<i64: 1, 24>}, {pipeline_mode = #tpu.pipeline_mode<synchronous>, transform_indices = @transform_7, window_bounds = array<i64: 32, 24>}, {pipeline_mode = #tpu.pipeline_mode<synchronous>, transform_indices = @transform_8, window_bounds = array<i64: 1, 24>}, {pipeline_mode = #tpu.pipeline_mode<synchronous>, transform_indices = @transform_9, window_bounds = array<i64: 1, 24>}, {pipeline_mode = #tpu.pipeline_mode<synchronous>, transform_indices = @transform_10, window_bounds = array<i64: 1, 24>}, {pipeline_mode = #tpu.pipeline_mode<synchronous>, transform_indices = @transform_11, window_bounds = array<i64: 1, 24>}, {pipeline_mode = #tpu.pipeline_mode<synchronous>, transform_indices = @transform_12, window_bounds = array<i64: 1, 24>}, {pipeline_mode = #tpu.pipeline_mode<synchronous>, transform_indices = @transform_13, window_bounds = array<i64: 24, 48>}, {pipeline_mode = #tpu.pipeline_mode<synchronous>, transform_indices = @transform_14, window_bounds = array<i64: 24, 48>}, {pipeline_mode = #tpu.pipeline_mode<synchronous>, transform_indices = @transform_15, window_bounds = array<i64: 1, 48>}, {pipeline_mode = #tpu.pipeline_mode<synchronous>, transform_indices = @transform_16, window_bounds = array<i64: 48, 48>}, {pipeline_mode = #tpu.pipeline_mode<synchronous>, transform_indices = @transform_17, window_bounds = array<i64: 1, 48>}, {pipeline_mode = #tpu.pipeline_mode<synchronous>, transform_indices = @transform_18, window_bounds = array<i64: 48, 24>}, {pipeline_mode = #tpu.pipeline_mode<synchronous>, transform_indices = @transform_19, window_bounds = array<i64: 1, 24>}, {pipeline_mode = #tpu.pipeline_mode<synchronous>, transform_indices = @transform_20, window_bounds = array<i64: 48, 24>}, {pipeline_mode = #tpu.pipeline_mode<synchronous>, transform_indices = @transform_21, window_bounds = array<i64: 1, 24>}, {transform_indices = @transform_22, window_bounds = array<i64: 1, 4, 24>}]} {
    %cst = arith.constant 0.000000e+00 : f32
    %0 = vector.broadcast %cst : f32 to vector<8x8x64xf32>
    %c0 = arith.constant 0 : index
    %c0_0 = arith.constant 0 : index
    %c0_1 = arith.constant 0 : index
    %1 = vector.load %arg24[%c0, %c0_0, %c0_1] : memref<8x8x64xf32, #tpu.memory_space<vmem>>, vector<8x8x64xf32>
    tpu.vector_store %arg24[%c0, %c0_0, %c0_1], %0 {strides = array<i32>} : memref<8x8x64xf32, #tpu.memory_space<vmem>>, vector<8x8x64xf32>,
    %c0_2 = arith.constant 0 : index
    %c0_3 = arith.constant 0 : index
    %c0_4 = arith.constant 0 : index
    %c0_5 = arith.constant 0 : index
    %2 = vector.load %arg1[%c0_2, %c0_3, %c0_4, %c0_5] : memref<1x4x4x16xf32, #tpu.memory_space<vmem>>, vector<1x1x4x16xf32>
    %3 = vector.shape_cast %2 : vector<1x1x4x16xf32> to vector<4x16xf32>
    %c0_6 = arith.constant 0 : index
    %c0_7 = arith.constant 0 : index
    %4 = vector.load %arg2[%c0_6, %c0_7] : memref<16x64xf32, #tpu.memory_space<vmem>>, vector<16x64xf32>
    %cst_8 = arith.constant dense<0.000000e+00> : vector<4x64xf32>
    %5 = tpu.matmul %3, %4, %cst_8 {dimension_numbers = #tpu.dot_dimension_numbers<[1], [0], [0], [1], [0, 0, 1, 1], [], []>} : vector<4x16xf32>, vector<16x64xf32>, vector<4x64xf32> -> vector<4x64xf32>
    %c0_9 = arith.constant 0 : index
    %c0_10 = arith.constant 0 : index
    %6 = vector.load %arg3[%c0_9, %c0_10] : memref<1x64xf32, #tpu.memory_space<vmem>>, vector<1x64xf32>
    %7 = vector.broadcast %6 : vector<1x64xf32> to vector<4x64xf32>
    %8 = arith.addf %5, %7 : vector<4x64xf32>
    %cst_11 = arith.constant 0.000000e+00 : f32
    %9 = vector.broadcast %cst_11 : f32 to vector<4x64xf32>
    %10 = arith.maximumf %8, %9 : vector<4x64xf32>
    %c2 = arith.constant 2 : index
    %c2_12 = arith.constant 2 : index
    %c0_13 = arith.constant 0 : index
    %11 = vector.load %arg24[%c2, %c2_12, %c0_13] : memref<8x8x64xf32, #tpu.memory_space<vmem>>, vector<1x4x64xf32>
    %12 = vector.shape_cast %11 : vector<1x4x64xf32> to vector<4x64xf32>
    %13 = vector.shape_cast %10 : vector<4x64xf32> to vector<1x4x64xf32>
    tpu.vector_store %arg24[%c2, %c2_12, %c0_13], %13 {strides = array<i32>} : memref<8x8x64xf32, #tpu.memory_space<vmem>>, vector<1x4x64xf32>,
    %c0_14 = arith.constant 0 : index
    %c1 = arith.constant 1 : index
    %c0_15 = arith.constant 0 : index
    %c0_16 = arith.constant 0 : index
    %14 = vector.load %arg1[%c0_14, %c1, %c0_15, %c0_16] : memref<1x4x4x16xf32, #tpu.memory_space<vmem>>, vector<1x1x4x16xf32>
    %15 = vector.shape_cast %14 : vector<1x1x4x16xf32> to vector<4x16xf32>
    %c0_17 = arith.constant 0 : index
    %c0_18 = arith.constant 0 : index
    %16 = vector.load %arg2[%c0_17, %c0_18] : memref<16x64xf32, #tpu.memory_space<vmem>>, vector<16x64xf32>
    %cst_19 = arith.constant dense<0.000000e+00> : vector<4x64xf32>
    %17 = tpu.matmul %15, %16, %cst_19 {dimension_numbers = #tpu.dot_dimension_numbers<[1], [0], [0], [1], [0, 0, 1, 1], [], []>} : vector<4x16xf32>, vector<16x64xf32>, vector<4x64xf32> -> vector<4x64xf32>
    %c0_20 = arith.constant 0 : index
    %c0_21 = arith.constant 0 : index
    %18 = vector.load %arg3[%c0_20, %c0_21] : memref<1x64xf32, #tpu.memory_space<vmem>>, vector<1x64xf32>
    %19 = vector.broadcast %18 : vector<1x64xf32> to vector<4x64xf32>
    %20 = arith.addf %17, %19 : vector<4x64xf32>
    %cst_22 = arith.constant 0.000000e+00 : f32
    %21 = vector.broadcast %cst_22 : f32 to vector<4x64xf32>
    %22 = arith.maximumf %20, %21 : vector<4x64xf32>
    %c3 = arith.constant 3 : index
    %c2_23 = arith.constant 2 : index
    %c0_24 = arith.constant 0 : index
    %23 = vector.load %arg24[%c3, %c2_23, %c0_24] : memref<8x8x64xf32, #tpu.memory_space<vmem>>, vector<1x4x64xf32>
    %24 = vector.shape_cast %23 : vector<1x4x64xf32> to vector<4x64xf32>
    %25 = vector.shape_cast %22 : vector<4x64xf32> to vector<1x4x64xf32>
    tpu.vector_store %arg24[%c3, %c2_23, %c0_24], %25 {strides = array<i32>} : memref<8x8x64xf32, #tpu.memory_space<vmem>>, vector<1x4x64xf32>,
    %c0_25 = arith.constant 0 : index
    %c2_26 = arith.constant 2 : index
    %c0_27 = arith.constant 0 : index
    %c0_28 = arith.constant 0 : index
    %26 = vector.load %arg1[%c0_25, %c2_26, %c0_27, %c0_28] : memref<1x4x4x16xf32, #tpu.memory_space<vmem>>, vector<1x1x4x16xf32>
    %27 = vector.shape_cast %26 : vector<1x1x4x16xf32> to vector<4x16xf32>
    %c0_29 = arith.constant 0 : index
    %c0_30 = arith.constant 0 : index
    %28 = vector.load %arg2[%c0_29, %c0_30] : memref<16x64xf32, #tpu.memory_space<vmem>>, vector<16x64xf32>
    %cst_31 = arith.constant dense<0.000000e+00> : vector<4x64xf32>
    %29 = tpu.matmul %27, %28, %cst_31 {dimension_numbers = #tpu.dot_dimension_numbers<[1], [0], [0], [1], [0, 0, 1, 1], [], []>} : vector<4x16xf32>, vector<16x64xf32>, vector<4x64xf32> -> vector<4x64xf32>
    %c0_32 = arith.constant 0 : index
    %c0_33 = arith.constant 0 : index
    %30 = vector.load %arg3[%c0_32, %c0_33] : memref<1x64xf32, #tpu.memory_space<vmem>>, vector<1x64xf32>
    %31 = vector.broadcast %30 : vector<1x64xf32> to vector<4x64xf32>
    %32 = arith.addf %29, %31 : vector<4x64xf32>
    %cst_34 = arith.constant 0.000000e+00 : f32
    %33 = vector.broadcast %cst_34 : f32 to vector<4x64xf32>
    %34 = arith.maximumf %32, %33 : vector<4x64xf32>
    %c4 = arith.constant 4 : index
    %c2_35 = arith.constant 2 : index
    %c0_36 = arith.constant 0 : index
    %35 = vector.load %arg24[%c4, %c2_35, %c0_36] : memref<8x8x64xf32, #tpu.memory_space<vmem>>, vector<1x4x64xf32>
    %36 = vector.shape_cast %35 : vector<1x4x64xf32> to vector<4x64xf32>
    %37 = vector.shape_cast %34 : vector<4x64xf32> to vector<1x4x64xf32>
    tpu.vector_store %arg24[%c4, %c2_35, %c0_36], %37 {strides = array<i32>} : memref<8x8x64xf32, #tpu.memory_space<vmem>>, vector<1x4x64xf32>,
    %c0_37 = arith.constant 0 : index
    %c3_38 = arith.constant 3 : index
    %c0_39 = arith.constant 0 : index
    %c0_40 = arith.constant 0 : index
    %38 = vector.load %arg1[%c0_37, %c3_38, %c0_39, %c0_40] : memref<1x4x4x16xf32, #tpu.memory_space<vmem>>, vector<1x1x4x16xf32>
    %39 = vector.shape_cast %38 : vector<1x1x4x16xf32> to vector<4x16xf32>
    %c0_41 = arith.constant 0 : index
    %c0_42 = arith.constant 0 : index
    %40 = vector.load %arg2[%c0_41, %c0_42] : memref<16x64xf32, #tpu.memory_space<vmem>>, vector<16x64xf32>
    %cst_43 = arith.constant dense<0.000000e+00> : vector<4x64xf32>
    %41 = tpu.matmul %39, %40, %cst_43 {dimension_numbers = #tpu.dot_dimension_numbers<[1], [0], [0], [1], [0, 0, 1, 1], [], []>} : vector<4x16xf32>, vector<16x64xf32>, vector<4x64xf32> -> vector<4x64xf32>
    %c0_44 = arith.constant 0 : index
    %c0_45 = arith.constant 0 : index
    %42 = vector.load %arg3[%c0_44, %c0_45] : memref<1x64xf32, #tpu.memory_space<vmem>>, vector<1x64xf32>
    %43 = vector.broadcast %42 : vector<1x64xf32> to vector<4x64xf32>
    %44 = arith.addf %41, %43 : vector<4x64xf32>
    %cst_46 = arith.constant 0.000000e+00 : f32
    %45 = vector.broadcast %cst_46 : f32 to vector<4x64xf32>
    %46 = arith.maximumf %44, %45 : vector<4x64xf32>
    %c5 = arith.constant 5 : index
    %c2_47 = arith.constant 2 : index
    %c0_48 = arith.constant 0 : index
    %47 = vector.load %arg24[%c5, %c2_47, %c0_48] : memref<8x8x64xf32, #tpu.memory_space<vmem>>, vector<1x4x64xf32>
    %48 = vector.shape_cast %47 : vector<1x4x64xf32> to vector<4x64xf32>
    %49 = vector.shape_cast %46 : vector<4x64xf32> to vector<1x4x64xf32>
    tpu.vector_store %arg24[%c5, %c2_47, %c0_48], %49 {strides = array<i32>} : memref<8x8x64xf32, #tpu.memory_space<vmem>>, vector<1x4x64xf32>,
    %c0_49 = arith.constant 0 : index
    %c0_50 = arith.constant 0 : index
    %c0_51 = arith.constant 0 : index
    %50 = vector.load %arg4[%c0_49, %c0_50, %c0_51] : memref<5x5x64xf32, #tpu.memory_space<vmem>>, vector<5x5x64xf32>
    %c0_52 = arith.constant 0 : index
    %c0_53 = arith.constant 0 : index
    %c0_54 = arith.constant 0 : index
    %51 = vector.load %arg24[%c0_52, %c0_53, %c0_54] : memref<8x8x64xf32, #tpu.memory_space<vmem>>, vector<5x5x64xf32>
    %52 = arith.mulf %51, %50 : vector<5x5x64xf32>
    %cst_55 = arith.constant dense<0.000000e+00> : vector<5x64xf32>
    %53 = vector.multi_reduction <add>, %52, %cst_55 [0] : vector<5x5x64xf32> to vector<5x64xf32>
    %cst_56 = arith.constant dense<0.000000e+00> : vector<64xf32>
    %54 = vector.multi_reduction <add>, %53, %cst_56 [0] : vector<5x64xf32> to vector<64xf32>
    %55 = vector.shape_cast %54 : vector<64xf32> to vector<1x64xf32>
    %c0_57 = arith.constant 0 : index
    %c0_58 = arith.constant 0 : index
    %56 = vector.load %arg5[%c0_57, %c0_58] : memref<1x64xf32, #tpu.memory_space<vmem>>, vector<1x64xf32>
    %57 = arith.addf %55, %56 : vector<1x64xf32>
    %cst_59 = arith.constant 0.000000e+00 : f32
    %58 = vector.broadcast %cst_59 : f32 to vector<1x64xf32>
    %59 = arith.maximumf %57, %58 : vector<1x64xf32>
    %c0_60 = arith.constant 0 : index
    %c0_61 = arith.constant 0 : index
    %60 = vector.load %arg25[%c0_60, %c0_61] : memref<4x64xf32, #tpu.memory_space<vmem>>, vector<1x64xf32>
    tpu.vector_store %arg25[%c0_60, %c0_61], %59 {strides = array<i32>} : memref<4x64xf32, #tpu.memory_space<vmem>>, vector<1x64xf32>,
    %c0_62 = arith.constant 0 : index
    %c2_63 = arith.constant 2 : index
    %c0_64 = arith.constant 0 : index
    %61 = vector.load %arg24[%c0_62, %c2_63, %c0_64] : memref<8x8x64xf32, #tpu.memory_space<vmem>>, vector<5x5x64xf32>
    %62 = arith.mulf %61, %50 : vector<5x5x64xf32>
    %cst_65 = arith.constant dense<0.000000e+00> : vector<5x64xf32>
    %63 = vector.multi_reduction <add>, %62, %cst_65 [0] : vector<5x5x64xf32> to vector<5x64xf32>
    %cst_66 = arith.constant dense<0.000000e+00> : vector<64xf32>
    %64 = vector.multi_reduction <add>, %63, %cst_66 [0] : vector<5x64xf32> to vector<64xf32>
    %65 = vector.shape_cast %64 : vector<64xf32> to vector<1x64xf32>
    %c0_67 = arith.constant 0 : index
    %c0_68 = arith.constant 0 : index
    %66 = vector.load %arg5[%c0_67, %c0_68] : memref<1x64xf32, #tpu.memory_space<vmem>>, vector<1x64xf32>
    %67 = arith.addf %65, %66 : vector<1x64xf32>
    %cst_69 = arith.constant 0.000000e+00 : f32
    %68 = vector.broadcast %cst_69 : f32 to vector<1x64xf32>
    %69 = arith.maximumf %67, %68 : vector<1x64xf32>
    %c1_70 = arith.constant 1 : index
    %c0_71 = arith.constant 0 : index
    %70 = vector.load %arg25[%c1_70, %c0_71] : memref<4x64xf32, #tpu.memory_space<vmem>>, vector<1x64xf32>
    tpu.vector_store %arg25[%c1_70, %c0_71], %69 {strides = array<i32>} : memref<4x64xf32, #tpu.memory_space<vmem>>, vector<1x64xf32>,
    %c2_72 = arith.constant 2 : index
    %c0_73 = arith.constant 0 : index
    %c0_74 = arith.constant 0 : index
    %71 = vector.load %arg24[%c2_72, %c0_73, %c0_74] : memref<8x8x64xf32, #tpu.memory_space<vmem>>, vector<5x5x64xf32>
    %72 = arith.mulf %71, %50 : vector<5x5x64xf32>
    %cst_75 = arith.constant dense<0.000000e+00> : vector<5x64xf32>
    %73 = vector.multi_reduction <add>, %72, %cst_75 [0] : vector<5x5x64xf32> to vector<5x64xf32>
    %cst_76 = arith.constant dense<0.000000e+00> : vector<64xf32>
    %74 = vector.multi_reduction <add>, %73, %cst_76 [0] : vector<5x64xf32> to vector<64xf32>
    %75 = vector.shape_cast %74 : vector<64xf32> to vector<1x64xf32>
    %c0_77 = arith.constant 0 : index
    %c0_78 = arith.constant 0 : index
    %76 = vector.load %arg5[%c0_77, %c0_78] : memref<1x64xf32, #tpu.memory_space<vmem>>, vector<1x64xf32>
    %77 = arith.addf %75, %76 : vector<1x64xf32>
    %cst_79 = arith.constant 0.000000e+00 : f32
    %78 = vector.broadcast %cst_79 : f32 to vector<1x64xf32>
    %79 = arith.maximumf %77, %78 : vector<1x64xf32>
    %c2_80 = arith.constant 2 : index
    %c0_81 = arith.constant 0 : index
    %80 = vector.load %arg25[%c2_80, %c0_81] : memref<4x64xf32, #tpu.memory_space<vmem>>, vector<1x64xf32>
    tpu.vector_store %arg25[%c2_80, %c0_81], %79 {strides = array<i32>} : memref<4x64xf32, #tpu.memory_space<vmem>>, vector<1x64xf32>,
    %c2_82 = arith.constant 2 : index
    %c2_83 = arith.constant 2 : index
    %c0_84 = arith.constant 0 : index
    %81 = vector.load %arg24[%c2_82, %c2_83, %c0_84] : memref<8x8x64xf32, #tpu.memory_space<vmem>>, vector<5x5x64xf32>
    %82 = arith.mulf %81, %50 : vector<5x5x64xf32>
    %cst_85 = arith.constant dense<0.000000e+00> : vector<5x64xf32>
    %83 = vector.multi_reduction <add>, %82, %cst_85 [0] : vector<5x5x64xf32> to vector<5x64xf32>
    %cst_86 = arith.constant dense<0.000000e+00> : vector<64xf32>
    %84 = vector.multi_reduction <add>, %83, %cst_86 [0] : vector<5x64xf32> to vector<64xf32>
    %85 = vector.shape_cast %84 : vector<64xf32> to vector<1x64xf32>
    %c0_87 = arith.constant 0 : index
    %c0_88 = arith.constant 0 : index
    %86 = vector.load %arg5[%c0_87, %c0_88] : memref<1x64xf32, #tpu.memory_space<vmem>>, vector<1x64xf32>
    %87 = arith.addf %85, %86 : vector<1x64xf32>
    %cst_89 = arith.constant 0.000000e+00 : f32
    %88 = vector.broadcast %cst_89 : f32 to vector<1x64xf32>
    %89 = arith.maximumf %87, %88 : vector<1x64xf32>
    %c3_90 = arith.constant 3 : index
    %c0_91 = arith.constant 0 : index
    %90 = vector.load %arg25[%c3_90, %c0_91] : memref<4x64xf32, #tpu.memory_space<vmem>>, vector<1x64xf32>
    tpu.vector_store %arg25[%c3_90, %c0_91], %89 {strides = array<i32>} : memref<4x64xf32, #tpu.memory_space<vmem>>, vector<1x64xf32>,
    %c0_92 = arith.constant 0 : index
    %c0_93 = arith.constant 0 : index
    %91 = vector.load %arg25[%c0_92, %c0_93] : memref<4x64xf32, #tpu.memory_space<vmem>>, vector<4x64xf32>
    %92 = vector.extract_strided_slice %91 {offsets = [0, 0], sizes = [4, 32], strides = [1, 1]} : vector<4x64xf32> to vector<4x32xf32>
    %c0_94 = arith.constant 0 : index
    %c0_95 = arith.constant 0 : index
    %93 = vector.load %arg6[%c0_94, %c0_95] : memref<32x24xf32, #tpu.memory_space<vmem>>, vector<32x24xf32>
    %cst_96 = arith.constant dense<0.000000e+00> : vector<4x24xf32>
    %94 = tpu.matmul %92, %93, %cst_96 {dimension_numbers = #tpu.dot_dimension_numbers<[1], [0], [0], [1], [0, 0, 1, 1], [], []>} : vector<4x32xf32>, vector<32x24xf32>, vector<4x24xf32> -> vector<4x24xf32>
    %c0_97 = arith.constant 0 : index
    %c0_98 = arith.constant 0 : index
    %95 = vector.load %arg7[%c0_97, %c0_98] : memref<1x24xf32, #tpu.memory_space<vmem>>, vector<1x24xf32>
    %96 = vector.broadcast %95 : vector<1x24xf32> to vector<4x24xf32>
    %97 = arith.addf %94, %96 : vector<4x24xf32>
    %98 = vector.extract_strided_slice %91 {offsets = [0, 32], sizes = [4, 32], strides = [1, 1]} : vector<4x64xf32> to vector<4x32xf32>
    %c0_99 = arith.constant 0 : index
    %c0_100 = arith.constant 0 : index
    %99 = vector.load %arg8[%c0_99, %c0_100] : memref<32x24xf32, #tpu.memory_space<vmem>>, vector<32x24xf32>
    %cst_101 = arith.constant dense<0.000000e+00> : vector<4x24xf32>
    %100 = tpu.matmul %98, %99, %cst_101 {dimension_numbers = #tpu.dot_dimension_numbers<[1], [0], [0], [1], [0, 0, 1, 1], [], []>} : vector<4x32xf32>, vector<32x24xf32>, vector<4x24xf32> -> vector<4x24xf32>
    %c0_102 = arith.constant 0 : index
    %c0_103 = arith.constant 0 : index
    %101 = vector.load %arg9[%c0_102, %c0_103] : memref<1x24xf32, #tpu.memory_space<vmem>>, vector<1x24xf32>
    %102 = vector.broadcast %101 : vector<1x24xf32> to vector<4x24xf32>
    %103 = arith.addf %100, %102 : vector<4x24xf32>
    %cst_104 = arith.constant dense<0.000000e+00> : vector<24xf32>
    %104 = vector.multi_reduction <add>, %97, %cst_104 [0] : vector<4x24xf32> to vector<24xf32>
    %105 = vector.shape_cast %104 : vector<24xf32> to vector<1x24xf32>
    %cst_105 = arith.constant 4.000000e+00 : f32
    %106 = vector.broadcast %cst_105 : f32 to vector<1x24xf32>
    %107 = arith.divf %105, %106 : vector<1x24xf32>
    %cst_106 = arith.constant dense<0.000000e+00> : vector<24xf32>
    %108 = vector.multi_reduction <add>, %103, %cst_106 [0] : vector<4x24xf32> to vector<24xf32>
    %109 = vector.shape_cast %108 : vector<24xf32> to vector<1x24xf32>
    %cst_107 = arith.constant 4.000000e+00 : f32
    %110 = vector.broadcast %cst_107 : f32 to vector<1x24xf32>
    %111 = arith.divf %109, %110 : vector<1x24xf32>
    %112 = vector.shape_cast %107 : vector<1x24xf32> to vector<1x1x24xf32>
    %cst_108 = arith.constant dense<0.000000e+00> : vector<1xf32>
    %113 = vector.multi_reduction <add>, %112, %cst_108 [1, 2] : vector<1x1x24xf32> to vector<1xf32>
    %114 = vector.shape_cast %113 : vector<1xf32> to vector<1x1x1xf32>
    %115 = vector.extract %114[0, 0, 0] : f32 from vector<1x1x1xf32>
    %116 = vector.shape_cast %111 : vector<1x24xf32> to vector<1x1x24xf32>
    %cst_109 = arith.constant dense<0.000000e+00> : vector<1xf32>
    %117 = vector.multi_reduction <add>, %116, %cst_109 [1, 2] : vector<1x1x24xf32> to vector<1xf32>
    %118 = vector.shape_cast %117 : vector<1xf32> to vector<1x1x1xf32>
    %119 = vector.extract %118[0, 0, 0] : f32 from vector<1x1x1xf32>
    %120 = arith.addf %115, %119 : f32
    %cst_110 = arith.constant 4.800000e+01 : f32
    %121 = arith.divf %120, %cst_110 : f32
    %122 = vector.broadcast %121 : f32 to vector<1x24xf32>
    %123 = arith.subf %107, %122 : vector<1x24xf32>
    %124 = arith.mulf %123, %123 : vector<1x24xf32>
    %125 = vector.shape_cast %124 : vector<1x24xf32> to vector<1x1x24xf32>
    %cst_111 = arith.constant dense<0.000000e+00> : vector<1xf32>
    %126 = vector.multi_reduction <add>, %125, %cst_111 [1, 2] : vector<1x1x24xf32> to vector<1xf32>
    %127 = vector.shape_cast %126 : vector<1xf32> to vector<1x1x1xf32>
    %128 = vector.extract %127[0, 0, 0] : f32 from vector<1x1x1xf32>
    %129 = vector.broadcast %121 : f32 to vector<1x24xf32>
    %130 = arith.subf %111, %129 : vector<1x24xf32>
    %131 = arith.mulf %130, %130 : vector<1x24xf32>
    %132 = vector.shape_cast %131 : vector<1x24xf32> to vector<1x1x24xf32>
    %cst_112 = arith.constant dense<0.000000e+00> : vector<1xf32>
    %133 = vector.multi_reduction <add>, %132, %cst_112 [1, 2] : vector<1x1x24xf32> to vector<1xf32>
    %134 = vector.shape_cast %133 : vector<1xf32> to vector<1x1x1xf32>
    %135 = vector.extract %134[0, 0, 0] : f32 from vector<1x1x1xf32>
    %136 = arith.addf %128, %135 : f32
    %cst_113 = arith.constant 4.800000e+01 : f32
    %137 = arith.divf %136, %cst_113 : f32
    %cst_114 = arith.constant 9.99999974E-6 : f32
    %138 = arith.addf %137, %cst_114 : f32
    %139 = math.rsqrt %138 : f32
    %140 = vector.broadcast %121 : f32 to vector<1x24xf32>
    %141 = arith.subf %107, %140 : vector<1x24xf32>
    %142 = vector.broadcast %139 : f32 to vector<1x24xf32>
    %143 = arith.mulf %141, %142 : vector<1x24xf32>
    %c0_115 = arith.constant 0 : index
    %c0_116 = arith.constant 0 : index
    %144 = vector.load %arg10[%c0_115, %c0_116] : memref<1x24xf32, #tpu.memory_space<vmem>>, vector<1x24xf32>
    %145 = arith.mulf %143, %144 : vector<1x24xf32>
    %c0_117 = arith.constant 0 : index
    %c0_118 = arith.constant 0 : index
    %146 = vector.load %arg11[%c0_117, %c0_118] : memref<1x24xf32, #tpu.memory_space<vmem>>, vector<1x24xf32>
    %147 = arith.addf %145, %146 : vector<1x24xf32>
    %148 = vector.broadcast %121 : f32 to vector<1x24xf32>
    %149 = arith.subf %111, %148 : vector<1x24xf32>
    %150 = vector.broadcast %139 : f32 to vector<1x24xf32>
    %151 = arith.mulf %149, %150 : vector<1x24xf32>
    %c0_119 = arith.constant 0 : index
    %c0_120 = arith.constant 0 : index
    %152 = vector.load %arg12[%c0_119, %c0_120] : memref<1x24xf32, #tpu.memory_space<vmem>>, vector<1x24xf32>
    %153 = arith.mulf %151, %152 : vector<1x24xf32>
    %c0_121 = arith.constant 0 : index
    %c0_122 = arith.constant 0 : index
    %154 = vector.load %arg13[%c0_121, %c0_122] : memref<1x24xf32, #tpu.memory_space<vmem>>, vector<1x24xf32>
    %155 = arith.addf %153, %154 : vector<1x24xf32>
    %c0_123 = arith.constant 0 : index
    %c0_124 = arith.constant 0 : index
    %156 = vector.load %arg14[%c0_123, %c0_124] : memref<24x48xf32, #tpu.memory_space<vmem>>, vector<24x48xf32>
    %cst_125 = arith.constant dense<0.000000e+00> : vector<1x48xf32>
    %157 = tpu.matmul %147, %156, %cst_125 {dimension_numbers = #tpu.dot_dimension_numbers<[1], [0], [0], [1], [0, 0, 1, 1], [], []>} : vector<1x24xf32>, vector<24x48xf32>, vector<1x48xf32> -> vector<1x48xf32>
    %c0_126 = arith.constant 0 : index
    %c0_127 = arith.constant 0 : index
    %158 = vector.load %arg15[%c0_126, %c0_127] : memref<24x48xf32, #tpu.memory_space<vmem>>, vector<24x48xf32>
    %cst_128 = arith.constant dense<0.000000e+00> : vector<1x48xf32>
    %159 = tpu.matmul %155, %158, %cst_128 {dimension_numbers = #tpu.dot_dimension_numbers<[1], [0], [0], [1], [0, 0, 1, 1], [], []>} : vector<1x24xf32>, vector<24x48xf32>, vector<1x48xf32> -> vector<1x48xf32>
    %160 = arith.addf %157, %159 : vector<1x48xf32>
    %c0_129 = arith.constant 0 : index
    %c0_130 = arith.constant 0 : index
    %161 = vector.load %arg16[%c0_129, %c0_130] : memref<1x48xf32, #tpu.memory_space<vmem>>, vector<1x48xf32>
    %162 = arith.addf %160, %161 : vector<1x48xf32>
    %c0_131 = arith.constant 0 : index
    %c0_132 = arith.constant 0 : index
    %163 = vector.load %arg17[%c0_131, %c0_132] : memref<48x48xf32, #tpu.memory_space<vmem>>, vector<48x48xf32>
    %cst_133 = arith.constant dense<0.000000e+00> : vector<1x48xf32>
    %164 = tpu.matmul %162, %163, %cst_133 {dimension_numbers = #tpu.dot_dimension_numbers<[1], [0], [0], [1], [0, 0, 1, 1], [], []>} : vector<1x48xf32>, vector<48x48xf32>, vector<1x48xf32> -> vector<1x48xf32>
    %c0_134 = arith.constant 0 : index
    %c0_135 = arith.constant 0 : index
    %165 = vector.load %arg18[%c0_134, %c0_135] : memref<1x48xf32, #tpu.memory_space<vmem>>, vector<1x48xf32>
    %166 = arith.addf %164, %165 : vector<1x48xf32>
    %c0_136 = arith.constant 0 : index
    %c0_137 = arith.constant 0 : index
    %167 = vector.load %arg19[%c0_136, %c0_137] : memref<48x24xf32, #tpu.memory_space<vmem>>, vector<48x24xf32>
    %cst_138 = arith.constant dense<0.000000e+00> : vector<1x24xf32>
    %168 = tpu.matmul %166, %167, %cst_138 {dimension_numbers = #tpu.dot_dimension_numbers<[1], [0], [0], [1], [0, 0, 1, 1], [], []>} : vector<1x48xf32>, vector<48x24xf32>, vector<1x24xf32> -> vector<1x24xf32>
    %c0_139 = arith.constant 0 : index
    %c0_140 = arith.constant 0 : index
    %169 = vector.load %arg20[%c0_139, %c0_140] : memref<1x24xf32, #tpu.memory_space<vmem>>, vector<1x24xf32>
    %170 = arith.addf %168, %169 : vector<1x24xf32>
    %171 = arith.negf %170 : vector<1x24xf32>
    %172 = math.exp %171 : vector<1x24xf32>
    %cst_141 = arith.constant 1.000000e+00 : f32
    %173 = vector.broadcast %cst_141 : f32 to vector<1x24xf32>
    %174 = arith.addf %173, %172 : vector<1x24xf32>
    %175 = arith.divf %173, %174 : vector<1x24xf32>
    %c0_142 = arith.constant 0 : index
    %c0_143 = arith.constant 0 : index
    %176 = vector.load %arg21[%c0_142, %c0_143] : memref<48x24xf32, #tpu.memory_space<vmem>>, vector<48x24xf32>
    %cst_144 = arith.constant dense<0.000000e+00> : vector<1x24xf32>
    %177 = tpu.matmul %166, %176, %cst_144 {dimension_numbers = #tpu.dot_dimension_numbers<[1], [0], [0], [1], [0, 0, 1, 1], [], []>} : vector<1x48xf32>, vector<48x24xf32>, vector<1x24xf32> -> vector<1x24xf32>
    %c0_145 = arith.constant 0 : index
    %c0_146 = arith.constant 0 : index
    %178 = vector.load %arg22[%c0_145, %c0_146] : memref<1x24xf32, #tpu.memory_space<vmem>>, vector<1x24xf32>
    %179 = arith.addf %177, %178 : vector<1x24xf32>
    %180 = arith.negf %179 : vector<1x24xf32>
    %181 = math.exp %180 : vector<1x24xf32>
    %cst_147 = arith.constant 1.000000e+00 : f32
    %182 = vector.broadcast %cst_147 : f32 to vector<1x24xf32>
    %183 = arith.addf %182, %181 : vector<1x24xf32>
    %184 = arith.divf %182, %183 : vector<1x24xf32>
    %185 = vector.broadcast %175 : vector<1x24xf32> to vector<4x24xf32>
    %186 = arith.mulf %97, %185 : vector<4x24xf32>
    %187 = vector.broadcast %184 : vector<1x24xf32> to vector<4x24xf32>
    %188 = arith.mulf %103, %187 : vector<4x24xf32>
    %189 = arith.addf %186, %188 : vector<4x24xf32>
    %c0_148 = arith.constant 0 : index
    %c0_149 = arith.constant 0 : index
    %c0_150 = arith.constant 0 : index
    %190 = vector.load %arg23[%c0_148, %c0_149, %c0_150] : memref<1x4x24xf32, #tpu.memory_space<vmem>>, vector<1x4x24xf32>
    %191 = vector.shape_cast %190 : vector<1x4x24xf32> to vector<4x24xf32>
    %192 = vector.shape_cast %189 : vector<4x24xf32> to vector<1x4x24xf32>
    tpu.vector_store %arg23[%c0_148, %c0_149, %c0_150], %192 {strides = array<i32>} : memref<1x4x24xf32, #tpu.memory_space<vmem>>, vector<1x4x24xf32>,
    return
  }
  func.func @transform_0(%arg0: i32) -> (i32, i32, i32, i32) {
    %c0_i32 = arith.constant 0 : i32
    %c0_i32_0 = arith.constant 0 : i32
    %c0_i32_1 = arith.constant 0 : i32
    %c0_i32_2 = arith.constant 0 : i32
    return %arg0, %c0_i32, %c0_i32_0, %c0_i32_1 : i32, i32, i32, i32
  }
  func.func @transform_1(%arg0: i32) -> (i32, i32) {
    %c0_i32 = arith.constant 0 : i32
    %c0_i32_0 = arith.constant 0 : i32
    %c0_i32_1 = arith.constant 0 : i32
    return %c0_i32, %c0_i32_0 : i32, i32
  }
  func.func @transform_2(%arg0: i32) -> (i32, i32) {
    %c0_i32 = arith.constant 0 : i32
    %c0_i32_0 = arith.constant 0 : i32
    %c0_i32_1 = arith.constant 0 : i32
    return %c0_i32, %c0_i32_0 : i32, i32
  }
  func.func @transform_3(%arg0: i32) -> (i32, i32, i32) {
    %c0_i32 = arith.constant 0 : i32
    %c0_i32_0 = arith.constant 0 : i32
    %c0_i32_1 = arith.constant 0 : i32
    %c0_i32_2 = arith.constant 0 : i32
    return %c0_i32, %c0_i32_0, %c0_i32_1 : i32, i32, i32
  }
  func.func @transform_4(%arg0: i32) -> (i32, i32) {
    %c0_i32 = arith.constant 0 : i32
    %c0_i32_0 = arith.constant 0 : i32
    %c0_i32_1 = arith.constant 0 : i32
    return %c0_i32, %c0_i32_0 : i32, i32
  }
  func.func @transform_5(%arg0: i32) -> (i32, i32) {
    %c0_i32 = arith.constant 0 : i32
    %c0_i32_0 = arith.constant 0 : i32
    %c0_i32_1 = arith.constant 0 : i32
    return %c0_i32, %c0_i32_0 : i32, i32
  }
  func.func @transform_6(%arg0: i32) -> (i32, i32) {
    %c0_i32 = arith.constant 0 : i32
    %c0_i32_0 = arith.constant 0 : i32
    %c0_i32_1 = arith.constant 0 : i32
    return %c0_i32, %c0_i32_0 : i32, i32
  }
  func.func @transform_7(%arg0: i32) -> (i32, i32) {
    %c0_i32 = arith.constant 0 : i32
    %c0_i32_0 = arith.constant 0 : i32
    %c0_i32_1 = arith.constant 0 : i32
    return %c0_i32, %c0_i32_0 : i32, i32
  }
  func.func @transform_8(%arg0: i32) -> (i32, i32) {
    %c0_i32 = arith.constant 0 : i32
    %c0_i32_0 = arith.constant 0 : i32
    %c0_i32_1 = arith.constant 0 : i32
    return %c0_i32, %c0_i32_0 : i32, i32
  }
  func.func @transform_9(%arg0: i32) -> (i32, i32) {
    %c0_i32 = arith.constant 0 : i32
    %c0_i32_0 = arith.constant 0 : i32
    %c0_i32_1 = arith.constant 0 : i32
    return %c0_i32, %c0_i32_0 : i32, i32
  }
  func.func @transform_10(%arg0: i32) -> (i32, i32) {
    %c0_i32 = arith.constant 0 : i32
    %c0_i32_0 = arith.constant 0 : i32
    %c0_i32_1 = arith.constant 0 : i32
    return %c0_i32, %c0_i32_0 : i32, i32
  }
  func.func @transform_11(%arg0: i32) -> (i32, i32) {
    %c0_i32 = arith.constant 0 : i32
    %c0_i32_0 = arith.constant 0 : i32
    %c0_i32_1 = arith.constant 0 : i32
    return %c0_i32, %c0_i32_0 : i32, i32
  }
  func.func @transform_12(%arg0: i32) -> (i32, i32) {
    %c0_i32 = arith.constant 0 : i32
    %c0_i32_0 = arith.constant 0 : i32
    %c0_i32_1 = arith.constant 0 : i32
    return %c0_i32, %c0_i32_0 : i32, i32
  }
  func.func @transform_13(%arg0: i32) -> (i32, i32) {
    %c0_i32 = arith.constant 0 : i32
    %c0_i32_0 = arith.constant 0 : i32
    %c0_i32_1 = arith.constant 0 : i32
    return %c0_i32, %c0_i32_0 : i32, i32
  }
  func.func @transform_14(%arg0: i32) -> (i32, i32) {
    %c0_i32 = arith.constant 0 : i32
    %c0_i32_0 = arith.constant 0 : i32
    %c0_i32_1 = arith.constant 0 : i32
    return %c0_i32, %c0_i32_0 : i32, i32
  }
  func.func @transform_15(%arg0: i32) -> (i32, i32) {
    %c0_i32 = arith.constant 0 : i32
    %c0_i32_0 = arith.constant 0 : i32
    %c0_i32_1 = arith.constant 0 : i32
    return %c0_i32, %c0_i32_0 : i32, i32
  }
  func.func @transform_16(%arg0: i32) -> (i32, i32) {
    %c0_i32 = arith.constant 0 : i32
    %c0_i32_0 = arith.constant 0 : i32
    %c0_i32_1 = arith.constant 0 : i32
    return %c0_i32, %c0_i32_0 : i32, i32
  }
  func.func @transform_17(%arg0: i32) -> (i32, i32) {
    %c0_i32 = arith.constant 0 : i32
    %c0_i32_0 = arith.constant 0 : i32
    %c0_i32_1 = arith.constant 0 : i32
    return %c0_i32, %c0_i32_0 : i32, i32
  }
  func.func @transform_18(%arg0: i32) -> (i32, i32) {
    %c0_i32 = arith.constant 0 : i32
    %c0_i32_0 = arith.constant 0 : i32
    %c0_i32_1 = arith.constant 0 : i32
    return %c0_i32, %c0_i32_0 : i32, i32
  }
  func.func @transform_19(%arg0: i32) -> (i32, i32) {
    %c0_i32 = arith.constant 0 : i32
    %c0_i32_0 = arith.constant 0 : i32
    %c0_i32_1 = arith.constant 0 : i32
    return %c0_i32, %c0_i32_0 : i32, i32
  }
  func.func @transform_20(%arg0: i32) -> (i32, i32) {
    %c0_i32 = arith.constant 0 : i32
    %c0_i32_0 = arith.constant 0 : i32
    %c0_i32_1 = arith.constant 0 : i32
    return %c0_i32, %c0_i32_0 : i32, i32
  }
  func.func @transform_21(%arg0: i32) -> (i32, i32) {
    %c0_i32 = arith.constant 0 : i32
    %c0_i32_0 = arith.constant 0 : i32
    %c0_i32_1 = arith.constant 0 : i32
    return %c0_i32, %c0_i32_0 : i32, i32
  }
  func.func @transform_22(%arg0: i32) -> (i32, i32, i32) {
    %c0_i32 = arith.constant 0 : i32
    %c0_i32_0 = arith.constant 0 : i32
    %c0_i32_1 = arith.constant 0 : i32
    return %arg0, %c0_i32, %c0_i32_0 : i32, i32, i32
  }
}

module attributes {stable_mosaic.version = 11 : i64} {
  func.func @_uib_kernel(%arg0: i32, %arg1: memref<1x6x6x16xf32, #tpu.memory_space<vmem>>, %arg2: memref<9x2x16xf32, #tpu.memory_space<vmem>>, %arg3: memref<2x16xf32, #tpu.memory_space<vmem>>, %arg4: memref<16x32xf32, #tpu.memory_space<vmem>>, %arg5: memref<1x32xf32, #tpu.memory_space<vmem>>, %arg6: memref<16x32xf32, #tpu.memory_space<vmem>>, %arg7: memref<1x32xf32, #tpu.memory_space<vmem>>, %arg8: memref<5x5x64xf32, #tpu.memory_space<vmem>>, %arg9: memref<1x64xf32, #tpu.memory_space<vmem>>, %arg10: memref<32x16xf32, #tpu.memory_space<vmem>>, %arg11: memref<1x16xf32, #tpu.memory_space<vmem>>, %arg12: memref<32x16xf32, #tpu.memory_space<vmem>>, %arg13: memref<1x16xf32, #tpu.memory_space<vmem>>, %arg14: memref<1x16xf32, #tpu.memory_space<vmem>>, %arg15: memref<1x16xf32, #tpu.memory_space<vmem>>, %arg16: memref<1x16xf32, #tpu.memory_space<vmem>>, %arg17: memref<1x16xf32, #tpu.memory_space<vmem>>, %arg18: memref<16x32xf32, #tpu.memory_space<vmem>>, %arg19: memref<16x32xf32, #tpu.memory_space<vmem>>, %arg20: memref<1x32xf32, #tpu.memory_space<vmem>>, %arg21: memref<32x32xf32, #tpu.memory_space<vmem>>, %arg22: memref<1x32xf32, #tpu.memory_space<vmem>>, %arg23: memref<32x16xf32, #tpu.memory_space<vmem>>, %arg24: memref<1x16xf32, #tpu.memory_space<vmem>>, %arg25: memref<32x16xf32, #tpu.memory_space<vmem>>, %arg26: memref<1x16xf32, #tpu.memory_space<vmem>>, %arg27: memref<1x16x16xf32, #tpu.memory_space<vmem>>, %arg28: memref<1x16x16xf32, #tpu.memory_space<vmem>>, %arg29: memref<8x8x64xf32, #tpu.memory_space<vmem>>, %arg30: memref<16x64xf32, #tpu.memory_space<vmem>>) attributes {dimension_semantics = [#tpu.dimension_semantics<parallel>], iteration_bounds = array<i64: 2>, scalar_prefetch = 0 : i64, scratch_operands = 2 : i64, tpu.core_type = #tpu.core_type<tc>, window_params = [{transform_indices = @transform_0, window_bounds = array<i64: 1, 6, 6, 16>}, {pipeline_mode = #tpu.pipeline_mode<synchronous>, transform_indices = @transform_1, window_bounds = array<i64: 9, 2, 16>}, {pipeline_mode = #tpu.pipeline_mode<synchronous>, transform_indices = @transform_2, window_bounds = array<i64: 2, 16>}, {pipeline_mode = #tpu.pipeline_mode<synchronous>, transform_indices = @transform_3, window_bounds = array<i64: 16, 32>}, {pipeline_mode = #tpu.pipeline_mode<synchronous>, transform_indices = @transform_4, window_bounds = array<i64: 1, 32>}, {pipeline_mode = #tpu.pipeline_mode<synchronous>, transform_indices = @transform_5, window_bounds = array<i64: 16, 32>}, {pipeline_mode = #tpu.pipeline_mode<synchronous>, transform_indices = @transform_6, window_bounds = array<i64: 1, 32>}, {pipeline_mode = #tpu.pipeline_mode<synchronous>, transform_indices = @transform_7, window_bounds = array<i64: 5, 5, 64>}, {pipeline_mode = #tpu.pipeline_mode<synchronous>, transform_indices = @transform_8, window_bounds = array<i64: 1, 64>}, {pipeline_mode = #tpu.pipeline_mode<synchronous>, transform_indices = @transform_9, window_bounds = array<i64: 32, 16>}, {pipeline_mode = #tpu.pipeline_mode<synchronous>, transform_indices = @transform_10, window_bounds = array<i64: 1, 16>}, {pipeline_mode = #tpu.pipeline_mode<synchronous>, transform_indices = @transform_11, window_bounds = array<i64: 32, 16>}, {pipeline_mode = #tpu.pipeline_mode<synchronous>, transform_indices = @transform_12, window_bounds = array<i64: 1, 16>}, {pipeline_mode = #tpu.pipeline_mode<synchronous>, transform_indices = @transform_13, window_bounds = array<i64: 1, 16>}, {pipeline_mode = #tpu.pipeline_mode<synchronous>, transform_indices = @transform_14, window_bounds = array<i64: 1, 16>}, {pipeline_mode = #tpu.pipeline_mode<synchronous>, transform_indices = @transform_15, window_bounds = array<i64: 1, 16>}, {pipeline_mode = #tpu.pipeline_mode<synchronous>, transform_indices = @transform_16, window_bounds = array<i64: 1, 16>}, {pipeline_mode = #tpu.pipeline_mode<synchronous>, transform_indices = @transform_17, window_bounds = array<i64: 16, 32>}, {pipeline_mode = #tpu.pipeline_mode<synchronous>, transform_indices = @transform_18, window_bounds = array<i64: 16, 32>}, {pipeline_mode = #tpu.pipeline_mode<synchronous>, transform_indices = @transform_19, window_bounds = array<i64: 1, 32>}, {pipeline_mode = #tpu.pipeline_mode<synchronous>, transform_indices = @transform_20, window_bounds = array<i64: 32, 32>}, {pipeline_mode = #tpu.pipeline_mode<synchronous>, transform_indices = @transform_21, window_bounds = array<i64: 1, 32>}, {pipeline_mode = #tpu.pipeline_mode<synchronous>, transform_indices = @transform_22, window_bounds = array<i64: 32, 16>}, {pipeline_mode = #tpu.pipeline_mode<synchronous>, transform_indices = @transform_23, window_bounds = array<i64: 1, 16>}, {pipeline_mode = #tpu.pipeline_mode<synchronous>, transform_indices = @transform_24, window_bounds = array<i64: 32, 16>}, {pipeline_mode = #tpu.pipeline_mode<synchronous>, transform_indices = @transform_25, window_bounds = array<i64: 1, 16>}, {transform_indices = @transform_26, window_bounds = array<i64: 1, 16, 16>}, {transform_indices = @transform_27, window_bounds = array<i64: 1, 16, 16>}]} {
    %cst = arith.constant 0.000000e+00 : f32
    %0 = vector.broadcast %cst : f32 to vector<8x8x64xf32>
    %c0 = arith.constant 0 : index
    %c0_0 = arith.constant 0 : index
    %c0_1 = arith.constant 0 : index
    %1 = vector.load %arg29[%c0, %c0_0, %c0_1] : memref<8x8x64xf32, #tpu.memory_space<vmem>>, vector<8x8x64xf32>
    tpu.vector_store %arg29[%c0, %c0_0, %c0_1], %0 {strides = array<i32>} : memref<8x8x64xf32, #tpu.memory_space<vmem>>, vector<8x8x64xf32>,
    %c0_2 = arith.constant 0 : index
    %c0_3 = arith.constant 0 : index
    %c0_4 = arith.constant 0 : index
    %c0_5 = arith.constant 0 : index
    %2 = vector.load %arg1[%c0_2, %c0_3, %c0_4, %c0_5] : memref<1x6x6x16xf32, #tpu.memory_space<vmem>>, vector<1x4x4x16xf32>
    %3 = vector.shape_cast %2 : vector<1x4x4x16xf32> to vector<4x4x16xf32>
    %c0_6 = arith.constant 0 : index
    %c0_7 = arith.constant 0 : index
    %c0_8 = arith.constant 0 : index
    %4 = vector.load %arg2[%c0_6, %c0_7, %c0_8] : memref<9x2x16xf32, #tpu.memory_space<vmem>>, vector<1x1x16xf32>
    %5 = vector.shape_cast %4 : vector<1x1x16xf32> to vector<1x16xf32>
    %6 = vector.shape_cast %5 : vector<1x16xf32> to vector<1x1x16xf32>
    %7 = vector.broadcast %6 : vector<1x1x16xf32> to vector<4x4x16xf32>
    %8 = arith.mulf %3, %7 : vector<4x4x16xf32>
    %c0_9 = arith.constant 0 : index
    %c1 = arith.constant 1 : index
    %c0_10 = arith.constant 0 : index
    %9 = vector.load %arg2[%c0_9, %c1, %c0_10] : memref<9x2x16xf32, #tpu.memory_space<vmem>>, vector<1x1x16xf32>
    %10 = vector.shape_cast %9 : vector<1x1x16xf32> to vector<1x16xf32>
    %11 = vector.shape_cast %10 : vector<1x16xf32> to vector<1x1x16xf32>
    %12 = vector.broadcast %11 : vector<1x1x16xf32> to vector<4x4x16xf32>
    %13 = arith.mulf %3, %12 : vector<4x4x16xf32>
    %c0_11 = arith.constant 0 : index
    %c0_12 = arith.constant 0 : index
    %c1_13 = arith.constant 1 : index
    %c0_14 = arith.constant 0 : index
    %14 = vector.load %arg1[%c0_11, %c0_12, %c1_13, %c0_14] : memref<1x6x6x16xf32, #tpu.memory_space<vmem>>, vector<1x4x4x16xf32>
    %15 = vector.shape_cast %14 : vector<1x4x4x16xf32> to vector<4x4x16xf32>
    %c1_15 = arith.constant 1 : index
    %c0_16 = arith.constant 0 : index
    %c0_17 = arith.constant 0 : index
    %16 = vector.load %arg2[%c1_15, %c0_16, %c0_17] : memref<9x2x16xf32, #tpu.memory_space<vmem>>, vector<1x1x16xf32>
    %17 = vector.shape_cast %16 : vector<1x1x16xf32> to vector<1x16xf32>
    %18 = vector.shape_cast %17 : vector<1x16xf32> to vector<1x1x16xf32>
    %19 = vector.broadcast %18 : vector<1x1x16xf32> to vector<4x4x16xf32>
    %20 = arith.mulf %15, %19 : vector<4x4x16xf32>
    %c1_18 = arith.constant 1 : index
    %c1_19 = arith.constant 1 : index
    %c0_20 = arith.constant 0 : index
    %21 = vector.load %arg2[%c1_18, %c1_19, %c0_20] : memref<9x2x16xf32, #tpu.memory_space<vmem>>, vector<1x1x16xf32>
    %22 = vector.shape_cast %21 : vector<1x1x16xf32> to vector<1x16xf32>
    %23 = vector.shape_cast %22 : vector<1x16xf32> to vector<1x1x16xf32>
    %24 = vector.broadcast %23 : vector<1x1x16xf32> to vector<4x4x16xf32>
    %25 = arith.mulf %15, %24 : vector<4x4x16xf32>
    %26 = arith.addf %8, %20 : vector<4x4x16xf32>
    %27 = arith.addf %13, %25 : vector<4x4x16xf32>
    %c0_21 = arith.constant 0 : index
    %c0_22 = arith.constant 0 : index
    %c2 = arith.constant 2 : index
    %c0_23 = arith.constant 0 : index
    %28 = vector.load %arg1[%c0_21, %c0_22, %c2, %c0_23] : memref<1x6x6x16xf32, #tpu.memory_space<vmem>>, vector<1x4x4x16xf32>
    %29 = vector.shape_cast %28 : vector<1x4x4x16xf32> to vector<4x4x16xf32>
    %c2_24 = arith.constant 2 : index
    %c0_25 = arith.constant 0 : index
    %c0_26 = arith.constant 0 : index
    %30 = vector.load %arg2[%c2_24, %c0_25, %c0_26] : memref<9x2x16xf32, #tpu.memory_space<vmem>>, vector<1x1x16xf32>
    %31 = vector.shape_cast %30 : vector<1x1x16xf32> to vector<1x16xf32>
    %32 = vector.shape_cast %31 : vector<1x16xf32> to vector<1x1x16xf32>
    %33 = vector.broadcast %32 : vector<1x1x16xf32> to vector<4x4x16xf32>
    %34 = arith.mulf %29, %33 : vector<4x4x16xf32>
    %c2_27 = arith.constant 2 : index
    %c1_28 = arith.constant 1 : index
    %c0_29 = arith.constant 0 : index
    %35 = vector.load %arg2[%c2_27, %c1_28, %c0_29] : memref<9x2x16xf32, #tpu.memory_space<vmem>>, vector<1x1x16xf32>
    %36 = vector.shape_cast %35 : vector<1x1x16xf32> to vector<1x16xf32>
    %37 = vector.shape_cast %36 : vector<1x16xf32> to vector<1x1x16xf32>
    %38 = vector.broadcast %37 : vector<1x1x16xf32> to vector<4x4x16xf32>
    %39 = arith.mulf %29, %38 : vector<4x4x16xf32>
    %40 = arith.addf %26, %34 : vector<4x4x16xf32>
    %41 = arith.addf %27, %39 : vector<4x4x16xf32>
    %c0_30 = arith.constant 0 : index
    %c1_31 = arith.constant 1 : index
    %c0_32 = arith.constant 0 : index
    %c0_33 = arith.constant 0 : index
    %42 = vector.load %arg1[%c0_30, %c1_31, %c0_32, %c0_33] : memref<1x6x6x16xf32, #tpu.memory_space<vmem>>, vector<1x4x4x16xf32>
    %43 = vector.shape_cast %42 : vector<1x4x4x16xf32> to vector<4x4x16xf32>
    %c3 = arith.constant 3 : index
    %c0_34 = arith.constant 0 : index
    %c0_35 = arith.constant 0 : index
    %44 = vector.load %arg2[%c3, %c0_34, %c0_35] : memref<9x2x16xf32, #tpu.memory_space<vmem>>, vector<1x1x16xf32>
    %45 = vector.shape_cast %44 : vector<1x1x16xf32> to vector<1x16xf32>
    %46 = vector.shape_cast %45 : vector<1x16xf32> to vector<1x1x16xf32>
    %47 = vector.broadcast %46 : vector<1x1x16xf32> to vector<4x4x16xf32>
    %48 = arith.mulf %43, %47 : vector<4x4x16xf32>
    %c3_36 = arith.constant 3 : index
    %c1_37 = arith.constant 1 : index
    %c0_38 = arith.constant 0 : index
    %49 = vector.load %arg2[%c3_36, %c1_37, %c0_38] : memref<9x2x16xf32, #tpu.memory_space<vmem>>, vector<1x1x16xf32>
    %50 = vector.shape_cast %49 : vector<1x1x16xf32> to vector<1x16xf32>
    %51 = vector.shape_cast %50 : vector<1x16xf32> to vector<1x1x16xf32>
    %52 = vector.broadcast %51 : vector<1x1x16xf32> to vector<4x4x16xf32>
    %53 = arith.mulf %43, %52 : vector<4x4x16xf32>
    %54 = arith.addf %40, %48 : vector<4x4x16xf32>
    %55 = arith.addf %41, %53 : vector<4x4x16xf32>
    %c0_39 = arith.constant 0 : index
    %c1_40 = arith.constant 1 : index
    %c1_41 = arith.constant 1 : index
    %c0_42 = arith.constant 0 : index
    %56 = vector.load %arg1[%c0_39, %c1_40, %c1_41, %c0_42] : memref<1x6x6x16xf32, #tpu.memory_space<vmem>>, vector<1x4x4x16xf32>
    %57 = vector.shape_cast %56 : vector<1x4x4x16xf32> to vector<4x4x16xf32>
    %c4 = arith.constant 4 : index
    %c0_43 = arith.constant 0 : index
    %c0_44 = arith.constant 0 : index
    %58 = vector.load %arg2[%c4, %c0_43, %c0_44] : memref<9x2x16xf32, #tpu.memory_space<vmem>>, vector<1x1x16xf32>
    %59 = vector.shape_cast %58 : vector<1x1x16xf32> to vector<1x16xf32>
    %60 = vector.shape_cast %59 : vector<1x16xf32> to vector<1x1x16xf32>
    %61 = vector.broadcast %60 : vector<1x1x16xf32> to vector<4x4x16xf32>
    %62 = arith.mulf %57, %61 : vector<4x4x16xf32>
    %c4_45 = arith.constant 4 : index
    %c1_46 = arith.constant 1 : index
    %c0_47 = arith.constant 0 : index
    %63 = vector.load %arg2[%c4_45, %c1_46, %c0_47] : memref<9x2x16xf32, #tpu.memory_space<vmem>>, vector<1x1x16xf32>
    %64 = vector.shape_cast %63 : vector<1x1x16xf32> to vector<1x16xf32>
    %65 = vector.shape_cast %64 : vector<1x16xf32> to vector<1x1x16xf32>
    %66 = vector.broadcast %65 : vector<1x1x16xf32> to vector<4x4x16xf32>
    %67 = arith.mulf %57, %66 : vector<4x4x16xf32>
    %68 = arith.addf %54, %62 : vector<4x4x16xf32>
    %69 = arith.addf %55, %67 : vector<4x4x16xf32>
    %c0_48 = arith.constant 0 : index
    %c1_49 = arith.constant 1 : index
    %c2_50 = arith.constant 2 : index
    %c0_51 = arith.constant 0 : index
    %70 = vector.load %arg1[%c0_48, %c1_49, %c2_50, %c0_51] : memref<1x6x6x16xf32, #tpu.memory_space<vmem>>, vector<1x4x4x16xf32>
    %71 = vector.shape_cast %70 : vector<1x4x4x16xf32> to vector<4x4x16xf32>
    %c5 = arith.constant 5 : index
    %c0_52 = arith.constant 0 : index
    %c0_53 = arith.constant 0 : index
    %72 = vector.load %arg2[%c5, %c0_52, %c0_53] : memref<9x2x16xf32, #tpu.memory_space<vmem>>, vector<1x1x16xf32>
    %73 = vector.shape_cast %72 : vector<1x1x16xf32> to vector<1x16xf32>
    %74 = vector.shape_cast %73 : vector<1x16xf32> to vector<1x1x16xf32>
    %75 = vector.broadcast %74 : vector<1x1x16xf32> to vector<4x4x16xf32>
    %76 = arith.mulf %71, %75 : vector<4x4x16xf32>
    %c5_54 = arith.constant 5 : index
    %c1_55 = arith.constant 1 : index
    %c0_56 = arith.constant 0 : index
    %77 = vector.load %arg2[%c5_54, %c1_55, %c0_56] : memref<9x2x16xf32, #tpu.memory_space<vmem>>, vector<1x1x16xf32>
    %78 = vector.shape_cast %77 : vector<1x1x16xf32> to vector<1x16xf32>
    %79 = vector.shape_cast %78 : vector<1x16xf32> to vector<1x1x16xf32>
    %80 = vector.broadcast %79 : vector<1x1x16xf32> to vector<4x4x16xf32>
    %81 = arith.mulf %71, %80 : vector<4x4x16xf32>
    %82 = arith.addf %68, %76 : vector<4x4x16xf32>
    %83 = arith.addf %69, %81 : vector<4x4x16xf32>
    %c0_57 = arith.constant 0 : index
    %c2_58 = arith.constant 2 : index
    %c0_59 = arith.constant 0 : index
    %c0_60 = arith.constant 0 : index
    %84 = vector.load %arg1[%c0_57, %c2_58, %c0_59, %c0_60] : memref<1x6x6x16xf32, #tpu.memory_space<vmem>>, vector<1x4x4x16xf32>
    %85 = vector.shape_cast %84 : vector<1x4x4x16xf32> to vector<4x4x16xf32>
    %c6 = arith.constant 6 : index
    %c0_61 = arith.constant 0 : index
    %c0_62 = arith.constant 0 : index
    %86 = vector.load %arg2[%c6, %c0_61, %c0_62] : memref<9x2x16xf32, #tpu.memory_space<vmem>>, vector<1x1x16xf32>
    %87 = vector.shape_cast %86 : vector<1x1x16xf32> to vector<1x16xf32>
    %88 = vector.shape_cast %87 : vector<1x16xf32> to vector<1x1x16xf32>
    %89 = vector.broadcast %88 : vector<1x1x16xf32> to vector<4x4x16xf32>
    %90 = arith.mulf %85, %89 : vector<4x4x16xf32>
    %c6_63 = arith.constant 6 : index
    %c1_64 = arith.constant 1 : index
    %c0_65 = arith.constant 0 : index
    %91 = vector.load %arg2[%c6_63, %c1_64, %c0_65] : memref<9x2x16xf32, #tpu.memory_space<vmem>>, vector<1x1x16xf32>
    %92 = vector.shape_cast %91 : vector<1x1x16xf32> to vector<1x16xf32>
    %93 = vector.shape_cast %92 : vector<1x16xf32> to vector<1x1x16xf32>
    %94 = vector.broadcast %93 : vector<1x1x16xf32> to vector<4x4x16xf32>
    %95 = arith.mulf %85, %94 : vector<4x4x16xf32>
    %96 = arith.addf %82, %90 : vector<4x4x16xf32>
    %97 = arith.addf %83, %95 : vector<4x4x16xf32>
    %c0_66 = arith.constant 0 : index
    %c2_67 = arith.constant 2 : index
    %c1_68 = arith.constant 1 : index
    %c0_69 = arith.constant 0 : index
    %98 = vector.load %arg1[%c0_66, %c2_67, %c1_68, %c0_69] : memref<1x6x6x16xf32, #tpu.memory_space<vmem>>, vector<1x4x4x16xf32>
    %99 = vector.shape_cast %98 : vector<1x4x4x16xf32> to vector<4x4x16xf32>
    %c7 = arith.constant 7 : index
    %c0_70 = arith.constant 0 : index
    %c0_71 = arith.constant 0 : index
    %100 = vector.load %arg2[%c7, %c0_70, %c0_71] : memref<9x2x16xf32, #tpu.memory_space<vmem>>, vector<1x1x16xf32>
    %101 = vector.shape_cast %100 : vector<1x1x16xf32> to vector<1x16xf32>
    %102 = vector.shape_cast %101 : vector<1x16xf32> to vector<1x1x16xf32>
    %103 = vector.broadcast %102 : vector<1x1x16xf32> to vector<4x4x16xf32>
    %104 = arith.mulf %99, %103 : vector<4x4x16xf32>
    %c7_72 = arith.constant 7 : index
    %c1_73 = arith.constant 1 : index
    %c0_74 = arith.constant 0 : index
    %105 = vector.load %arg2[%c7_72, %c1_73, %c0_74] : memref<9x2x16xf32, #tpu.memory_space<vmem>>, vector<1x1x16xf32>
    %106 = vector.shape_cast %105 : vector<1x1x16xf32> to vector<1x16xf32>
    %107 = vector.shape_cast %106 : vector<1x16xf32> to vector<1x1x16xf32>
    %108 = vector.broadcast %107 : vector<1x1x16xf32> to vector<4x4x16xf32>
    %109 = arith.mulf %99, %108 : vector<4x4x16xf32>
    %110 = arith.addf %96, %104 : vector<4x4x16xf32>
    %111 = arith.addf %97, %109 : vector<4x4x16xf32>
    %c0_75 = arith.constant 0 : index
    %c2_76 = arith.constant 2 : index
    %c2_77 = arith.constant 2 : index
    %c0_78 = arith.constant 0 : index
    %112 = vector.load %arg1[%c0_75, %c2_76, %c2_77, %c0_78] : memref<1x6x6x16xf32, #tpu.memory_space<vmem>>, vector<1x4x4x16xf32>
    %113 = vector.shape_cast %112 : vector<1x4x4x16xf32> to vector<4x4x16xf32>
    %c8 = arith.constant 8 : index
    %c0_79 = arith.constant 0 : index
    %c0_80 = arith.constant 0 : index
    %114 = vector.load %arg2[%c8, %c0_79, %c0_80] : memref<9x2x16xf32, #tpu.memory_space<vmem>>, vector<1x1x16xf32>
    %115 = vector.shape_cast %114 : vector<1x1x16xf32> to vector<1x16xf32>
    %116 = vector.shape_cast %115 : vector<1x16xf32> to vector<1x1x16xf32>
    %117 = vector.broadcast %116 : vector<1x1x16xf32> to vector<4x4x16xf32>
    %118 = arith.mulf %113, %117 : vector<4x4x16xf32>
    %c8_81 = arith.constant 8 : index
    %c1_82 = arith.constant 1 : index
    %c0_83 = arith.constant 0 : index
    %119 = vector.load %arg2[%c8_81, %c1_82, %c0_83] : memref<9x2x16xf32, #tpu.memory_space<vmem>>, vector<1x1x16xf32>
    %120 = vector.shape_cast %119 : vector<1x1x16xf32> to vector<1x16xf32>
    %121 = vector.shape_cast %120 : vector<1x16xf32> to vector<1x1x16xf32>
    %122 = vector.broadcast %121 : vector<1x1x16xf32> to vector<4x4x16xf32>
    %123 = arith.mulf %113, %122 : vector<4x4x16xf32>
    %124 = arith.addf %110, %118 : vector<4x4x16xf32>
    %125 = arith.addf %111, %123 : vector<4x4x16xf32>
    %c0_84 = arith.constant 0 : index
    %c0_85 = arith.constant 0 : index
    %126 = vector.load %arg3[%c0_84, %c0_85] : memref<2x16xf32, #tpu.memory_space<vmem>>, vector<1x16xf32>
    %127 = vector.shape_cast %126 : vector<1x16xf32> to vector<1x1x16xf32>
    %128 = vector.broadcast %127 : vector<1x1x16xf32> to vector<4x4x16xf32>
    %129 = arith.addf %124, %128 : vector<4x4x16xf32>
    %c1_86 = arith.constant 1 : index
    %c0_87 = arith.constant 0 : index
    %130 = vector.load %arg3[%c1_86, %c0_87] : memref<2x16xf32, #tpu.memory_space<vmem>>, vector<1x16xf32>
    %131 = vector.shape_cast %130 : vector<1x16xf32> to vector<1x1x16xf32>
    %132 = vector.broadcast %131 : vector<1x1x16xf32> to vector<4x4x16xf32>
    %133 = arith.addf %125, %132 : vector<4x4x16xf32>
    %134 = vector.extract_strided_slice %129 {offsets = [0, 0, 0], sizes = [1, 4, 16], strides = [1, 1, 1]} : vector<4x4x16xf32> to vector<1x4x16xf32>
    %135 = vector.shape_cast %134 : vector<1x4x16xf32> to vector<4x16xf32>
    %c0_88 = arith.constant 0 : index
    %c0_89 = arith.constant 0 : index
    %136 = vector.load %arg4[%c0_88, %c0_89] : memref<16x32xf32, #tpu.memory_space<vmem>>, vector<16x32xf32>
    %cst_90 = arith.constant dense<0.000000e+00> : vector<4x32xf32>
    %137 = tpu.matmul %135, %136, %cst_90 {dimension_numbers = #tpu.dot_dimension_numbers<[1], [0], [0], [1], [0, 0, 1, 1], [], []>} : vector<4x16xf32>, vector<16x32xf32>, vector<4x32xf32> -> vector<4x32xf32>
    %c0_91 = arith.constant 0 : index
    %c0_92 = arith.constant 0 : index
    %138 = vector.load %arg5[%c0_91, %c0_92] : memref<1x32xf32, #tpu.memory_space<vmem>>, vector<1x32xf32>
    %139 = vector.broadcast %138 : vector<1x32xf32> to vector<4x32xf32>
    %140 = arith.addf %137, %139 : vector<4x32xf32>
    %141 = vector.extract_strided_slice %133 {offsets = [0, 0, 0], sizes = [1, 4, 16], strides = [1, 1, 1]} : vector<4x4x16xf32> to vector<1x4x16xf32>
    %142 = vector.shape_cast %141 : vector<1x4x16xf32> to vector<4x16xf32>
    %c0_93 = arith.constant 0 : index
    %c0_94 = arith.constant 0 : index
    %143 = vector.load %arg6[%c0_93, %c0_94] : memref<16x32xf32, #tpu.memory_space<vmem>>, vector<16x32xf32>
    %cst_95 = arith.constant dense<0.000000e+00> : vector<4x32xf32>
    %144 = tpu.matmul %142, %143, %cst_95 {dimension_numbers = #tpu.dot_dimension_numbers<[1], [0], [0], [1], [0, 0, 1, 1], [], []>} : vector<4x16xf32>, vector<16x32xf32>, vector<4x32xf32> -> vector<4x32xf32>
    %c0_96 = arith.constant 0 : index
    %c0_97 = arith.constant 0 : index
    %145 = vector.load %arg7[%c0_96, %c0_97] : memref<1x32xf32, #tpu.memory_space<vmem>>, vector<1x32xf32>
    %146 = vector.broadcast %145 : vector<1x32xf32> to vector<4x32xf32>
    %147 = arith.addf %144, %146 : vector<4x32xf32>
    %148 = tpu.concatenate %140, %147 in 1 : vector<4x32xf32>, vector<4x32xf32> -> vector<4x64xf32>
    %cst_98 = arith.constant 0.000000e+00 : f32
    %149 = vector.broadcast %cst_98 : f32 to vector<4x64xf32>
    %150 = arith.maximumf %148, %149 : vector<4x64xf32>
    %c2_99 = arith.constant 2 : index
    %c2_100 = arith.constant 2 : index
    %c0_101 = arith.constant 0 : index
    %151 = vector.load %arg29[%c2_99, %c2_100, %c0_101] : memref<8x8x64xf32, #tpu.memory_space<vmem>>, vector<1x4x64xf32>
    %152 = vector.shape_cast %151 : vector<1x4x64xf32> to vector<4x64xf32>
    %153 = vector.shape_cast %150 : vector<4x64xf32> to vector<1x4x64xf32>
    tpu.vector_store %arg29[%c2_99, %c2_100, %c0_101], %153 {strides = array<i32>} : memref<8x8x64xf32, #tpu.memory_space<vmem>>, vector<1x4x64xf32>,
    %154 = vector.extract_strided_slice %129 {offsets = [1, 0, 0], sizes = [1, 4, 16], strides = [1, 1, 1]} : vector<4x4x16xf32> to vector<1x4x16xf32>
    %155 = vector.shape_cast %154 : vector<1x4x16xf32> to vector<4x16xf32>
    %c0_102 = arith.constant 0 : index
    %c0_103 = arith.constant 0 : index
    %156 = vector.load %arg4[%c0_102, %c0_103] : memref<16x32xf32, #tpu.memory_space<vmem>>, vector<16x32xf32>
    %cst_104 = arith.constant dense<0.000000e+00> : vector<4x32xf32>
    %157 = tpu.matmul %155, %156, %cst_104 {dimension_numbers = #tpu.dot_dimension_numbers<[1], [0], [0], [1], [0, 0, 1, 1], [], []>} : vector<4x16xf32>, vector<16x32xf32>, vector<4x32xf32> -> vector<4x32xf32>
    %c0_105 = arith.constant 0 : index
    %c0_106 = arith.constant 0 : index
    %158 = vector.load %arg5[%c0_105, %c0_106] : memref<1x32xf32, #tpu.memory_space<vmem>>, vector<1x32xf32>
    %159 = vector.broadcast %158 : vector<1x32xf32> to vector<4x32xf32>
    %160 = arith.addf %157, %159 : vector<4x32xf32>
    %161 = vector.extract_strided_slice %133 {offsets = [1, 0, 0], sizes = [1, 4, 16], strides = [1, 1, 1]} : vector<4x4x16xf32> to vector<1x4x16xf32>
    %162 = vector.shape_cast %161 : vector<1x4x16xf32> to vector<4x16xf32>
    %c0_107 = arith.constant 0 : index
    %c0_108 = arith.constant 0 : index
    %163 = vector.load %arg6[%c0_107, %c0_108] : memref<16x32xf32, #tpu.memory_space<vmem>>, vector<16x32xf32>
    %cst_109 = arith.constant dense<0.000000e+00> : vector<4x32xf32>
    %164 = tpu.matmul %162, %163, %cst_109 {dimension_numbers = #tpu.dot_dimension_numbers<[1], [0], [0], [1], [0, 0, 1, 1], [], []>} : vector<4x16xf32>, vector<16x32xf32>, vector<4x32xf32> -> vector<4x32xf32>
    %c0_110 = arith.constant 0 : index
    %c0_111 = arith.constant 0 : index
    %165 = vector.load %arg7[%c0_110, %c0_111] : memref<1x32xf32, #tpu.memory_space<vmem>>, vector<1x32xf32>
    %166 = vector.broadcast %165 : vector<1x32xf32> to vector<4x32xf32>
    %167 = arith.addf %164, %166 : vector<4x32xf32>
    %168 = tpu.concatenate %160, %167 in 1 : vector<4x32xf32>, vector<4x32xf32> -> vector<4x64xf32>
    %cst_112 = arith.constant 0.000000e+00 : f32
    %169 = vector.broadcast %cst_112 : f32 to vector<4x64xf32>
    %170 = arith.maximumf %168, %169 : vector<4x64xf32>
    %c3_113 = arith.constant 3 : index
    %c2_114 = arith.constant 2 : index
    %c0_115 = arith.constant 0 : index
    %171 = vector.load %arg29[%c3_113, %c2_114, %c0_115] : memref<8x8x64xf32, #tpu.memory_space<vmem>>, vector<1x4x64xf32>
    %172 = vector.shape_cast %171 : vector<1x4x64xf32> to vector<4x64xf32>
    %173 = vector.shape_cast %170 : vector<4x64xf32> to vector<1x4x64xf32>
    tpu.vector_store %arg29[%c3_113, %c2_114, %c0_115], %173 {strides = array<i32>} : memref<8x8x64xf32, #tpu.memory_space<vmem>>, vector<1x4x64xf32>,
    %174 = vector.extract_strided_slice %129 {offsets = [2, 0, 0], sizes = [1, 4, 16], strides = [1, 1, 1]} : vector<4x4x16xf32> to vector<1x4x16xf32>
    %175 = vector.shape_cast %174 : vector<1x4x16xf32> to vector<4x16xf32>
    %c0_116 = arith.constant 0 : index
    %c0_117 = arith.constant 0 : index
    %176 = vector.load %arg4[%c0_116, %c0_117] : memref<16x32xf32, #tpu.memory_space<vmem>>, vector<16x32xf32>
    %cst_118 = arith.constant dense<0.000000e+00> : vector<4x32xf32>
    %177 = tpu.matmul %175, %176, %cst_118 {dimension_numbers = #tpu.dot_dimension_numbers<[1], [0], [0], [1], [0, 0, 1, 1], [], []>} : vector<4x16xf32>, vector<16x32xf32>, vector<4x32xf32> -> vector<4x32xf32>
    %c0_119 = arith.constant 0 : index
    %c0_120 = arith.constant 0 : index
    %178 = vector.load %arg5[%c0_119, %c0_120] : memref<1x32xf32, #tpu.memory_space<vmem>>, vector<1x32xf32>
    %179 = vector.broadcast %178 : vector<1x32xf32> to vector<4x32xf32>
    %180 = arith.addf %177, %179 : vector<4x32xf32>
    %181 = vector.extract_strided_slice %133 {offsets = [2, 0, 0], sizes = [1, 4, 16], strides = [1, 1, 1]} : vector<4x4x16xf32> to vector<1x4x16xf32>
    %182 = vector.shape_cast %181 : vector<1x4x16xf32> to vector<4x16xf32>
    %c0_121 = arith.constant 0 : index
    %c0_122 = arith.constant 0 : index
    %183 = vector.load %arg6[%c0_121, %c0_122] : memref<16x32xf32, #tpu.memory_space<vmem>>, vector<16x32xf32>
    %cst_123 = arith.constant dense<0.000000e+00> : vector<4x32xf32>
    %184 = tpu.matmul %182, %183, %cst_123 {dimension_numbers = #tpu.dot_dimension_numbers<[1], [0], [0], [1], [0, 0, 1, 1], [], []>} : vector<4x16xf32>, vector<16x32xf32>, vector<4x32xf32> -> vector<4x32xf32>
    %c0_124 = arith.constant 0 : index
    %c0_125 = arith.constant 0 : index
    %185 = vector.load %arg7[%c0_124, %c0_125] : memref<1x32xf32, #tpu.memory_space<vmem>>, vector<1x32xf32>
    %186 = vector.broadcast %185 : vector<1x32xf32> to vector<4x32xf32>
    %187 = arith.addf %184, %186 : vector<4x32xf32>
    %188 = tpu.concatenate %180, %187 in 1 : vector<4x32xf32>, vector<4x32xf32> -> vector<4x64xf32>
    %cst_126 = arith.constant 0.000000e+00 : f32
    %189 = vector.broadcast %cst_126 : f32 to vector<4x64xf32>
    %190 = arith.maximumf %188, %189 : vector<4x64xf32>
    %c4_127 = arith.constant 4 : index
    %c2_128 = arith.constant 2 : index
    %c0_129 = arith.constant 0 : index
    %191 = vector.load %arg29[%c4_127, %c2_128, %c0_129] : memref<8x8x64xf32, #tpu.memory_space<vmem>>, vector<1x4x64xf32>
    %192 = vector.shape_cast %191 : vector<1x4x64xf32> to vector<4x64xf32>
    %193 = vector.shape_cast %190 : vector<4x64xf32> to vector<1x4x64xf32>
    tpu.vector_store %arg29[%c4_127, %c2_128, %c0_129], %193 {strides = array<i32>} : memref<8x8x64xf32, #tpu.memory_space<vmem>>, vector<1x4x64xf32>,
    %194 = vector.extract_strided_slice %129 {offsets = [3, 0, 0], sizes = [1, 4, 16], strides = [1, 1, 1]} : vector<4x4x16xf32> to vector<1x4x16xf32>
    %195 = vector.shape_cast %194 : vector<1x4x16xf32> to vector<4x16xf32>
    %c0_130 = arith.constant 0 : index
    %c0_131 = arith.constant 0 : index
    %196 = vector.load %arg4[%c0_130, %c0_131] : memref<16x32xf32, #tpu.memory_space<vmem>>, vector<16x32xf32>
    %cst_132 = arith.constant dense<0.000000e+00> : vector<4x32xf32>
    %197 = tpu.matmul %195, %196, %cst_132 {dimension_numbers = #tpu.dot_dimension_numbers<[1], [0], [0], [1], [0, 0, 1, 1], [], []>} : vector<4x16xf32>, vector<16x32xf32>, vector<4x32xf32> -> vector<4x32xf32>
    %c0_133 = arith.constant 0 : index
    %c0_134 = arith.constant 0 : index
    %198 = vector.load %arg5[%c0_133, %c0_134] : memref<1x32xf32, #tpu.memory_space<vmem>>, vector<1x32xf32>
    %199 = vector.broadcast %198 : vector<1x32xf32> to vector<4x32xf32>
    %200 = arith.addf %197, %199 : vector<4x32xf32>
    %201 = vector.extract_strided_slice %133 {offsets = [3, 0, 0], sizes = [1, 4, 16], strides = [1, 1, 1]} : vector<4x4x16xf32> to vector<1x4x16xf32>
    %202 = vector.shape_cast %201 : vector<1x4x16xf32> to vector<4x16xf32>
    %c0_135 = arith.constant 0 : index
    %c0_136 = arith.constant 0 : index
    %203 = vector.load %arg6[%c0_135, %c0_136] : memref<16x32xf32, #tpu.memory_space<vmem>>, vector<16x32xf32>
    %cst_137 = arith.constant dense<0.000000e+00> : vector<4x32xf32>
    %204 = tpu.matmul %202, %203, %cst_137 {dimension_numbers = #tpu.dot_dimension_numbers<[1], [0], [0], [1], [0, 0, 1, 1], [], []>} : vector<4x16xf32>, vector<16x32xf32>, vector<4x32xf32> -> vector<4x32xf32>
    %c0_138 = arith.constant 0 : index
    %c0_139 = arith.constant 0 : index
    %205 = vector.load %arg7[%c0_138, %c0_139] : memref<1x32xf32, #tpu.memory_space<vmem>>, vector<1x32xf32>
    %206 = vector.broadcast %205 : vector<1x32xf32> to vector<4x32xf32>
    %207 = arith.addf %204, %206 : vector<4x32xf32>
    %208 = tpu.concatenate %200, %207 in 1 : vector<4x32xf32>, vector<4x32xf32> -> vector<4x64xf32>
    %cst_140 = arith.constant 0.000000e+00 : f32
    %209 = vector.broadcast %cst_140 : f32 to vector<4x64xf32>
    %210 = arith.maximumf %208, %209 : vector<4x64xf32>
    %c5_141 = arith.constant 5 : index
    %c2_142 = arith.constant 2 : index
    %c0_143 = arith.constant 0 : index
    %211 = vector.load %arg29[%c5_141, %c2_142, %c0_143] : memref<8x8x64xf32, #tpu.memory_space<vmem>>, vector<1x4x64xf32>
    %212 = vector.shape_cast %211 : vector<1x4x64xf32> to vector<4x64xf32>
    %213 = vector.shape_cast %210 : vector<4x64xf32> to vector<1x4x64xf32>
    tpu.vector_store %arg29[%c5_141, %c2_142, %c0_143], %213 {strides = array<i32>} : memref<8x8x64xf32, #tpu.memory_space<vmem>>, vector<1x4x64xf32>,
    %c0_144 = arith.constant 0 : index
    %c0_145 = arith.constant 0 : index
    %c0_146 = arith.constant 0 : index
    %214 = vector.load %arg29[%c0_144, %c0_145, %c0_146] : memref<8x8x64xf32, #tpu.memory_space<vmem>>, vector<4x4x64xf32>
    %c0_147 = arith.constant 0 : index
    %c0_148 = arith.constant 0 : index
    %c0_149 = arith.constant 0 : index
    %215 = vector.load %arg8[%c0_147, %c0_148, %c0_149] : memref<5x5x64xf32, #tpu.memory_space<vmem>>, vector<1x1x64xf32>
    %216 = vector.shape_cast %215 : vector<1x1x64xf32> to vector<1x64xf32>
    %217 = vector.shape_cast %216 : vector<1x64xf32> to vector<1x1x64xf32>
    %218 = vector.broadcast %217 : vector<1x1x64xf32> to vector<4x4x64xf32>
    %219 = arith.mulf %214, %218 : vector<4x4x64xf32>
    %c0_150 = arith.constant 0 : index
    %c1_151 = arith.constant 1 : index
    %c0_152 = arith.constant 0 : index
    %220 = vector.load %arg29[%c0_150, %c1_151, %c0_152] : memref<8x8x64xf32, #tpu.memory_space<vmem>>, vector<4x4x64xf32>
    %c0_153 = arith.constant 0 : index
    %c1_154 = arith.constant 1 : index
    %c0_155 = arith.constant 0 : index
    %221 = vector.load %arg8[%c0_153, %c1_154, %c0_155] : memref<5x5x64xf32, #tpu.memory_space<vmem>>, vector<1x1x64xf32>
    %222 = vector.shape_cast %221 : vector<1x1x64xf32> to vector<1x64xf32>
    %223 = vector.shape_cast %222 : vector<1x64xf32> to vector<1x1x64xf32>
    %224 = vector.broadcast %223 : vector<1x1x64xf32> to vector<4x4x64xf32>
    %225 = arith.mulf %220, %224 : vector<4x4x64xf32>
    %226 = arith.addf %219, %225 : vector<4x4x64xf32>
    %c0_156 = arith.constant 0 : index
    %c2_157 = arith.constant 2 : index
    %c0_158 = arith.constant 0 : index
    %227 = vector.load %arg29[%c0_156, %c2_157, %c0_158] : memref<8x8x64xf32, #tpu.memory_space<vmem>>, vector<4x4x64xf32>
    %c0_159 = arith.constant 0 : index
    %c2_160 = arith.constant 2 : index
    %c0_161 = arith.constant 0 : index
    %228 = vector.load %arg8[%c0_159, %c2_160, %c0_161] : memref<5x5x64xf32, #tpu.memory_space<vmem>>, vector<1x1x64xf32>
    %229 = vector.shape_cast %228 : vector<1x1x64xf32> to vector<1x64xf32>
    %230 = vector.shape_cast %229 : vector<1x64xf32> to vector<1x1x64xf32>
    %231 = vector.broadcast %230 : vector<1x1x64xf32> to vector<4x4x64xf32>
    %232 = arith.mulf %227, %231 : vector<4x4x64xf32>
    %233 = arith.addf %226, %232 : vector<4x4x64xf32>
    %c0_162 = arith.constant 0 : index
    %c3_163 = arith.constant 3 : index
    %c0_164 = arith.constant 0 : index
    %234 = vector.load %arg29[%c0_162, %c3_163, %c0_164] : memref<8x8x64xf32, #tpu.memory_space<vmem>>, vector<4x4x64xf32>
    %c0_165 = arith.constant 0 : index
    %c3_166 = arith.constant 3 : index
    %c0_167 = arith.constant 0 : index
    %235 = vector.load %arg8[%c0_165, %c3_166, %c0_167] : memref<5x5x64xf32, #tpu.memory_space<vmem>>, vector<1x1x64xf32>
    %236 = vector.shape_cast %235 : vector<1x1x64xf32> to vector<1x64xf32>
    %237 = vector.shape_cast %236 : vector<1x64xf32> to vector<1x1x64xf32>
    %238 = vector.broadcast %237 : vector<1x1x64xf32> to vector<4x4x64xf32>
    %239 = arith.mulf %234, %238 : vector<4x4x64xf32>
    %240 = arith.addf %233, %239 : vector<4x4x64xf32>
    %c0_168 = arith.constant 0 : index
    %c4_169 = arith.constant 4 : index
    %c0_170 = arith.constant 0 : index
    %241 = vector.load %arg29[%c0_168, %c4_169, %c0_170] : memref<8x8x64xf32, #tpu.memory_space<vmem>>, vector<4x4x64xf32>
    %c0_171 = arith.constant 0 : index
    %c4_172 = arith.constant 4 : index
    %c0_173 = arith.constant 0 : index
    %242 = vector.load %arg8[%c0_171, %c4_172, %c0_173] : memref<5x5x64xf32, #tpu.memory_space<vmem>>, vector<1x1x64xf32>
    %243 = vector.shape_cast %242 : vector<1x1x64xf32> to vector<1x64xf32>
    %244 = vector.shape_cast %243 : vector<1x64xf32> to vector<1x1x64xf32>
    %245 = vector.broadcast %244 : vector<1x1x64xf32> to vector<4x4x64xf32>
    %246 = arith.mulf %241, %245 : vector<4x4x64xf32>
    %247 = arith.addf %240, %246 : vector<4x4x64xf32>
    %c1_174 = arith.constant 1 : index
    %c0_175 = arith.constant 0 : index
    %c0_176 = arith.constant 0 : index
    %248 = vector.load %arg29[%c1_174, %c0_175, %c0_176] : memref<8x8x64xf32, #tpu.memory_space<vmem>>, vector<4x4x64xf32>
    %c1_177 = arith.constant 1 : index
    %c0_178 = arith.constant 0 : index
    %c0_179 = arith.constant 0 : index
    %249 = vector.load %arg8[%c1_177, %c0_178, %c0_179] : memref<5x5x64xf32, #tpu.memory_space<vmem>>, vector<1x1x64xf32>
    %250 = vector.shape_cast %249 : vector<1x1x64xf32> to vector<1x64xf32>
    %251 = vector.shape_cast %250 : vector<1x64xf32> to vector<1x1x64xf32>
    %252 = vector.broadcast %251 : vector<1x1x64xf32> to vector<4x4x64xf32>
    %253 = arith.mulf %248, %252 : vector<4x4x64xf32>
    %254 = arith.addf %247, %253 : vector<4x4x64xf32>
    %c1_180 = arith.constant 1 : index
    %c1_181 = arith.constant 1 : index
    %c0_182 = arith.constant 0 : index
    %255 = vector.load %arg29[%c1_180, %c1_181, %c0_182] : memref<8x8x64xf32, #tpu.memory_space<vmem>>, vector<4x4x64xf32>
    %c1_183 = arith.constant 1 : index
    %c1_184 = arith.constant 1 : index
    %c0_185 = arith.constant 0 : index
    %256 = vector.load %arg8[%c1_183, %c1_184, %c0_185] : memref<5x5x64xf32, #tpu.memory_space<vmem>>, vector<1x1x64xf32>
    %257 = vector.shape_cast %256 : vector<1x1x64xf32> to vector<1x64xf32>
    %258 = vector.shape_cast %257 : vector<1x64xf32> to vector<1x1x64xf32>
    %259 = vector.broadcast %258 : vector<1x1x64xf32> to vector<4x4x64xf32>
    %260 = arith.mulf %255, %259 : vector<4x4x64xf32>
    %261 = arith.addf %254, %260 : vector<4x4x64xf32>
    %c1_186 = arith.constant 1 : index
    %c2_187 = arith.constant 2 : index
    %c0_188 = arith.constant 0 : index
    %262 = vector.load %arg29[%c1_186, %c2_187, %c0_188] : memref<8x8x64xf32, #tpu.memory_space<vmem>>, vector<4x4x64xf32>
    %c1_189 = arith.constant 1 : index
    %c2_190 = arith.constant 2 : index
    %c0_191 = arith.constant 0 : index
    %263 = vector.load %arg8[%c1_189, %c2_190, %c0_191] : memref<5x5x64xf32, #tpu.memory_space<vmem>>, vector<1x1x64xf32>
    %264 = vector.shape_cast %263 : vector<1x1x64xf32> to vector<1x64xf32>
    %265 = vector.shape_cast %264 : vector<1x64xf32> to vector<1x1x64xf32>
    %266 = vector.broadcast %265 : vector<1x1x64xf32> to vector<4x4x64xf32>
    %267 = arith.mulf %262, %266 : vector<4x4x64xf32>
    %268 = arith.addf %261, %267 : vector<4x4x64xf32>
    %c1_192 = arith.constant 1 : index
    %c3_193 = arith.constant 3 : index
    %c0_194 = arith.constant 0 : index
    %269 = vector.load %arg29[%c1_192, %c3_193, %c0_194] : memref<8x8x64xf32, #tpu.memory_space<vmem>>, vector<4x4x64xf32>
    %c1_195 = arith.constant 1 : index
    %c3_196 = arith.constant 3 : index
    %c0_197 = arith.constant 0 : index
    %270 = vector.load %arg8[%c1_195, %c3_196, %c0_197] : memref<5x5x64xf32, #tpu.memory_space<vmem>>, vector<1x1x64xf32>
    %271 = vector.shape_cast %270 : vector<1x1x64xf32> to vector<1x64xf32>
    %272 = vector.shape_cast %271 : vector<1x64xf32> to vector<1x1x64xf32>
    %273 = vector.broadcast %272 : vector<1x1x64xf32> to vector<4x4x64xf32>
    %274 = arith.mulf %269, %273 : vector<4x4x64xf32>
    %275 = arith.addf %268, %274 : vector<4x4x64xf32>
    %c1_198 = arith.constant 1 : index
    %c4_199 = arith.constant 4 : index
    %c0_200 = arith.constant 0 : index
    %276 = vector.load %arg29[%c1_198, %c4_199, %c0_200] : memref<8x8x64xf32, #tpu.memory_space<vmem>>, vector<4x4x64xf32>
    %c1_201 = arith.constant 1 : index
    %c4_202 = arith.constant 4 : index
    %c0_203 = arith.constant 0 : index
    %277 = vector.load %arg8[%c1_201, %c4_202, %c0_203] : memref<5x5x64xf32, #tpu.memory_space<vmem>>, vector<1x1x64xf32>
    %278 = vector.shape_cast %277 : vector<1x1x64xf32> to vector<1x64xf32>
    %279 = vector.shape_cast %278 : vector<1x64xf32> to vector<1x1x64xf32>
    %280 = vector.broadcast %279 : vector<1x1x64xf32> to vector<4x4x64xf32>
    %281 = arith.mulf %276, %280 : vector<4x4x64xf32>
    %282 = arith.addf %275, %281 : vector<4x4x64xf32>
    %c2_204 = arith.constant 2 : index
    %c0_205 = arith.constant 0 : index
    %c0_206 = arith.constant 0 : index
    %283 = vector.load %arg29[%c2_204, %c0_205, %c0_206] : memref<8x8x64xf32, #tpu.memory_space<vmem>>, vector<4x4x64xf32>
    %c2_207 = arith.constant 2 : index
    %c0_208 = arith.constant 0 : index
    %c0_209 = arith.constant 0 : index
    %284 = vector.load %arg8[%c2_207, %c0_208, %c0_209] : memref<5x5x64xf32, #tpu.memory_space<vmem>>, vector<1x1x64xf32>
    %285 = vector.shape_cast %284 : vector<1x1x64xf32> to vector<1x64xf32>
    %286 = vector.shape_cast %285 : vector<1x64xf32> to vector<1x1x64xf32>
    %287 = vector.broadcast %286 : vector<1x1x64xf32> to vector<4x4x64xf32>
    %288 = arith.mulf %283, %287 : vector<4x4x64xf32>
    %289 = arith.addf %282, %288 : vector<4x4x64xf32>
    %c2_210 = arith.constant 2 : index
    %c1_211 = arith.constant 1 : index
    %c0_212 = arith.constant 0 : index
    %290 = vector.load %arg29[%c2_210, %c1_211, %c0_212] : memref<8x8x64xf32, #tpu.memory_space<vmem>>, vector<4x4x64xf32>
    %c2_213 = arith.constant 2 : index
    %c1_214 = arith.constant 1 : index
    %c0_215 = arith.constant 0 : index
    %291 = vector.load %arg8[%c2_213, %c1_214, %c0_215] : memref<5x5x64xf32, #tpu.memory_space<vmem>>, vector<1x1x64xf32>
    %292 = vector.shape_cast %291 : vector<1x1x64xf32> to vector<1x64xf32>
    %293 = vector.shape_cast %292 : vector<1x64xf32> to vector<1x1x64xf32>
    %294 = vector.broadcast %293 : vector<1x1x64xf32> to vector<4x4x64xf32>
    %295 = arith.mulf %290, %294 : vector<4x4x64xf32>
    %296 = arith.addf %289, %295 : vector<4x4x64xf32>
    %c2_216 = arith.constant 2 : index
    %c2_217 = arith.constant 2 : index
    %c0_218 = arith.constant 0 : index
    %297 = vector.load %arg29[%c2_216, %c2_217, %c0_218] : memref<8x8x64xf32, #tpu.memory_space<vmem>>, vector<4x4x64xf32>
    %c2_219 = arith.constant 2 : index
    %c2_220 = arith.constant 2 : index
    %c0_221 = arith.constant 0 : index
    %298 = vector.load %arg8[%c2_219, %c2_220, %c0_221] : memref<5x5x64xf32, #tpu.memory_space<vmem>>, vector<1x1x64xf32>
    %299 = vector.shape_cast %298 : vector<1x1x64xf32> to vector<1x64xf32>
    %300 = vector.shape_cast %299 : vector<1x64xf32> to vector<1x1x64xf32>
    %301 = vector.broadcast %300 : vector<1x1x64xf32> to vector<4x4x64xf32>
    %302 = arith.mulf %297, %301 : vector<4x4x64xf32>
    %303 = arith.addf %296, %302 : vector<4x4x64xf32>
    %c2_222 = arith.constant 2 : index
    %c3_223 = arith.constant 3 : index
    %c0_224 = arith.constant 0 : index
    %304 = vector.load %arg29[%c2_222, %c3_223, %c0_224] : memref<8x8x64xf32, #tpu.memory_space<vmem>>, vector<4x4x64xf32>
    %c2_225 = arith.constant 2 : index
    %c3_226 = arith.constant 3 : index
    %c0_227 = arith.constant 0 : index
    %305 = vector.load %arg8[%c2_225, %c3_226, %c0_227] : memref<5x5x64xf32, #tpu.memory_space<vmem>>, vector<1x1x64xf32>
    %306 = vector.shape_cast %305 : vector<1x1x64xf32> to vector<1x64xf32>
    %307 = vector.shape_cast %306 : vector<1x64xf32> to vector<1x1x64xf32>
    %308 = vector.broadcast %307 : vector<1x1x64xf32> to vector<4x4x64xf32>
    %309 = arith.mulf %304, %308 : vector<4x4x64xf32>
    %310 = arith.addf %303, %309 : vector<4x4x64xf32>
    %c2_228 = arith.constant 2 : index
    %c4_229 = arith.constant 4 : index
    %c0_230 = arith.constant 0 : index
    %311 = vector.load %arg29[%c2_228, %c4_229, %c0_230] : memref<8x8x64xf32, #tpu.memory_space<vmem>>, vector<4x4x64xf32>
    %c2_231 = arith.constant 2 : index
    %c4_232 = arith.constant 4 : index
    %c0_233 = arith.constant 0 : index
    %312 = vector.load %arg8[%c2_231, %c4_232, %c0_233] : memref<5x5x64xf32, #tpu.memory_space<vmem>>, vector<1x1x64xf32>
    %313 = vector.shape_cast %312 : vector<1x1x64xf32> to vector<1x64xf32>
    %314 = vector.shape_cast %313 : vector<1x64xf32> to vector<1x1x64xf32>
    %315 = vector.broadcast %314 : vector<1x1x64xf32> to vector<4x4x64xf32>
    %316 = arith.mulf %311, %315 : vector<4x4x64xf32>
    %317 = arith.addf %310, %316 : vector<4x4x64xf32>
    %c3_234 = arith.constant 3 : index
    %c0_235 = arith.constant 0 : index
    %c0_236 = arith.constant 0 : index
    %318 = vector.load %arg29[%c3_234, %c0_235, %c0_236] : memref<8x8x64xf32, #tpu.memory_space<vmem>>, vector<4x4x64xf32>
    %c3_237 = arith.constant 3 : index
    %c0_238 = arith.constant 0 : index
    %c0_239 = arith.constant 0 : index
    %319 = vector.load %arg8[%c3_237, %c0_238, %c0_239] : memref<5x5x64xf32, #tpu.memory_space<vmem>>, vector<1x1x64xf32>
    %320 = vector.shape_cast %319 : vector<1x1x64xf32> to vector<1x64xf32>
    %321 = vector.shape_cast %320 : vector<1x64xf32> to vector<1x1x64xf32>
    %322 = vector.broadcast %321 : vector<1x1x64xf32> to vector<4x4x64xf32>
    %323 = arith.mulf %318, %322 : vector<4x4x64xf32>
    %324 = arith.addf %317, %323 : vector<4x4x64xf32>
    %c3_240 = arith.constant 3 : index
    %c1_241 = arith.constant 1 : index
    %c0_242 = arith.constant 0 : index
    %325 = vector.load %arg29[%c3_240, %c1_241, %c0_242] : memref<8x8x64xf32, #tpu.memory_space<vmem>>, vector<4x4x64xf32>
    %c3_243 = arith.constant 3 : index
    %c1_244 = arith.constant 1 : index
    %c0_245 = arith.constant 0 : index
    %326 = vector.load %arg8[%c3_243, %c1_244, %c0_245] : memref<5x5x64xf32, #tpu.memory_space<vmem>>, vector<1x1x64xf32>
    %327 = vector.shape_cast %326 : vector<1x1x64xf32> to vector<1x64xf32>
    %328 = vector.shape_cast %327 : vector<1x64xf32> to vector<1x1x64xf32>
    %329 = vector.broadcast %328 : vector<1x1x64xf32> to vector<4x4x64xf32>
    %330 = arith.mulf %325, %329 : vector<4x4x64xf32>
    %331 = arith.addf %324, %330 : vector<4x4x64xf32>
    %c3_246 = arith.constant 3 : index
    %c2_247 = arith.constant 2 : index
    %c0_248 = arith.constant 0 : index
    %332 = vector.load %arg29[%c3_246, %c2_247, %c0_248] : memref<8x8x64xf32, #tpu.memory_space<vmem>>, vector<4x4x64xf32>
    %c3_249 = arith.constant 3 : index
    %c2_250 = arith.constant 2 : index
    %c0_251 = arith.constant 0 : index
    %333 = vector.load %arg8[%c3_249, %c2_250, %c0_251] : memref<5x5x64xf32, #tpu.memory_space<vmem>>, vector<1x1x64xf32>
    %334 = vector.shape_cast %333 : vector<1x1x64xf32> to vector<1x64xf32>
    %335 = vector.shape_cast %334 : vector<1x64xf32> to vector<1x1x64xf32>
    %336 = vector.broadcast %335 : vector<1x1x64xf32> to vector<4x4x64xf32>
    %337 = arith.mulf %332, %336 : vector<4x4x64xf32>
    %338 = arith.addf %331, %337 : vector<4x4x64xf32>
    %c3_252 = arith.constant 3 : index
    %c3_253 = arith.constant 3 : index
    %c0_254 = arith.constant 0 : index
    %339 = vector.load %arg29[%c3_252, %c3_253, %c0_254] : memref<8x8x64xf32, #tpu.memory_space<vmem>>, vector<4x4x64xf32>
    %c3_255 = arith.constant 3 : index
    %c3_256 = arith.constant 3 : index
    %c0_257 = arith.constant 0 : index
    %340 = vector.load %arg8[%c3_255, %c3_256, %c0_257] : memref<5x5x64xf32, #tpu.memory_space<vmem>>, vector<1x1x64xf32>
    %341 = vector.shape_cast %340 : vector<1x1x64xf32> to vector<1x64xf32>
    %342 = vector.shape_cast %341 : vector<1x64xf32> to vector<1x1x64xf32>
    %343 = vector.broadcast %342 : vector<1x1x64xf32> to vector<4x4x64xf32>
    %344 = arith.mulf %339, %343 : vector<4x4x64xf32>
    %345 = arith.addf %338, %344 : vector<4x4x64xf32>
    %c3_258 = arith.constant 3 : index
    %c4_259 = arith.constant 4 : index
    %c0_260 = arith.constant 0 : index
    %346 = vector.load %arg29[%c3_258, %c4_259, %c0_260] : memref<8x8x64xf32, #tpu.memory_space<vmem>>, vector<4x4x64xf32>
    %c3_261 = arith.constant 3 : index
    %c4_262 = arith.constant 4 : index
    %c0_263 = arith.constant 0 : index
    %347 = vector.load %arg8[%c3_261, %c4_262, %c0_263] : memref<5x5x64xf32, #tpu.memory_space<vmem>>, vector<1x1x64xf32>
    %348 = vector.shape_cast %347 : vector<1x1x64xf32> to vector<1x64xf32>
    %349 = vector.shape_cast %348 : vector<1x64xf32> to vector<1x1x64xf32>
    %350 = vector.broadcast %349 : vector<1x1x64xf32> to vector<4x4x64xf32>
    %351 = arith.mulf %346, %350 : vector<4x4x64xf32>
    %352 = arith.addf %345, %351 : vector<4x4x64xf32>
    %c4_264 = arith.constant 4 : index
    %c0_265 = arith.constant 0 : index
    %c0_266 = arith.constant 0 : index
    %353 = vector.load %arg29[%c4_264, %c0_265, %c0_266] : memref<8x8x64xf32, #tpu.memory_space<vmem>>, vector<4x4x64xf32>
    %c4_267 = arith.constant 4 : index
    %c0_268 = arith.constant 0 : index
    %c0_269 = arith.constant 0 : index
    %354 = vector.load %arg8[%c4_267, %c0_268, %c0_269] : memref<5x5x64xf32, #tpu.memory_space<vmem>>, vector<1x1x64xf32>
    %355 = vector.shape_cast %354 : vector<1x1x64xf32> to vector<1x64xf32>
    %356 = vector.shape_cast %355 : vector<1x64xf32> to vector<1x1x64xf32>
    %357 = vector.broadcast %356 : vector<1x1x64xf32> to vector<4x4x64xf32>
    %358 = arith.mulf %353, %357 : vector<4x4x64xf32>
    %359 = arith.addf %352, %358 : vector<4x4x64xf32>
    %c4_270 = arith.constant 4 : index
    %c1_271 = arith.constant 1 : index
    %c0_272 = arith.constant 0 : index
    %360 = vector.load %arg29[%c4_270, %c1_271, %c0_272] : memref<8x8x64xf32, #tpu.memory_space<vmem>>, vector<4x4x64xf32>
    %c4_273 = arith.constant 4 : index
    %c1_274 = arith.constant 1 : index
    %c0_275 = arith.constant 0 : index
    %361 = vector.load %arg8[%c4_273, %c1_274, %c0_275] : memref<5x5x64xf32, #tpu.memory_space<vmem>>, vector<1x1x64xf32>
    %362 = vector.shape_cast %361 : vector<1x1x64xf32> to vector<1x64xf32>
    %363 = vector.shape_cast %362 : vector<1x64xf32> to vector<1x1x64xf32>
    %364 = vector.broadcast %363 : vector<1x1x64xf32> to vector<4x4x64xf32>
    %365 = arith.mulf %360, %364 : vector<4x4x64xf32>
    %366 = arith.addf %359, %365 : vector<4x4x64xf32>
    %c4_276 = arith.constant 4 : index
    %c2_277 = arith.constant 2 : index
    %c0_278 = arith.constant 0 : index
    %367 = vector.load %arg29[%c4_276, %c2_277, %c0_278] : memref<8x8x64xf32, #tpu.memory_space<vmem>>, vector<4x4x64xf32>
    %c4_279 = arith.constant 4 : index
    %c2_280 = arith.constant 2 : index
    %c0_281 = arith.constant 0 : index
    %368 = vector.load %arg8[%c4_279, %c2_280, %c0_281] : memref<5x5x64xf32, #tpu.memory_space<vmem>>, vector<1x1x64xf32>
    %369 = vector.shape_cast %368 : vector<1x1x64xf32> to vector<1x64xf32>
    %370 = vector.shape_cast %369 : vector<1x64xf32> to vector<1x1x64xf32>
    %371 = vector.broadcast %370 : vector<1x1x64xf32> to vector<4x4x64xf32>
    %372 = arith.mulf %367, %371 : vector<4x4x64xf32>
    %373 = arith.addf %366, %372 : vector<4x4x64xf32>
    %c4_282 = arith.constant 4 : index
    %c3_283 = arith.constant 3 : index
    %c0_284 = arith.constant 0 : index
    %374 = vector.load %arg29[%c4_282, %c3_283, %c0_284] : memref<8x8x64xf32, #tpu.memory_space<vmem>>, vector<4x4x64xf32>
    %c4_285 = arith.constant 4 : index
    %c3_286 = arith.constant 3 : index
    %c0_287 = arith.constant 0 : index
    %375 = vector.load %arg8[%c4_285, %c3_286, %c0_287] : memref<5x5x64xf32, #tpu.memory_space<vmem>>, vector<1x1x64xf32>
    %376 = vector.shape_cast %375 : vector<1x1x64xf32> to vector<1x64xf32>
    %377 = vector.shape_cast %376 : vector<1x64xf32> to vector<1x1x64xf32>
    %378 = vector.broadcast %377 : vector<1x1x64xf32> to vector<4x4x64xf32>
    %379 = arith.mulf %374, %378 : vector<4x4x64xf32>
    %380 = arith.addf %373, %379 : vector<4x4x64xf32>
    %c4_288 = arith.constant 4 : index
    %c4_289 = arith.constant 4 : index
    %c0_290 = arith.constant 0 : index
    %381 = vector.load %arg29[%c4_288, %c4_289, %c0_290] : memref<8x8x64xf32, #tpu.memory_space<vmem>>, vector<4x4x64xf32>
    %c4_291 = arith.constant 4 : index
    %c4_292 = arith.constant 4 : index
    %c0_293 = arith.constant 0 : index
    %382 = vector.load %arg8[%c4_291, %c4_292, %c0_293] : memref<5x5x64xf32, #tpu.memory_space<vmem>>, vector<1x1x64xf32>
    %383 = vector.shape_cast %382 : vector<1x1x64xf32> to vector<1x64xf32>
    %384 = vector.shape_cast %383 : vector<1x64xf32> to vector<1x1x64xf32>
    %385 = vector.broadcast %384 : vector<1x1x64xf32> to vector<4x4x64xf32>
    %386 = arith.mulf %381, %385 : vector<4x4x64xf32>
    %387 = arith.addf %380, %386 : vector<4x4x64xf32>
    %c0_294 = arith.constant 0 : index
    %c0_295 = arith.constant 0 : index
    %388 = vector.load %arg9[%c0_294, %c0_295] : memref<1x64xf32, #tpu.memory_space<vmem>>, vector<1x64xf32>
    %389 = vector.shape_cast %388 : vector<1x64xf32> to vector<1x1x64xf32>
    %390 = vector.broadcast %389 : vector<1x1x64xf32> to vector<4x4x64xf32>
    %391 = arith.addf %387, %390 : vector<4x4x64xf32>
    %cst_296 = arith.constant 0.000000e+00 : f32
    %392 = vector.broadcast %cst_296 : f32 to vector<4x4x64xf32>
    %393 = arith.maximumf %391, %392 : vector<4x4x64xf32>
    %394 = vector.extract_strided_slice %393 {offsets = [0, 0, 0], sizes = [1, 4, 64], strides = [1, 1, 1]} : vector<4x4x64xf32> to vector<1x4x64xf32>
    %395 = vector.shape_cast %394 : vector<1x4x64xf32> to vector<4x64xf32>
    %c0_297 = arith.constant 0 : index
    %c0_298 = arith.constant 0 : index
    %396 = vector.load %arg30[%c0_297, %c0_298] : memref<16x64xf32, #tpu.memory_space<vmem>>, vector<4x64xf32>
    tpu.vector_store %arg30[%c0_297, %c0_298], %395 {strides = array<i32>} : memref<16x64xf32, #tpu.memory_space<vmem>>, vector<4x64xf32>,
    %397 = vector.extract_strided_slice %393 {offsets = [1, 0, 0], sizes = [1, 4, 64], strides = [1, 1, 1]} : vector<4x4x64xf32> to vector<1x4x64xf32>
    %398 = vector.shape_cast %397 : vector<1x4x64xf32> to vector<4x64xf32>
    %c4_299 = arith.constant 4 : index
    %c0_300 = arith.constant 0 : index
    %399 = vector.load %arg30[%c4_299, %c0_300] : memref<16x64xf32, #tpu.memory_space<vmem>>, vector<4x64xf32>
    tpu.vector_store %arg30[%c4_299, %c0_300], %398 {strides = array<i32>} : memref<16x64xf32, #tpu.memory_space<vmem>>, vector<4x64xf32>,
    %400 = vector.extract_strided_slice %393 {offsets = [2, 0, 0], sizes = [1, 4, 64], strides = [1, 1, 1]} : vector<4x4x64xf32> to vector<1x4x64xf32>
    %401 = vector.shape_cast %400 : vector<1x4x64xf32> to vector<4x64xf32>
    %c8_301 = arith.constant 8 : index
    %c0_302 = arith.constant 0 : index
    %402 = vector.load %arg30[%c8_301, %c0_302] : memref<16x64xf32, #tpu.memory_space<vmem>>, vector<4x64xf32>
    tpu.vector_store %arg30[%c8_301, %c0_302], %401 {strides = array<i32>} : memref<16x64xf32, #tpu.memory_space<vmem>>, vector<4x64xf32>,
    %403 = vector.extract_strided_slice %393 {offsets = [3, 0, 0], sizes = [1, 4, 64], strides = [1, 1, 1]} : vector<4x4x64xf32> to vector<1x4x64xf32>
    %404 = vector.shape_cast %403 : vector<1x4x64xf32> to vector<4x64xf32>
    %c12 = arith.constant 12 : index
    %c0_303 = arith.constant 0 : index
    %405 = vector.load %arg30[%c12, %c0_303] : memref<16x64xf32, #tpu.memory_space<vmem>>, vector<4x64xf32>
    tpu.vector_store %arg30[%c12, %c0_303], %404 {strides = array<i32>} : memref<16x64xf32, #tpu.memory_space<vmem>>, vector<4x64xf32>,
    %c0_304 = arith.constant 0 : index
    %c0_305 = arith.constant 0 : index
    %406 = vector.load %arg30[%c0_304, %c0_305] : memref<16x64xf32, #tpu.memory_space<vmem>>, vector<16x64xf32>
    %407 = vector.extract_strided_slice %406 {offsets = [0, 0], sizes = [16, 32], strides = [1, 1]} : vector<16x64xf32> to vector<16x32xf32>
    %c0_306 = arith.constant 0 : index
    %c0_307 = arith.constant 0 : index
    %408 = vector.load %arg10[%c0_306, %c0_307] : memref<32x16xf32, #tpu.memory_space<vmem>>, vector<32x16xf32>
    %cst_308 = arith.constant dense<0.000000e+00> : vector<16x16xf32>
    %409 = tpu.matmul %407, %408, %cst_308 {dimension_numbers = #tpu.dot_dimension_numbers<[1], [0], [0], [1], [0, 0, 1, 1], [], []>} : vector<16x32xf32>, vector<32x16xf32>, vector<16x16xf32> -> vector<16x16xf32>
    %c0_309 = arith.constant 0 : index
    %c0_310 = arith.constant 0 : index
    %410 = vector.load %arg11[%c0_309, %c0_310] : memref<1x16xf32, #tpu.memory_space<vmem>>, vector<1x16xf32>
    %411 = vector.broadcast %410 : vector<1x16xf32> to vector<16x16xf32>
    %412 = arith.addf %409, %411 : vector<16x16xf32>
    %413 = vector.extract_strided_slice %406 {offsets = [0, 32], sizes = [16, 32], strides = [1, 1]} : vector<16x64xf32> to vector<16x32xf32>
    %c0_311 = arith.constant 0 : index
    %c0_312 = arith.constant 0 : index
    %414 = vector.load %arg12[%c0_311, %c0_312] : memref<32x16xf32, #tpu.memory_space<vmem>>, vector<32x16xf32>
    %cst_313 = arith.constant dense<0.000000e+00> : vector<16x16xf32>
    %415 = tpu.matmul %413, %414, %cst_313 {dimension_numbers = #tpu.dot_dimension_numbers<[1], [0], [0], [1], [0, 0, 1, 1], [], []>} : vector<16x32xf32>, vector<32x16xf32>, vector<16x16xf32> -> vector<16x16xf32>
    %c0_314 = arith.constant 0 : index
    %c0_315 = arith.constant 0 : index
    %416 = vector.load %arg13[%c0_314, %c0_315] : memref<1x16xf32, #tpu.memory_space<vmem>>, vector<1x16xf32>
    %417 = vector.broadcast %416 : vector<1x16xf32> to vector<16x16xf32>
    %418 = arith.addf %415, %417 : vector<16x16xf32>
    %cst_316 = arith.constant dense<0.000000e+00> : vector<16xf32>
    %419 = vector.multi_reduction <add>, %412, %cst_316 [0] : vector<16x16xf32> to vector<16xf32>
    %420 = vector.shape_cast %419 : vector<16xf32> to vector<1x16xf32>
    %cst_317 = arith.constant 1.600000e+01 : f32
    %421 = vector.broadcast %cst_317 : f32 to vector<1x16xf32>
    %422 = arith.divf %420, %421 : vector<1x16xf32>
    %cst_318 = arith.constant dense<0.000000e+00> : vector<16xf32>
    %423 = vector.multi_reduction <add>, %418, %cst_318 [0] : vector<16x16xf32> to vector<16xf32>
    %424 = vector.shape_cast %423 : vector<16xf32> to vector<1x16xf32>
    %cst_319 = arith.constant 1.600000e+01 : f32
    %425 = vector.broadcast %cst_319 : f32 to vector<1x16xf32>
    %426 = arith.divf %424, %425 : vector<1x16xf32>
    %427 = vector.shape_cast %422 : vector<1x16xf32> to vector<1x1x16xf32>
    %cst_320 = arith.constant dense<0.000000e+00> : vector<1xf32>
    %428 = vector.multi_reduction <add>, %427, %cst_320 [1, 2] : vector<1x1x16xf32> to vector<1xf32>
    %429 = vector.shape_cast %428 : vector<1xf32> to vector<1x1x1xf32>
    %430 = vector.extract %429[0, 0, 0] : f32 from vector<1x1x1xf32>
    %431 = vector.shape_cast %426 : vector<1x16xf32> to vector<1x1x16xf32>
    %cst_321 = arith.constant dense<0.000000e+00> : vector<1xf32>
    %432 = vector.multi_reduction <add>, %431, %cst_321 [1, 2] : vector<1x1x16xf32> to vector<1xf32>
    %433 = vector.shape_cast %432 : vector<1xf32> to vector<1x1x1xf32>
    %434 = vector.extract %433[0, 0, 0] : f32 from vector<1x1x1xf32>
    %435 = arith.addf %430, %434 : f32
    %cst_322 = arith.constant 3.200000e+01 : f32
    %436 = arith.divf %435, %cst_322 : f32
    %437 = vector.broadcast %436 : f32 to vector<1x16xf32>
    %438 = arith.subf %422, %437 : vector<1x16xf32>
    %439 = arith.mulf %438, %438 : vector<1x16xf32>
    %440 = vector.shape_cast %439 : vector<1x16xf32> to vector<1x1x16xf32>
    %cst_323 = arith.constant dense<0.000000e+00> : vector<1xf32>
    %441 = vector.multi_reduction <add>, %440, %cst_323 [1, 2] : vector<1x1x16xf32> to vector<1xf32>
    %442 = vector.shape_cast %441 : vector<1xf32> to vector<1x1x1xf32>
    %443 = vector.extract %442[0, 0, 0] : f32 from vector<1x1x1xf32>
    %444 = vector.broadcast %436 : f32 to vector<1x16xf32>
    %445 = arith.subf %426, %444 : vector<1x16xf32>
    %446 = arith.mulf %445, %445 : vector<1x16xf32>
    %447 = vector.shape_cast %446 : vector<1x16xf32> to vector<1x1x16xf32>
    %cst_324 = arith.constant dense<0.000000e+00> : vector<1xf32>
    %448 = vector.multi_reduction <add>, %447, %cst_324 [1, 2] : vector<1x1x16xf32> to vector<1xf32>
    %449 = vector.shape_cast %448 : vector<1xf32> to vector<1x1x1xf32>
    %450 = vector.extract %449[0, 0, 0] : f32 from vector<1x1x1xf32>
    %451 = arith.addf %443, %450 : f32
    %cst_325 = arith.constant 3.200000e+01 : f32
    %452 = arith.divf %451, %cst_325 : f32
    %cst_326 = arith.constant 9.99999974E-6 : f32
    %453 = arith.addf %452, %cst_326 : f32
    %454 = math.rsqrt %453 : f32
    %455 = vector.broadcast %436 : f32 to vector<1x16xf32>
    %456 = arith.subf %422, %455 : vector<1x16xf32>
    %457 = vector.broadcast %454 : f32 to vector<1x16xf32>
    %458 = arith.mulf %456, %457 : vector<1x16xf32>
    %c0_327 = arith.constant 0 : index
    %c0_328 = arith.constant 0 : index
    %459 = vector.load %arg14[%c0_327, %c0_328] : memref<1x16xf32, #tpu.memory_space<vmem>>, vector<1x16xf32>
    %460 = arith.mulf %458, %459 : vector<1x16xf32>
    %c0_329 = arith.constant 0 : index
    %c0_330 = arith.constant 0 : index
    %461 = vector.load %arg15[%c0_329, %c0_330] : memref<1x16xf32, #tpu.memory_space<vmem>>, vector<1x16xf32>
    %462 = arith.addf %460, %461 : vector<1x16xf32>
    %463 = vector.broadcast %436 : f32 to vector<1x16xf32>
    %464 = arith.subf %426, %463 : vector<1x16xf32>
    %465 = vector.broadcast %454 : f32 to vector<1x16xf32>
    %466 = arith.mulf %464, %465 : vector<1x16xf32>
    %c0_331 = arith.constant 0 : index
    %c0_332 = arith.constant 0 : index
    %467 = vector.load %arg16[%c0_331, %c0_332] : memref<1x16xf32, #tpu.memory_space<vmem>>, vector<1x16xf32>
    %468 = arith.mulf %466, %467 : vector<1x16xf32>
    %c0_333 = arith.constant 0 : index
    %c0_334 = arith.constant 0 : index
    %469 = vector.load %arg17[%c0_333, %c0_334] : memref<1x16xf32, #tpu.memory_space<vmem>>, vector<1x16xf32>
    %470 = arith.addf %468, %469 : vector<1x16xf32>
    %c0_335 = arith.constant 0 : index
    %c0_336 = arith.constant 0 : index
    %471 = vector.load %arg18[%c0_335, %c0_336] : memref<16x32xf32, #tpu.memory_space<vmem>>, vector<16x32xf32>
    %cst_337 = arith.constant dense<0.000000e+00> : vector<1x32xf32>
    %472 = tpu.matmul %462, %471, %cst_337 {dimension_numbers = #tpu.dot_dimension_numbers<[1], [0], [0], [1], [0, 0, 1, 1], [], []>} : vector<1x16xf32>, vector<16x32xf32>, vector<1x32xf32> -> vector<1x32xf32>
    %c0_338 = arith.constant 0 : index
    %c0_339 = arith.constant 0 : index
    %473 = vector.load %arg19[%c0_338, %c0_339] : memref<16x32xf32, #tpu.memory_space<vmem>>, vector<16x32xf32>
    %cst_340 = arith.constant dense<0.000000e+00> : vector<1x32xf32>
    %474 = tpu.matmul %470, %473, %cst_340 {dimension_numbers = #tpu.dot_dimension_numbers<[1], [0], [0], [1], [0, 0, 1, 1], [], []>} : vector<1x16xf32>, vector<16x32xf32>, vector<1x32xf32> -> vector<1x32xf32>
    %475 = arith.addf %472, %474 : vector<1x32xf32>
    %c0_341 = arith.constant 0 : index
    %c0_342 = arith.constant 0 : index
    %476 = vector.load %arg20[%c0_341, %c0_342] : memref<1x32xf32, #tpu.memory_space<vmem>>, vector<1x32xf32>
    %477 = arith.addf %475, %476 : vector<1x32xf32>
    %c0_343 = arith.constant 0 : index
    %c0_344 = arith.constant 0 : index
    %478 = vector.load %arg21[%c0_343, %c0_344] : memref<32x32xf32, #tpu.memory_space<vmem>>, vector<32x32xf32>
    %cst_345 = arith.constant dense<0.000000e+00> : vector<1x32xf32>
    %479 = tpu.matmul %477, %478, %cst_345 {dimension_numbers = #tpu.dot_dimension_numbers<[1], [0], [0], [1], [0, 0, 1, 1], [], []>} : vector<1x32xf32>, vector<32x32xf32>, vector<1x32xf32> -> vector<1x32xf32>
    %c0_346 = arith.constant 0 : index
    %c0_347 = arith.constant 0 : index
    %480 = vector.load %arg22[%c0_346, %c0_347] : memref<1x32xf32, #tpu.memory_space<vmem>>, vector<1x32xf32>
    %481 = arith.addf %479, %480 : vector<1x32xf32>
    %c0_348 = arith.constant 0 : index
    %c0_349 = arith.constant 0 : index
    %482 = vector.load %arg23[%c0_348, %c0_349] : memref<32x16xf32, #tpu.memory_space<vmem>>, vector<32x16xf32>
    %cst_350 = arith.constant dense<0.000000e+00> : vector<1x16xf32>
    %483 = tpu.matmul %481, %482, %cst_350 {dimension_numbers = #tpu.dot_dimension_numbers<[1], [0], [0], [1], [0, 0, 1, 1], [], []>} : vector<1x32xf32>, vector<32x16xf32>, vector<1x16xf32> -> vector<1x16xf32>
    %c0_351 = arith.constant 0 : index
    %c0_352 = arith.constant 0 : index
    %484 = vector.load %arg24[%c0_351, %c0_352] : memref<1x16xf32, #tpu.memory_space<vmem>>, vector<1x16xf32>
    %485 = arith.addf %483, %484 : vector<1x16xf32>
    %486 = arith.negf %485 : vector<1x16xf32>
    %487 = math.exp %486 : vector<1x16xf32>
    %cst_353 = arith.constant 1.000000e+00 : f32
    %488 = vector.broadcast %cst_353 : f32 to vector<1x16xf32>
    %489 = arith.addf %488, %487 : vector<1x16xf32>
    %490 = arith.divf %488, %489 : vector<1x16xf32>
    %c0_354 = arith.constant 0 : index
    %c0_355 = arith.constant 0 : index
    %491 = vector.load %arg25[%c0_354, %c0_355] : memref<32x16xf32, #tpu.memory_space<vmem>>, vector<32x16xf32>
    %cst_356 = arith.constant dense<0.000000e+00> : vector<1x16xf32>
    %492 = tpu.matmul %481, %491, %cst_356 {dimension_numbers = #tpu.dot_dimension_numbers<[1], [0], [0], [1], [0, 0, 1, 1], [], []>} : vector<1x32xf32>, vector<32x16xf32>, vector<1x16xf32> -> vector<1x16xf32>
    %c0_357 = arith.constant 0 : index
    %c0_358 = arith.constant 0 : index
    %493 = vector.load %arg26[%c0_357, %c0_358] : memref<1x16xf32, #tpu.memory_space<vmem>>, vector<1x16xf32>
    %494 = arith.addf %492, %493 : vector<1x16xf32>
    %495 = arith.negf %494 : vector<1x16xf32>
    %496 = math.exp %495 : vector<1x16xf32>
    %cst_359 = arith.constant 1.000000e+00 : f32
    %497 = vector.broadcast %cst_359 : f32 to vector<1x16xf32>
    %498 = arith.addf %497, %496 : vector<1x16xf32>
    %499 = arith.divf %497, %498 : vector<1x16xf32>
    %500 = vector.broadcast %490 : vector<1x16xf32> to vector<16x16xf32>
    %501 = arith.mulf %412, %500 : vector<16x16xf32>
    %502 = vector.broadcast %499 : vector<1x16xf32> to vector<16x16xf32>
    %503 = arith.mulf %418, %502 : vector<16x16xf32>
    %504 = arith.addf %501, %503 : vector<16x16xf32>
    %c0_360 = arith.constant 0 : index
    %c0_361 = arith.constant 0 : index
    %c0_362 = arith.constant 0 : index
    %505 = vector.load %arg27[%c0_360, %c0_361, %c0_362] : memref<1x16x16xf32, #tpu.memory_space<vmem>>, vector<1x16x16xf32>
    %506 = vector.shape_cast %505 : vector<1x16x16xf32> to vector<16x16xf32>
    %507 = arith.addf %504, %506 : vector<16x16xf32>
    %c0_363 = arith.constant 0 : index
    %c0_364 = arith.constant 0 : index
    %c0_365 = arith.constant 0 : index
    %508 = vector.load %arg28[%c0_363, %c0_364, %c0_365] : memref<1x16x16xf32, #tpu.memory_space<vmem>>, vector<1x16x16xf32>
    %509 = vector.shape_cast %508 : vector<1x16x16xf32> to vector<16x16xf32>
    %510 = vector.shape_cast %507 : vector<16x16xf32> to vector<1x16x16xf32>
    tpu.vector_store %arg28[%c0_363, %c0_364, %c0_365], %510 {strides = array<i32>} : memref<1x16x16xf32, #tpu.memory_space<vmem>>, vector<1x16x16xf32>,
    return
  }
  func.func @transform_0(%arg0: i32) -> (i32, i32, i32, i32) {
    %c0_i32 = arith.constant 0 : i32
    %c0_i32_0 = arith.constant 0 : i32
    %c0_i32_1 = arith.constant 0 : i32
    %c0_i32_2 = arith.constant 0 : i32
    return %arg0, %c0_i32, %c0_i32_0, %c0_i32_1 : i32, i32, i32, i32
  }
  func.func @transform_1(%arg0: i32) -> (i32, i32, i32) {
    %c0_i32 = arith.constant 0 : i32
    %c0_i32_0 = arith.constant 0 : i32
    %c0_i32_1 = arith.constant 0 : i32
    %c0_i32_2 = arith.constant 0 : i32
    return %c0_i32, %c0_i32_0, %c0_i32_1 : i32, i32, i32
  }
  func.func @transform_2(%arg0: i32) -> (i32, i32) {
    %c0_i32 = arith.constant 0 : i32
    %c0_i32_0 = arith.constant 0 : i32
    %c0_i32_1 = arith.constant 0 : i32
    return %c0_i32, %c0_i32_0 : i32, i32
  }
  func.func @transform_3(%arg0: i32) -> (i32, i32) {
    %c0_i32 = arith.constant 0 : i32
    %c0_i32_0 = arith.constant 0 : i32
    %c0_i32_1 = arith.constant 0 : i32
    return %c0_i32, %c0_i32_0 : i32, i32
  }
  func.func @transform_4(%arg0: i32) -> (i32, i32) {
    %c0_i32 = arith.constant 0 : i32
    %c0_i32_0 = arith.constant 0 : i32
    %c0_i32_1 = arith.constant 0 : i32
    return %c0_i32, %c0_i32_0 : i32, i32
  }
  func.func @transform_5(%arg0: i32) -> (i32, i32) {
    %c0_i32 = arith.constant 0 : i32
    %c0_i32_0 = arith.constant 0 : i32
    %c0_i32_1 = arith.constant 0 : i32
    return %c0_i32, %c0_i32_0 : i32, i32
  }
  func.func @transform_6(%arg0: i32) -> (i32, i32) {
    %c0_i32 = arith.constant 0 : i32
    %c0_i32_0 = arith.constant 0 : i32
    %c0_i32_1 = arith.constant 0 : i32
    return %c0_i32, %c0_i32_0 : i32, i32
  }
  func.func @transform_7(%arg0: i32) -> (i32, i32, i32) {
    %c0_i32 = arith.constant 0 : i32
    %c0_i32_0 = arith.constant 0 : i32
    %c0_i32_1 = arith.constant 0 : i32
    %c0_i32_2 = arith.constant 0 : i32
    return %c0_i32, %c0_i32_0, %c0_i32_1 : i32, i32, i32
  }
  func.func @transform_8(%arg0: i32) -> (i32, i32) {
    %c0_i32 = arith.constant 0 : i32
    %c0_i32_0 = arith.constant 0 : i32
    %c0_i32_1 = arith.constant 0 : i32
    return %c0_i32, %c0_i32_0 : i32, i32
  }
  func.func @transform_9(%arg0: i32) -> (i32, i32) {
    %c0_i32 = arith.constant 0 : i32
    %c0_i32_0 = arith.constant 0 : i32
    %c0_i32_1 = arith.constant 0 : i32
    return %c0_i32, %c0_i32_0 : i32, i32
  }
  func.func @transform_10(%arg0: i32) -> (i32, i32) {
    %c0_i32 = arith.constant 0 : i32
    %c0_i32_0 = arith.constant 0 : i32
    %c0_i32_1 = arith.constant 0 : i32
    return %c0_i32, %c0_i32_0 : i32, i32
  }
  func.func @transform_11(%arg0: i32) -> (i32, i32) {
    %c0_i32 = arith.constant 0 : i32
    %c0_i32_0 = arith.constant 0 : i32
    %c0_i32_1 = arith.constant 0 : i32
    return %c0_i32, %c0_i32_0 : i32, i32
  }
  func.func @transform_12(%arg0: i32) -> (i32, i32) {
    %c0_i32 = arith.constant 0 : i32
    %c0_i32_0 = arith.constant 0 : i32
    %c0_i32_1 = arith.constant 0 : i32
    return %c0_i32, %c0_i32_0 : i32, i32
  }
  func.func @transform_13(%arg0: i32) -> (i32, i32) {
    %c0_i32 = arith.constant 0 : i32
    %c0_i32_0 = arith.constant 0 : i32
    %c0_i32_1 = arith.constant 0 : i32
    return %c0_i32, %c0_i32_0 : i32, i32
  }
  func.func @transform_14(%arg0: i32) -> (i32, i32) {
    %c0_i32 = arith.constant 0 : i32
    %c0_i32_0 = arith.constant 0 : i32
    %c0_i32_1 = arith.constant 0 : i32
    return %c0_i32, %c0_i32_0 : i32, i32
  }
  func.func @transform_15(%arg0: i32) -> (i32, i32) {
    %c0_i32 = arith.constant 0 : i32
    %c0_i32_0 = arith.constant 0 : i32
    %c0_i32_1 = arith.constant 0 : i32
    return %c0_i32, %c0_i32_0 : i32, i32
  }
  func.func @transform_16(%arg0: i32) -> (i32, i32) {
    %c0_i32 = arith.constant 0 : i32
    %c0_i32_0 = arith.constant 0 : i32
    %c0_i32_1 = arith.constant 0 : i32
    return %c0_i32, %c0_i32_0 : i32, i32
  }
  func.func @transform_17(%arg0: i32) -> (i32, i32) {
    %c0_i32 = arith.constant 0 : i32
    %c0_i32_0 = arith.constant 0 : i32
    %c0_i32_1 = arith.constant 0 : i32
    return %c0_i32, %c0_i32_0 : i32, i32
  }
  func.func @transform_18(%arg0: i32) -> (i32, i32) {
    %c0_i32 = arith.constant 0 : i32
    %c0_i32_0 = arith.constant 0 : i32
    %c0_i32_1 = arith.constant 0 : i32
    return %c0_i32, %c0_i32_0 : i32, i32
  }
  func.func @transform_19(%arg0: i32) -> (i32, i32) {
    %c0_i32 = arith.constant 0 : i32
    %c0_i32_0 = arith.constant 0 : i32
    %c0_i32_1 = arith.constant 0 : i32
    return %c0_i32, %c0_i32_0 : i32, i32
  }
  func.func @transform_20(%arg0: i32) -> (i32, i32) {
    %c0_i32 = arith.constant 0 : i32
    %c0_i32_0 = arith.constant 0 : i32
    %c0_i32_1 = arith.constant 0 : i32
    return %c0_i32, %c0_i32_0 : i32, i32
  }
  func.func @transform_21(%arg0: i32) -> (i32, i32) {
    %c0_i32 = arith.constant 0 : i32
    %c0_i32_0 = arith.constant 0 : i32
    %c0_i32_1 = arith.constant 0 : i32
    return %c0_i32, %c0_i32_0 : i32, i32
  }
  func.func @transform_22(%arg0: i32) -> (i32, i32) {
    %c0_i32 = arith.constant 0 : i32
    %c0_i32_0 = arith.constant 0 : i32
    %c0_i32_1 = arith.constant 0 : i32
    return %c0_i32, %c0_i32_0 : i32, i32
  }
  func.func @transform_23(%arg0: i32) -> (i32, i32) {
    %c0_i32 = arith.constant 0 : i32
    %c0_i32_0 = arith.constant 0 : i32
    %c0_i32_1 = arith.constant 0 : i32
    return %c0_i32, %c0_i32_0 : i32, i32
  }
  func.func @transform_24(%arg0: i32) -> (i32, i32) {
    %c0_i32 = arith.constant 0 : i32
    %c0_i32_0 = arith.constant 0 : i32
    %c0_i32_1 = arith.constant 0 : i32
    return %c0_i32, %c0_i32_0 : i32, i32
  }
  func.func @transform_25(%arg0: i32) -> (i32, i32) {
    %c0_i32 = arith.constant 0 : i32
    %c0_i32_0 = arith.constant 0 : i32
    %c0_i32_1 = arith.constant 0 : i32
    return %c0_i32, %c0_i32_0 : i32, i32
  }
  func.func @transform_26(%arg0: i32) -> (i32, i32, i32) {
    %c0_i32 = arith.constant 0 : i32
    %c0_i32_0 = arith.constant 0 : i32
    %c0_i32_1 = arith.constant 0 : i32
    return %arg0, %c0_i32, %c0_i32_0 : i32, i32, i32
  }
  func.func @transform_27(%arg0: i32) -> (i32, i32, i32) {
    %c0_i32 = arith.constant 0 : i32
    %c0_i32_0 = arith.constant 0 : i32
    %c0_i32_1 = arith.constant 0 : i32
    return %arg0, %c0_i32, %c0_i32_0 : i32, i32, i32
  }
}

</mosaic_0001>

<bundles_post_ra>
// kernel: _lambda_.5
= control target key start
LH: loop header
LB: loop body
LE: loop exit
PB: predicated region body
PF: predicated region fallthrough
CT: control target
= control target key end

     0   :  { %s481_s12 = smov 0   ;;  %s483_s13 = smov 0   ;;  %s539_s0 = inlined_call_operand.vmem [shape: bf16[36,512], index: 0, kind: input, shape index: {}]   ;;  %s540_s1 = inlined_call_operand.vmem [shape: bf16[8,36], index: 1, kind: input, shape index: {}]   ;;  %s541_s2 = inlined_call_operand.vmem [shape: f32[8,1], index: 2, kind: input, shape index: {}]   ;;  %s542_s3 = inlined_call_operand.vmem [shape: f32[8,512], index: 3, kind: output, shape index: {}]  }
   0x1   :  { %s485_s14 = smov 0  }
   0x2 LB: > { %s380_s15 = sadd.s32 4294967295, %s458_s14   ;;  %s498_s16 = sadd.s32 1, %s458_s14   ;;  %s458_s14 = sphi %s485_s14, %s545_s14   ;;  %s454_s13 = sphi %s483_s13, %s544_s13   ;;  %s450_s12 = sphi %s481_s12, %s543_s12  }
   0x3   : > { %s17_s17 = ssub.s32 %s458_s14, %s498_s16  ;;  %s20_s18 = sadd.s32 1, %s454_s13 }
   0x4   : > { %p18_p0 = scmp.eq.s32.totalorder %s17_s17, 0  ;;  %p27_p1 = scmp.ne.s32.totalorder %s454_s13, %s450_s12 }
   0x5   : > { %p28_p2 = scmp.eq.s32.totalorder %s458_s14, 0  ;;  %p383_p4 = scmp.ge.s32.totalorder %s458_s14, 2 }
   0x6   : > { %s507_s19 = scalar_select %p18_p0, %s454_s13, %s20_s18  }
   0x7   : > { %p29_p3 = por %p28_p2, %p27_p1  ;;  %127 = sbr.rel (%p383_p4) target bundleno = 21 (0x15), region = 24 }
   0xe   : > { %130 = sbr.rel (!%p29_p3) target bundleno = 21 (0x15), region = 28  ;;  %s132_s20 = sand.u32 (%p29_p3), 1, %s454_s13  }
   0xf   : > { %s399_s21 = sshll.u32 (%p29_p3), %s458_s14, 3  ;;  %s400_s22 = smul.u32 (%p29_p3), 40, %s132_s20 }
  0x10   : > { %s137_s25 = scalar_lea.vmem (%p29_p3), %s539_s0, %s399_s21 }
  0x11   : > { %v173_v0 = vld [vmem:[%s137_s25] sm:$0xff] (%p29_p3)  ;;  %v175_v1 = vld [vmem:[%s137_s25 + $0x10] sm:$0xff] (%p29_p3)  ;;  %s134_s26 = scalar_lea.vmem (%p29_p3), [#allocation2], %s400_s22 }
  0x12   : > { %v177_v2 = vld [vmem:[%s137_s25 + $0x20] sm:$0xff] (%p29_p3)  ;;  %v179_v3 = vld [vmem:[%s137_s25 + $0x30] sm:$0xff] (%p29_p3)  ;;  %174 = vst [vmem:[%s134_s26] sm:$0xff] (%p29_p3), %v173_v0  ;;  %176 = vst [vmem:[%s134_s26 + $0x8] sm:$0xff] (%p29_p3), %v175_v1 }
  0x13   : > { %v181_v4 = vld [vmem:[%s137_s25 + $0x40] sm:$0xff] (%p29_p3)  ;;  %178 = vst [vmem:[%s134_s26 + $0x10] sm:$0xff] (%p29_p3), %v177_v2  ;;  %180 = vst [vmem:[%s134_s26 + $0x18] sm:$0xff] (%p29_p3), %v179_v3 }
  0x14   : > { %182 = vst [vmem:[%s134_s26 + $0x20] sm:$0xff] (%p29_p3), %v181_v4 }
  0x15 PF: > { %p386_p5 = scmp.ge.s32.totalorder %s458_s14, 1  ;;  %p187_p6 = scmp.lt.s32.totalorder %s458_s14, 3 }
  0x17   : > { %p188_p7 = pnand %p386_p5, %p187_p6 }
  0x18   : > { %s194_s27 = sand.u32 (!%p188_p7), 1, %s450_s12   ;;  %v460_v5 = vmov (!%p188_p7), 0   ;;  %v231_v6 = vld [vmem:[%s541_s2] sm:$0xff] (!%p188_p7)  ;;  %vm266_vm0 = vcmask (!%p188_p7), 1041408   ;;  %vm262_vm1 = vcmask (!%p188_p7), 293888   ;;  %s387_s7 = sshll.u32 (!%p188_p7), %s380_s15, 1 }
  0x19   : > { %191 = sbr.rel (%p188_p7) target bundleno = 260 (0x104), region = 66  ;;  %305 = vmatprep.mubr.bf16.mxu0 (!%p188_p7), %v460_v5  ;;  %427 = vset.pattern.permute.xlu0 (!%p188_p7), %v460_v5  ;;  %v230_v15 = vld [vmem:[%s540_s1] sm:$0xf] (!%p188_p7)  ;;  %p219_p8 = scmp.lt.s32.totalorder (!%p188_p7), %s387_s7, 3 }
  0x1a   : > { %s401_s28 = smul.u32 (!%p188_p7), 40, %s194_s27  ;;  %234 = vperm.xlu0 (!%p188_p7), %427, %v231_v6  }
  0x1c   : > { %s196_s4 = scalar_lea.vmem (!%p188_p7), [#allocation2], %s401_s28 }
  0x1d   : > { %v428_v7 = vld [vmem:[%s196_s4 + $0x4] ss:$8 sps:$4 sm:$0xff] (!%p188_p7)   ;;  %v430_v8 = vld [vmem:[%s196_s4] ss:$8 sps:$4 sm:$0xff] (!%p188_p7)   ;;  %v431_v9 = vld [vmem:[%s196_s4 + $0x14] ss:$8 sps:$4 sm:$0xff] (!%p188_p7)  }
  0x1e   : > { %273 = vmatprep.subr.bf16.mxu0 (!%p188_p7), %v428_v7  ;;  %v229_v10 = vld [vmem:[%s196_s4 + $0x20] sm:$0x33] (!%p188_p7)  ;;  %v433_v11 = vld [vmem:[%s196_s4 + $0x10] ss:$8 sps:$4 sm:$0xff] (!%p188_p7)  }
  0x1f   : > { %274 = vmatpush1.bf16.msra.mxu0 (!%p188_p7), %v430_v8  ;;  %v394_v12 = vcombine.high (!%p188_p7), %v229_v10, %v229_v10  ;;  %v393_v13 = vcombine.low (!%p188_p7), %v229_v10, %v229_v10 }
  0x20   : > { %275 = vmatprep.subr.bf16.mxu0 %v431_v9  ;;  %s547_s7 = smov (!%p219_p8, %s387_s7), 3 }
  0x21   : > { %v268_v14 = vsel %vm266_vm0, %v393_v13, 0  ;;  %s388_s8 = sshll.u32 %s547_s7, 3 }
  0x22   : > { %s222_s11 = scalar_lea.vmem %s542_s3, %s388_s8 }
  0x23   : > { %276 = vmatpush1.bf16.msra.mxu0 %v433_v11 }
  0x24   : > { %395 = vmatprep.subr.msk.bf16.mxu0 %vm266_vm0, %v394_v12 }
  0x27   : > { %278 = vmatpush1.bf16.msra.mxu0 %v268_v14 }
  0x2a   : > { %396 = vmatmul.mubr.msk.bf16.vlgmr.msra.gmra.mrb[0].mxu0 %vm262_vm1, %v230_v15 }
  0x99   : > { %v235_v16 = vpop.permute.xlu0 %234 }
  0xfd   : > { %v307_v17 = vpop.f32.mrb[0].mxu0 }
  0xfe   : > { %v308_v18 = vadd.f32 %v307_v17, %v235_v16  ;;  %v309_v19 = vpop.f32.mrb[1].mxu0 }
  0xff   : > { %v310_v20 = vadd.f32 %v309_v19, %v235_v16  ;;  %v311_v21 = vpop.f32.mrb[2].mxu0 }
 0x100   : > { %v314_v22 = vmax.f32 %v308_v18, 0.0  ;;  %v312_v23 = vpop.f32.mrb[3].mxu0 }
 0x101   : > { %v315_v24 = vmax.f32 %v310_v20, 0.0 }
 0x102   : > { %316 = vst [vmem:[%s222_s11] sm:$0xff] %v314_v22 }
 0x103   : > { %317 = vst [vmem:[%s222_s11 + $0x8] sm:$0xff] %v315_v24 }
 0x104 PF: > { %p10_p9 = scmp.ge.s32.totalorder %s498_s16, 4   ;;  %s543_s12 = smov %s454_s13 }
 0x105   : > { %s544_s13 = smov %s507_s19  ;;  %s545_s14 = smov %s498_s16 }
 0x106   :  { %12 = sbr.rel (!%p10_p9) target bundleno = 2 (0x2), region = 105 }

// kernel: _lambda_.6
= control target key start
LH: loop header
LB: loop body
LE: loop exit
PB: predicated region body
PF: predicated region fallthrough
CT: control target
= control target key end

     0   :  { %v218_v0 = vmov 0.0   ;;  %vm219_vm0 = vmmov 0   ;;  %v220_v2 = vmov 0   ;;  %vm68_vm1 = vcmask 1043456   ;;  %s283_s0 = inlined_call_operand.vmem [shape: bf16[72,128], index: 0, kind: input, shape index: {}]   ;;  %s284_s2 = inlined_call_operand.vmem [shape: f32[8,1], index: 2, kind: input, shape index: {}]   ;;  %s285_s4 = inlined_call_operand.vmem [shape: f32[8,1], index: 4, kind: input, shape index: {}]   ;;  %s286_s1 = inlined_call_operand.vmem [shape: bf16[8,72], index: 1, kind: input, shape index: {}]   ;;  %s287_s3 = inlined_call_operand.vmem [shape: bf16[8,8], index: 3, kind: input, shape index: {}]   ;;  %s288_s5 = inlined_call_operand.vmem [shape: f32[8,128], index: 5, kind: output, shape index: {}]  }
   0x1   :  { %189 = vmatprep.subr.bf16.mxu0 %v218_v0  ;;  %v213_v1 = vld [vmem:[%s283_s0] sm:$0xff]   ;;  %199 = vmatprep.mubr.msk.bf16.mxu0 %vm219_vm0, %v218_v0  ;;  %v214_v3 = vld [vmem:[%s283_s0 + $0x8] sm:$0xff]   ;;  %v215_v5 = vld [vmem:[%s283_s0 + $0x10] sm:$0xff]   ;;  %vm64_vm2 = vcmask 588800   ;;  %vm121_vm3 = vcmask 64512  }
   0x2   :  { %212 = vset.pattern.permute.xlu0 %v220_v2  ;;  %203 = vmatprep.subr.bf16.mxu1 %v218_v0  ;;  %v31_v4 = vld [vmem:[%s284_s2] sm:$0xff]  ;;  %v216_v7 = vld [vmem:[%s283_s0 + $0x18] sm:$0xff]  }
   0x3   :  { %190 = vmatpush3.bf16.msra.mxu0 %v213_v1  ;;  %205 = vmatprep.mubr.msk.bf16.mxu1 %vm219_vm0, %v218_v0  ;;  %v114_v6 = vld [vmem:[%s285_s4] sm:$0xff] }
   0x4   :  { %191 = vmatprep.subr.bf16.mxu0 %v218_v0  ;;  %34 = vperm.xlu0 %212, %v31_v4   ;;  %v217_v8 = vld [vmem:[%s283_s0 + $0x20] ss:$0 sps:$4 sm:$0xff]  }
   0x5   :  { %v70_v9 = vsel %vm68_vm1, %v217_v8, 0  ;;  %v30_v10 = vld [vmem:[%s286_s1] sm:$0xf] }
   0x6   :  { %v113_v20 = vld [vmem:[%s287_s3] sm:$0xf] }
   0x7   :  { %192 = vmatpush3.bf16.msra.mxu0 %v214_v3 }
   0x8   :  { %193 = vmatprep.subr.bf16.mxu0 %v218_v0  ;;  %118 = vperm.xlu0 %212, %v114_v6  }
   0xb   :  { %194 = vmatpush3.bf16.msra.mxu0 %v215_v5 }
   0xc   :  { %195 = vmatprep.subr.bf16.mxu0 %v218_v0 }
   0xf   :  { %196 = vmatpush3.bf16.msra.mxu0 %v216_v7 }
  0x10   :  { %197 = vmatprep.subr.bf16.mxu0 %v218_v0 }
  0x13   :  { %198 = vmatpush3.bf16.msra.mxu0 %v70_v9 }
  0x16   :  { %200 = vmatmul.mubr.msk.bf16.vlgmr.msra.gmra.mrb[0].mxu0 %vm64_vm2, %v30_v10 }
  0x83   :  { %v35_v11 = vpop.permute.xlu0 %34 }
  0x87   :  { %v119_v21 = vpop.permute.xlu0 %118 }
  0xe9   :  { %v106_v12 = vpop.f32.mrb[0].mxu0 }
  0xea   :  { %v107_v13 = vadd.f32 %v106_v12, %v35_v11  ;;  %v201_v14 = vpop.f32.mrb[1].mxu0 }
  0xeb   :  { %v109_v15 = vpop.f32.mrb[2].mxu0 }
  0xec   :  { %v112_v16 = vmax.f32 %v107_v13, 0.0  ;;  %v202_v17 = vpop.f32.mrb[3].mxu0 }
  0xee   :  { %v115_v18 = vpack.c.bf16 %v112_v16, %v112_v16 }
  0xf0   :  { %v126_v19 = vsel %vm68_vm1, %v115_v18, 0 }
  0xf1   :  { %204 = vmatpush3.bf16.msra.mxu1 %v126_v19 }
  0xf4   :  { %206 = vmatmul.mubr.msk.bf16.vlgmr.msra.gmra.mrb[0].mxu1 %vm121_vm3, %v113_v20 }
 0x1c7   :  { %v162_v22 = vpop.f32.mrb[0].mxu1 }
 0x1c8   :  { %v163_v23 = vadd.f32 %v162_v22, %v119_v21  ;;  %v207_v24 = vpop.f32.mrb[1].mxu1 }
 0x1c9   :  { %v165_v25 = vpop.f32.mrb[2].mxu1 }
 0x1ca   :  { %v168_v26 = vmax.f32 %v163_v23, 0.0  ;;  %v208_v27 = vpop.f32.mrb[3].mxu1 }
 0x1cc   :  { %169 = vst [vmem:[%s288_s5] sm:$0xff] %v168_v26 }

// kernel: _lambda_.7
= control target key start
LH: loop header
LB: loop body
LE: loop exit
PB: predicated region body
PF: predicated region fallthrough
CT: control target
= control target key end

     0   :  { %v250_v0 = vmov 0.0   ;;  %vm251_vm0 = vmmov 0   ;;  %v252_v2 = vmov 0   ;;  %vm80_vm1 = vcmask 1043456   ;;  %s322_s0 = inlined_call_operand.vmem [shape: bf16[72,32], index: 0, kind: input, shape index: {}]   ;;  %s323_s2 = inlined_call_operand.vmem [shape: f32[16,1], index: 2, kind: input, shape index: {}]   ;;  %s324_s1 = inlined_call_operand.vmem [shape: bf16[16,72], index: 1, kind: input, shape index: {}]   ;;  %s325_s3 = inlined_call_operand.vmem [shape: bf16[16,16], index: 3, kind: input, shape index: {}]   ;;  %s326_s4 = inlined_call_operand.vmem [shape: f32[16,1], index: 4, kind: input, shape index: {}]   ;;  %s327_s5 = inlined_call_operand.vmem [shape: f32[16,32], index: 5, kind: output, shape index: {}]  }
   0x1   :  { %218 = vmatprep.subr.bf16.mxu0 %v250_v0  ;;  %v243_v1 = vld [vmem:[%s322_s0] sm:$0xff]   ;;  %228 = vmatprep.mubr.msk.bf16.mxu0 %vm251_vm0, %v250_v0  ;;  %v244_v3 = vld [vmem:[%s322_s0 + $0x8] sm:$0xff]   ;;  %v245_v5 = vld [vmem:[%s322_s0 + $0x10] sm:$0xff]   ;;  %vm76_vm2 = vcmask 588800   ;;  %vm147_vm3 = vcmask 130048   ;;  %vm194_vm4 = vcmask 261120  }
   0x2   :  { %241 = vset.pattern.permute.xlu0 %v252_v2  ;;  %232 = vmatprep.subr.bf16.mxu1 %v250_v0  ;;  %v32_v4 = vld [vmem:[%s323_s2] sm:$0xff]  ;;  %v33_v6 = vld [vmem:[%s323_s2 + $0x8] sm:$0xff]  ;;  %v246_v7 = vld [vmem:[%s322_s0 + $0x18] sm:$0xff]  }
   0x3   :  { %219 = vmatpush3.bf16.msra.mxu0 %v243_v1  ;;  %234 = vmatprep.mubr.msk.bf16.mxu1 %vm251_vm0, %v250_v0  ;;  %v247_v8 = vld [vmem:[%s322_s0 + $0x20] ss:$0 sps:$4 sm:$0xff]   ;;  %v130_v12 = vld [vmem:[%s326_s4 + $0x8] sm:$0xff] }
   0x4   :  { %220 = vmatprep.subr.bf16.mxu0 %v250_v0  ;;  %242 = vset.pattern.permute.xlu1 %v252_v2  ;;  %v82_v9 = vsel %vm80_vm1, %v247_v8, 0  ;;  %v248_v10 = vld [vmem:[%s324_s1] sm:$0xff]  }
   0x5   :  { %36 = vperm.xlu0 %241, %v32_v4   ;;  %v129_v11 = vld [vmem:[%s326_s4] sm:$0xff] }
   0x6   :  { %134 = vperm.xlu1 %242, %v129_v11   ;;  %v249_v24 = vld [vmem:[%s325_s3] sm:$0xff]  }
   0x7   :  { %221 = vmatpush3.bf16.msra.mxu0 %v244_v3 }
   0x8   :  { %222 = vmatprep.subr.bf16.mxu0 %v250_v0 }
   0x9   :  { %41 = vperm.xlu0 %241, %v33_v6  }
   0xa   :  { %139 = vperm.xlu1 %242, %v130_v12  }
   0xb   :  { %223 = vmatpush3.bf16.msra.mxu0 %v245_v5 }
   0xc   :  { %224 = vmatprep.subr.bf16.mxu0 %v250_v0 }
   0xf   :  { %225 = vmatpush3.bf16.msra.mxu0 %v246_v7 }
  0x10   :  { %226 = vmatprep.subr.bf16.mxu0 %v250_v0 }
  0x13   :  { %227 = vmatpush3.bf16.msra.mxu0 %v82_v9 }
  0x16   :  { %229 = vmatmul.mubr.msk.bf16.vlgmr.msra.gmra.mrb[0].mxu0 %vm76_vm2, %v248_v10 }
  0x84   :  { %v37_v13 = vpop.permute.xlu0 %36 }
  0x85   :  { %v135_v25 = vpop.permute.xlu1 %134 }
  0x88   :  { %v42_v17 = vpop.permute.xlu0 %41 }
  0x89   :  { %v140_v29 = vpop.permute.xlu1 %139 }
  0xe9   :  { %v118_v14 = vpop.f32.mrb[0].mxu0 }
  0xea   :  { %v119_v15 = vadd.f32 %v118_v14, %v37_v13  ;;  %v230_v16 = vpop.f32.mrb[1].mxu0 }
  0xeb   :  { %v121_v18 = vpop.f32.mrb[2].mxu0 }
  0xec   :  { %v122_v19 = vadd.f32 %v121_v18, %v42_v17  ;;  %v231_v20 = vpop.f32.mrb[3].mxu0  ;;  %v125_v21 = vmax.f32 %v119_v15, 0.0 }
  0xee   :  { %v126_v22 = vmax.f32 %v122_v19, 0.0 }
  0xf0   :  { %v131_v23 = vpack.c.bf16 %v126_v22, %v125_v21 }
  0xf2   :  { %233 = vmatpush3.bf16.msra.mxu1 %v131_v23 }
  0xf5   :  { %235 = vmatmul.mubr.msk.bf16.vlgmr.msra.gmra.mrb[0].mxu1 %vm147_vm3, %v249_v24 }
 0x1c8   :  { %v185_v26 = vpop.f32.mrb[0].mxu1 }
 0x1c9   :  { %v186_v27 = vadd.f32 %v185_v26, %v135_v25  ;;  %v236_v28 = vpop.f32.mrb[1].mxu1 }
 0x1ca   :  { %v188_v30 = vpop.f32.mrb[2].mxu1 }
 0x1cb   :  { %v192_v31 = vmax.f32 %v186_v27, 0.0  ;;  %v189_v32 = vadd.f32 %v188_v30, %v140_v29  ;;  %v237_v33 = vpop.f32.mrb[3].mxu1 }
 0x1cd   :  { %195 = vst.msk [vmem:[%s327_s5] sm:$0xff] %vm194_vm4, %v192_v31  ;;  %v193_v34 = vmax.f32 %v189_v32, 0.0 }
 0x1cf   :  { %196 = vst.msk [vmem:[%s327_s5 + $0x8] sm:$0xff] %vm194_vm4, %v193_v34 }

// kernel: _lambda_.9
= control target key start
LH: loop header
LB: loop body
LE: loop exit
PB: predicated region body
PF: predicated region fallthrough
CT: control target
= control target key end

     0   :  { %s2792_s0 = inlined_call_operand.vmem [shape: f32[2,4,4,16], index: 0, kind: input, shape index: {}]   ;;  %s2793_s1 = inlined_call_operand.vmem [shape: f32[16,64], index: 1, kind: input, shape index: {}]   ;;  %s2794_s2 = inlined_call_operand.vmem [shape: f32[1,64], index: 2, kind: input, shape index: {}]   ;;  %s2795_s3 = inlined_call_operand.vmem [shape: f32[5,5,64], index: 3, kind: input, shape index: {}]   ;;  %s2796_s4 = inlined_call_operand.vmem [shape: f32[1,64], index: 4, kind: input, shape index: {}]   ;;  %s2797_s5 = inlined_call_operand.vmem [shape: f32[32,24], index: 5, kind: input, shape index: {}]   ;;  %s2798_s6 = inlined_call_operand.vmem [shape: f32[1,24], index: 6, kind: input, shape index: {}]   ;;  %s2799_s7 = inlined_call_operand.vmem [shape: f32[32,24], index: 7, kind: input, shape index: {}]   ;;  %s2800_s8 = inlined_call_operand.vmem [shape: f32[1,24], index: 8, kind: input, shape index: {}]   ;;  %s2801_s9 = inlined_call_operand.vmem [shape: f32[1,24], index: 9, kind: input, shape index: {}]   ;;  %s2802_s10 = inlined_call_operand.vmem [shape: f32[1,24], index: 10, kind: input, shape index: {}]   ;;  %s2803_s11 = inlined_call_operand.vmem [shape: f32[1,24], index: 11, kind: input, shape index: {}]   ;;  %s2804_s12 = inlined_call_operand.vmem [shape: f32[1,24], index: 12, kind: input, shape index: {}]   ;;  %s2805_s13 = inlined_call_operand.vmem [shape: f32[24,48], index: 13, kind: input, shape index: {}]   ;;  %s2806_s14 = inlined_call_operand.vmem [shape: f32[24,48], index: 14, kind: input, shape index: {}]   ;;  %s2807_s15 = inlined_call_operand.vmem [shape: f32[1,48], index: 15, kind: input, shape index: {}]   ;;  %s2808_s16 = inlined_call_operand.vmem [shape: f32[48,48], index: 16, kind: input, shape index: {}]   ;;  %s2809_s17 = inlined_call_operand.vmem [shape: f32[1,48], index: 17, kind: input, shape index: {}]   ;;  %s2810_s18 = inlined_call_operand.vmem [shape: f32[48,24], index: 18, kind: input, shape index: {}]   ;;  %s2811_s19 = inlined_call_operand.vmem [shape: f32[1,24], index: 19, kind: input, shape index: {}]   ;;  %s2812_s20 = inlined_call_operand.vmem [shape: f32[48,24], index: 20, kind: input, shape index: {}]   ;;  %s2813_s21 = inlined_call_operand.vmem [shape: f32[1,24], index: 21, kind: input, shape index: {}]   ;;  %s2814_s22 = inlined_call_operand.hbm [shape: f32[2,4,24], index: 22, kind: output, shape index: {}]  }
   0x1   :  { %2826 = sst [smem:[#allocation11_spill]] %s2792_s0 }
   0x2   :  { %2827 = sst [smem:[#allocation12_spill]] %s2793_s1 }
   0x3   :  { %2828 = sst [smem:[#allocation13_spill]] %s2794_s2 }
   0x4   :  { %2829 = sst [smem:[#allocation14_spill]] %s2795_s3 }
   0x5   :  { %2830 = sst [smem:[#allocation15_spill]] %s2796_s4 }
   0x6   :  { %2831 = sst [smem:[#allocation16_spill]] %s2797_s5 }
   0x7   :  { %2832 = sst [smem:[#allocation17_spill]] %s2798_s6 }
   0x8   :  { %2833 = sst [smem:[#allocation18_spill]] %s2799_s7 }
   0x9   :  { %2834 = sst [smem:[#allocation19_spill]] %s2800_s8 }
   0xa   :  { %2835 = sst [smem:[#allocation20_spill]] %s2806_s14 }
   0xb   :  { %27 = vsyncpa [#allocation5], 0 }
   0xc   :  { %29 = vsyncpa [#allocation5 + $0x1], 0  ;;  %s2417_s3 = smov 0   ;;  %s2419_s28 = smov 0  }
   0xd   :  { %s2421_s29 = smov 0   ;;  %s2423_s30 = smov 0  }
   0xe LB: > { %2836 = sst [smem:[#allocation7_spill]] %s2291_s29  ;;  %s2438_s4 = sadd.s32 4294967295, %s2295_s30   ;;  %s2295_s30 = sphi %s2423_s30, %s2853_s30   ;;  %s2291_s29 = sphi %s2421_s29, %s2855_s29   ;;  %s2287_s28 = sphi %s2419_s28, %s2857_s28   ;;  %s2283_s3 = sphi %s2417_s3, %s2856_s3  }
   0xf   : > { %s1915_s0 = sadd.s32 4294967294, %s2295_s30   ;;  %s2442_s23 = sadd.s32 1, %s2295_s30  }
  0x10   : > { %2837 = sst [smem:[#allocation8_spill]] %s2442_s23  ;;  %s509_s1 = sadd.s32 1, %s2291_s29 }
  0x11   : > { %s506_s5 = ssub.s32 %s2295_s30, %s2442_s23  ;;  %p519_p0 = scmp.ne.s32.totalorder %s2291_s29, %s2287_s28 }
  0x12   : > { %p507_p1 = scmp.eq.s32.totalorder %s506_s5, 0  ;;  %p520_p2 = scmp.eq.s32.totalorder %s2438_s4, 1 }
  0x13   : > { %p525_p3 = scmp.ne.s32.totalorder %s2287_s28, %s2283_s3  ;;  %p526_p4 = scmp.eq.s32.totalorder %s1915_s0, 1 }
  0x14   : > { %s2453_s24 = scalar_select %p507_p1, %s2291_s29, %s509_s1  }
  0x15   : > { %p2455_p5 = por %p520_p2, %p519_p0  ;;  %p2459_p6 = por %p526_p4, %p525_p3 }
  0x16   : > { %2838 = sst [smem:[#allocation9_spill]] %s2453_s24  ;;  %p1918_p7 = scmp.ge.s32.totalorder %s2295_s30, 1 }
  0x17   : > { %s2840_s25 = scalar_select %p2459_p6, 1, 0 }
  0x18   : > { %p615_p8 = scmp.lt.s32.totalorder %s2295_s30, 3 }
  0x19   : > { %2841 = sst [smem:[#allocation10_spill]] %s2840_s25 }
  0x1a   : > { %p616_p9 = pnand %p1918_p7, %p615_p8 }
  0x1b   : > { %s2842_s27 = sld [smem:[#allocation12_spill]] (!%p616_p9)  ;;  %p677_p10 = scmp.lt.s32.totalorder (!%p616_p9), %s2438_s4, 1  ;;  %v2297_v2 = vmov (!%p616_p9), 0.0|0.0   ;;  %vm682_vm0 = vcmask (!%p616_p9), 523264   ;;  %vm2298_vm1 = vmmov (!%p616_p9), 0   ;;  %v2299_v4 = vmov (!%p616_p9), 0.0  }
  0x1c   : > { %619 = sbr.rel (%p616_p9) target bundleno = 1844 (0x734), region = 108  ;;  %2113 = vmatprep.subr.bf16.mxu0 (!%p616_p9), %v2297_v2  ;;  %2116 = vmatprep.subr.bf16.mxu1 (!%p616_p9), %v2297_v2  ;;  %683 = vst.msk [vmem:[#allocation2] sm:$0xff] (!%p616_p9), %vm682_vm0, %v2299_v4  ;;  %684 = vst.msk [vmem:[#allocation2 + $0x8] sm:$0xff] (!%p616_p9), %vm682_vm0, %v2299_v4  ;;  %vm701_vm2 = vcmask (!%p616_p9), 130048   ;;  %s2843_s1 = sld [smem:[#allocation11_spill]] (!%p616_p9)  ;;  %vm777_vm3 = vcmask (!%p616_p9), 519168  }
  0x1d   : > { %2004 = vmatprep.mubr.msk.f32.mxu0 (!%p616_p9), %vm2298_vm1, %v2299_v4  ;;  %2011 = vmatprep.mubr.msk.f32.mxu1 (!%p616_p9), %vm2298_vm1, %v2299_v4  ;;  %685 = vst.msk [vmem:[#allocation2 + $0x10] sm:$0xff] (!%p616_p9), %vm682_vm0, %v2299_v4  ;;  %689 = vst.msk [vmem:[#allocation2 + $0x30] sm:$0xff] (!%p616_p9), %vm682_vm0, %v2299_v4  ;;  %s2845_s7 = sld [smem:[#allocation18_spill]] (!%p616_p9)  ;;  %s2846_s2 = sld [smem:[#allocation13_spill]] (!%p616_p9)  ;;  %vm1055_vm4 = vcmask (!%p616_p9), 520192   ;;  %vm1075_vm5 = vcmask (!%p616_p9), 516096  }
  0x1e   : > { %686 = vst.msk [vmem:[#allocation2 + $0x18] sm:$0xff] (!%p616_p9), %vm682_vm0, %v2299_v4  ;;  %687 = vst.msk [vmem:[#allocation2 + $0x20] sm:$0xff] (!%p616_p9), %vm682_vm0, %v2299_v4  ;;  %s2848_s24 = sld [smem:[#allocation15_spill]] (!%p616_p9)  ;;  %vm1179_vm6 = vcmask (!%p616_p9), 261120   ;;  %vm1338_vm7 = vcmask (!%p616_p9), 191488   ;;  %vm1356_vm8 = vcmask (!%p616_p9), 188416  }
  0x1f   : > { %688 = vst.msk [vmem:[#allocation2 + $0x28] sm:$0xff] (!%p616_p9), %vm682_vm0, %v2299_v4  ;;  %s2850_s8 = sld [smem:[#allocation19_spill]] (!%p616_p9)  ;;  %s2851_s14 = sld [smem:[#allocation20_spill]] (!%p616_p9)  ;;  %vm1431_vm9 = vcmask (!%p616_p9), 195584   ;;  %vm1587_vm10 = vcmask (!%p616_p9), 392192  }
  0x21   : > { %v692_v0 = vld [vmem:[%s2842_s27] sm:$0xff] (!%p616_p9)  ;;  %v693_v1 = vld [vmem:[%s2842_s27 + $0x8] sm:$0xff] (!%p616_p9) }
  0x22   : > { %v2114_v3 = vpack.c.bf16 (!%p616_p9), %v693_v1, %v692_v0 }
  0x23   : > { %s678_s5 = scalar_select %p677_p10, %s2438_s4, 1  ;;  %v1253_v15 = vld [vmem:[%s2845_s7] sm:$0xff]  ;;  %v1254_v16 = vld [vmem:[%s2845_s7 + $0x8] sm:$0xff]  ;;  %v1255_v17 = vld [vmem:[%s2845_s7 + $0x10] sm:$0xff] }
  0x24   : > { %2115 = vmatpush3.bf16.msra.mxu0 %v2114_v3  ;;  %2118 = vmatpush3.bf16.msra.mxu1 %v2114_v3  ;;  %v2132_v18 = vpack.c.bf16 %v1254_v16, %v1253_v15  ;;  %v1256_v19 = vld [vmem:[%s2845_s7 + $0x18] sm:$0xff]  ;;  %v1922_v21 = vld [vmem:[%s2846_s2] ss:$0 sm:$0xff]  ;;  %v1046_v28 = vld [vmem:[#allocation2 + $0x8] sm:$0x1f]  ;;  %s2300_s2 = smov 96  }
  0x25   : > { %s1948_s26 = sshll.u32 %s678_s5, 4  ;;  %2119 = vmatprep.subr.bf16.mxu0 %v2297_v2  ;;  %2122 = vmatprep.subr.bf16.mxu1 %v2297_v2  ;;  %v2135_v20 = vpack.c.bf16 %v1256_v19, %v1255_v17  ;;  %v1045_v27 = vld [vmem:[#allocation2] sm:$0x1f]  ;;  %v1078_v33 = vld [vmem:[#allocation2 + $0xa] sm:$0x1f] }
  0x26   : > { %s681_s27 = scalar_lea.vmem %s2843_s1, %s1948_s26  ;;  %s2844_s26 = sld [smem:[#allocation16_spill]]  ;;  %v1077_v32 = vld [vmem:[#allocation2 + $0x2] sm:$0x1f]  ;;  %v1111_v40 = vld [vmem:[#allocation2 + $0x30] sm:$0x1f] }
  0x27   : > { %v691_v5 = vld [vmem:[%s681_s27] sm:$0xf]  ;;  %v1924_v6 = vld [vmem:[%s681_s27 + $0x4] sm:$0xf]  ;;  %v1927_v7 = vld [vmem:[%s681_s27 + $0x8] sm:$0xf] }
  0x28   : > { %2005 = vmatmul.mubr.msk.f32.vlgmr.msra.gmra.mrb[0].mxu0 %vm701_vm2, %v691_v5  ;;  %2012 = vmatmul.mubr.msk.f32.vlgmr.msra.gmra.mrb[0].mxu1 %vm701_vm2, %v1924_v6  ;;  %v1930_v8 = vld [vmem:[%s681_s27 + $0xc] sm:$0xf]  ;;  %s2847_s1 = sld [smem:[#allocation14_spill]]  ;;  %v1141_v58 = vld [vmem:[#allocation2 + $0x32] sm:$0x1f] }
  0x29   : > { %2121 = vmatpush3.bf16.msra.mxu0 %v2114_v3  ;;  %2124 = vmatpush3.bf16.msra.mxu1 %v2114_v3 }
  0x2a   : > { %2018 = vmatprep.mubr.msk.f32.mxu0 %vm2298_vm1, %v2299_v4  ;;  %2025 = vmatprep.mubr.msk.f32.mxu1 %vm2298_vm1, %v2299_v4 }
  0x2b   : > { %2125 = vmatprep.subr.bf16.mxu0 %v2297_v2  ;;  %2131 = vmatprep.subr.bf16.mxu1 %v2297_v2 }
  0x2c   : > { %2019 = vmatmul.mubr.msk.f32.vlgmr.msra.gmra.mrb[2].mxu0 %vm701_vm2, %v1927_v7  ;;  %2026 = vmatmul.mubr.msk.f32.vlgmr.msra.gmra.mrb[2].mxu1 %vm701_vm2, %v1930_v8  ;;  %v1168_v9 = vld [vmem:[%s2844_s26] sm:$0xff]  ;;  %v1169_v10 = vld [vmem:[%s2844_s26 + $0x8] sm:$0xff]  ;;  %v1170_v11 = vld [vmem:[%s2844_s26 + $0x10] sm:$0xff] }
  0x2d   : > { %2036 = vmatprep.mubr.msk.f32.mxu0 %vm2298_vm1, %v2299_v4  ;;  %2047 = vmatprep.mubr.msk.f32.mxu1 %vm2298_vm1, %v2299_v4  ;;  %v2126_v12 = vpack.c.bf16 %v1169_v10, %v1168_v9  ;;  %v1171_v13 = vld [vmem:[%s2844_s26 + $0x18] sm:$0xff]  ;;  %s2849_s26 = sld [smem:[#allocation17_spill]] }
  0x2e   : > { %v2129_v14 = vpack.c.bf16 %v1171_v13, %v1170_v11  ;;  %2133 = vmatpush3.bf16.msra.mxu1 %v2132_v18  ;;  %v1040_v23 = vld [vmem:[%s2847_s1] sm:$0x1f]  ;;  %v2542_v24 = vld [vmem:[%s2847_s1 + $0x8] sm:$0x1f]  ;;  %v1042_v55 = vld [vmem:[%s2847_s1 + $0x10] sm:$0x1f] }
  0x2f   : > { %2127 = vmatpush3.bf16.msra.mxu0 %v2126_v12  ;;  %2134 = vmatprep.subr.bf16.mxu1 %v2297_v2  ;;  %v1050_v36 = vmul.f32 %v1045_v27, %v1040_v23  ;;  %v1051_v37 = vmul.f32 %v1046_v28, %v2542_v24  ;;  %v1082_v41 = vmul.f32 %v1077_v32, %v1040_v23  ;;  %v1044_v47 = vld [vmem:[%s2847_s1 + $0x20] sm:$0x1f]  ;;  %v1043_v56 = vld [vmem:[%s2847_s1 + $0x18] sm:$0x1f] }
  0x30   : > { %2128 = vmatprep.subr.bf16.mxu0 %v2297_v2  ;;  %v1083_v42 = vmul.f32 %v1078_v33, %v2542_v24  ;;  %v1116_v50 = vmul.f32 %v1111_v40, %v1044_v47  ;;  %v1146_v13 = vmul.f32 %v1141_v58, %v1044_v47 }
  0x31   : > { %v1056_v51 = vsel %vm1055_vm4, %v1050_v36, 0.0  ;;  %v1057_v52 = vsel %vm1055_vm4, %v1051_v37, 0.0  ;;  %v1087_v53 = vsel %vm1055_vm4, %v1082_v41, 0.0 }
  0x32   : > { %2136 = vmatpush3.bf16.msra.mxu1 %v2135_v20  ;;  %v1088_v54 = vsel %vm1055_vm4, %v1083_v42, 0.0  ;;  %v2564_v57 = vsel %vm1055_vm4, %v1116_v50, 0.0  ;;  %v1058_v60 = vadd.f32 %v1057_v52, %v1056_v51 }
  0x33   : > { %2130 = vmatpush3.bf16.msra.mxu0 %v2129_v14  ;;  %2137 = vmatprep.subr.bf16.mxu1 %v2297_v2  ;;  %v1089_v62 = vadd.f32 %v1088_v54, %v1087_v53  ;;  %v1154_v53 = vsel %vm1055_vm4, %v1146_v13, 0.0  ;;  %v1072_v13 = vld [vmem:[%s2848_s24] sm:$0x1] }
  0x34   : > { %2143 = vmatprep.subr.bf16.mxu0 %v2297_v2 }
  0xfb   : > { %v771_v22 = vpop.f32.mrb[0].mxu0  ;;  %v859_v25 = vpop.f32.mrb[0].mxu1 }
  0xfc   : > { %v772_v26 = vadd.f32 %v1922_v21, %v771_v22  ;;  %v860_v29 = vadd.f32 %v1922_v21, %v859_v25  ;;  %v2006_v30 = vpop.f32.mrb[1].mxu0  ;;  %v2013_v31 = vpop.f32.mrb[1].mxu1 }
  0xfe   : > { %v775_v34 = vmax.f32 %v772_v26, 0.0  ;;  %v863_v35 = vmax.f32 %v860_v29, 0.0 }
  0xff   : > { %v946_v38 = vpop.f32.mrb[2].mxu0  ;;  %v1033_v39 = vpop.f32.mrb[2].mxu1 }
 0x100   : > { %778 = vst.msk [vmem:[#allocation2 + $0x12] sm:$0xf] %vm777_vm3, %v775_v34  ;;  %865 = vst.msk [vmem:[#allocation2 + $0x1a] sm:$0xf] %vm777_vm3, %v863_v35  ;;  %v947_v43 = vadd.f32 %v1922_v21, %v946_v38  ;;  %v2020_v44 = vpop.f32.mrb[3].mxu0  ;;  %v1034_v45 = vadd.f32 %v1922_v21, %v1033_v39  ;;  %v2027_v46 = vpop.f32.mrb[3].mxu1 }
 0x102   : > { %v950_v48 = vmax.f32 %v947_v43, 0.0  ;;  %v1037_v49 = vmax.f32 %v1034_v45, 0.0 }
 0x104   : > { %952 = vst.msk [vmem:[#allocation2 + $0x22] sm:$0xf] %vm777_vm3, %v950_v48  ;;  %1039 = vst.msk [vmem:[#allocation2 + $0x2a] sm:$0xf] %vm777_vm3, %v1037_v49 }
 0x107   : > { %v1047_v59 = vld [vmem:[#allocation2 + $0x10] sm:$0x1f]  ;;  %v1048_v6 = vld [vmem:[#allocation2 + $0x18] sm:$0x1f] }
 0x108   : > { %v1079_v61 = vld [vmem:[#allocation2 + $0x12] sm:$0x1f]  ;;  %v1052_v0 = vmul.f32 %v1047_v59, %v1042_v55  ;;  %v1080_v7 = vld [vmem:[#allocation2 + $0x1a] sm:$0x1f]  ;;  %v1053_v9 = vmul.f32 %v1048_v6, %v1043_v56 }
 0x109   : > { %v1107_v63 = vld [vmem:[#allocation2 + $0x10] sm:$0x1f]  ;;  %v1084_v1 = vmul.f32 %v1079_v61, %v1042_v55  ;;  %v1085_v10 = vmul.f32 %v1080_v7, %v1043_v56  ;;  %v1108_v11 = vld [vmem:[#allocation2 + $0x18] sm:$0x1f] }
 0x10a   : > { %v1112_v3 = vmul.f32 %v1107_v63, %v1040_v23  ;;  %v1137_v5 = vld [vmem:[#allocation2 + $0x12] sm:$0x1f]  ;;  %v1138_v12 = vld [vmem:[#allocation2 + $0x1a] sm:$0x1f]  ;;  %v1059_v14 = vsel %vm1055_vm4, %v1052_v0, 0.0  ;;  %v1113_v17 = vmul.f32 %v1108_v11, %v2542_v24  ;;  %v1061_v21 = vsel %vm1055_vm4, %v1053_v9, 0.0 }
 0x10b   : > { %v1142_v8 = vmul.f32 %v1137_v5, %v1040_v23  ;;  %v1090_v15 = vsel %vm1055_vm4, %v1084_v1, 0.0  ;;  %v1060_v18 = vadd.f32 %v1059_v14, %v1058_v60  ;;  %v1049_v22 = vld [vmem:[#allocation2 + $0x20] sm:$0x1f]  ;;  %v1092_v25 = vsel %vm1055_vm4, %v1085_v10, 0.0  ;;  %v1110_v35 = vld [vmem:[#allocation2 + $0x28] sm:$0x1f] }
 0x10c   : > { %v1117_v16 = vsel %vm1055_vm4, %v1112_v3, 0.0  ;;  %v1091_v19 = vadd.f32 %v1090_v15, %v1089_v62  ;;  %v1081_v23 = vld [vmem:[#allocation2 + $0x22] sm:$0x1f]  ;;  %v1118_v26 = vsel %vm1055_vm4, %v1113_v17, 0.0  ;;  %v1143_v27 = vmul.f32 %v1138_v12, %v2542_v24  ;;  %v1140_v36 = vld [vmem:[#allocation2 + $0x2a] sm:$0x1f] }
 0x10d   : > { %v1147_v20 = vsel %vm1055_vm4, %v1142_v8, 0.0  ;;  %v1054_v28 = vmul.f32 %v1049_v22, %v1044_v47  ;;  %v1109_v29 = vld [vmem:[#allocation2 + $0x20] sm:$0x1f]  ;;  %v1062_v31 = vadd.f32 %v1061_v21, %v1060_v18  ;;  %v1119_v33 = vadd.f32 %v1118_v26, %v1117_v16 }
 0x10e   : > { %v1139_v30 = vld [vmem:[#allocation2 + $0x22] sm:$0x1f]  ;;  %v1093_v32 = vadd.f32 %v1092_v25, %v1091_v19  ;;  %v1086_v34 = vmul.f32 %v1081_v23, %v1044_v47  ;;  %v1148_v37 = vsel %vm1055_vm4, %v1143_v27, 0.0  ;;  %v1114_v39 = vmul.f32 %v1109_v29, %v1042_v55  ;;  %v1103_v15 = vld [vmem:[%s2848_s24] sm:$0x1] }
 0x10f   : > { %v1063_v38 = vsel %vm1055_vm4, %v1054_v28, 0.0  ;;  %v1144_v40 = vmul.f32 %v1139_v30, %v1042_v55  ;;  %v1149_v41 = vadd.f32 %v1148_v37, %v1147_v20  ;;  %v1115_v24 = vmul.f32 %v1110_v35, %v1043_v56  ;;  %v1133_v28 = vld [vmem:[%s2848_s24] sm:$0x1] }
 0x110   : > { %v1064_v42 = vadd.f32 %v1063_v38, %v1062_v31  ;;  %v1094_v43 = vsel %vm1055_vm4, %v1086_v34, 0.0  ;;  %v1120_v45 = vsel %vm1055_vm4, %v1114_v39, 0.0  ;;  %v1145_v48 = vmul.f32 %v1140_v36, %v1043_v56  ;;  %v1163_v29 = vld [vmem:[%s2848_s24] sm:$0x1] }
 0x111   : > { %v1095_v44 = vadd.f32 %v1094_v43, %v1093_v32  ;;  %v1150_v46 = vsel %vm1055_vm4, %v1144_v40, 0.0  ;;  %v1121_v47 = vadd.f32 %v1120_v45, %v1119_v33  ;;  %v1122_v50 = vsel %vm1055_vm4, %v1115_v24, 0.0  ;;  %v1933_v38 = vld [vmem:[%s2849_s26] ss:$0 sm:$0xff] }
 0x112   : > { %v1151_v49 = vadd.f32 %v1150_v46, %v1149_v41  ;;  %v1065_v51 = vsel %vm1055_vm4, %v1064_v42, 0.0  ;;  %v1152_v52 = vsel %vm1055_vm4, %v1145_v48, 0.0 }
 0x113   : > { %v1066_v54 = vrot.slane %v1065_v51, 4  ;;  %v1096_v55 = vsel %vm1055_vm4, %v1095_v44, 0.0  ;;  %v1123_v58 = vadd.f32 %v1122_v50, %v1121_v47  ;;  %v1935_v50 = vld [vmem:[%s2850_s8] ss:$0 sm:$0xff] }
 0x114   : > { %v1153_v59 = vadd.f32 %v1152_v52, %v1151_v49  ;;  %v1097_v60 = vrot.slane %v1096_v55, 4 }
 0x115   : > { %v1067_v61 = vadd.f32 %v1066_v54, %v1065_v51  ;;  %v1125_v62 = vadd.f32 %v2564_v57, %v1123_v58 }
 0x116   : > { %v1155_v56 = vadd.f32 %v1154_v53, %v1153_v59  ;;  %v1098_v63 = vadd.f32 %v1097_v60, %v1096_v55 }
 0x117   : > { %v1068_v0 = vrot.slane %v1067_v61, 2  ;;  %v1126_v3 = vsel %vm1055_vm4, %v1125_v62, 0.0 }
 0x118   : > { %v1099_v1 = vrot.slane %v1098_v63, 2  ;;  %v1156_v5 = vsel %vm1055_vm4, %v1155_v56, 0.0  ;;  %v1127_v7 = vrot.slane %v1126_v3, 4 }
 0x119   : > { %v1069_v6 = vadd.f32 %v1068_v0, %v1067_v61  ;;  %v1157_v8 = vrot.slane %v1156_v5, 4 }
 0x11a   : > { %v1100_v9 = vadd.f32 %v1099_v1, %v1098_v63  ;;  %v1128_v11 = vadd.f32 %v1127_v7, %v1126_v3 }
 0x11b   : > { %v1070_v10 = vrot.slane %v1069_v6, 1  ;;  %v1158_v12 = vadd.f32 %v1157_v8, %v1156_v5 }
 0x11c   : > { %v1101_v57 = vrot.slane %v1100_v9, 1  ;;  %v1129_v16 = vrot.slane %v1128_v11, 2 }
 0x11d   : > { %v1071_v14 = vadd.f32 %v1070_v10, %v1069_v6  ;;  %v1159_v17 = vrot.slane %v1158_v12, 2 }
 0x11e   : > { %v1102_v18 = vadd.f32 %v1101_v57, %v1100_v9  ;;  %v1130_v20 = vadd.f32 %v1129_v16, %v1128_v11 }
 0x11f   : > { %v1073_v19 = vadd.f32 %v1072_v13, %v1071_v14  ;;  %v1160_v21 = vadd.f32 %v1159_v17, %v1158_v12 }
 0x120   : > { %v1104_v22 = vadd.f32 %v1103_v15, %v1102_v18  ;;  %v1131_v25 = vrot.slane %v1130_v20, 1 }
 0x121   : > { %v1074_v23 = vmax.f32 %v1073_v19, 0.0  ;;  %v1161_v26 = vrot.slane %v1160_v21, 1 }
 0x122   : > { %v1105_v27 = vmax.f32 %v1104_v22, 0.0  ;;  %v1132_v30 = vadd.f32 %v1131_v25, %v1130_v20 }
 0x123   : > { %1076 = vst.msk [vmem:[#allocation3] sm:$0x1] %vm1075_vm5, %v1074_v23  ;;  %v1162_v31 = vadd.f32 %v1161_v26, %v1160_v21 }
 0x124   : > { %1106 = vst.msk [vmem:[#allocation3 + $0x1] sm:$0x1] %vm1075_vm5, %v1105_v27  ;;  %v1134_v32 = vadd.f32 %v1133_v28, %v1132_v30 }
 0x125   : > { %v1164_v33 = vadd.f32 %v1163_v29, %v1162_v31  ;;  %v1428_v31 = vld [vmem:[%s2851_s14] sm:$0xff] }
 0x126   : > { %v1135_v34 = vmax.f32 %v1134_v32, 0.0  ;;  %v1429_v32 = vld [vmem:[%s2851_s14 + $0x8] sm:$0xff] }
 0x127   : > { %v1165_v35 = vmax.f32 %v1164_v33, 0.0  ;;  %v2138_v33 = vpack.c.bf16 %v1429_v32, %v1428_v31 }
 0x128   : > { %1136 = vst.msk [vmem:[#allocation3 + $0x2] sm:$0x1] %vm1075_vm5, %v1135_v34 }
 0x129   : > { %1166 = vst.msk [vmem:[#allocation3 + $0x3] sm:$0x1] %vm1075_vm5, %v1165_v35 }
 0x130   : > { %v1167_v36 = vld [vmem:[#allocation3] sm:$0xf] }
 0x131   : > { %1264 = vrot.lane.b32.xlu0 %v1167_v36, %s2300_s2  ;;  %2037 = vmatmul.mubr.msk.f32.vlgmr.msra.gmra.mrb[4].mxu0 %vm1179_vm6, %v1167_v36 }
 0x132   : > { %2080 = vmatprep.mubr.msk.f32.mxu0 %vm2298_vm1, %v2299_v4 }
 0x1a3   : > { %v1265_v37 = vpop.permute.xlu0 %1264 }
 0x1a4   : > { %2048 = vmatmul.mubr.msk.f32.vlgmr.msra.gmra.mrb[4].mxu1 %vm1179_vm6, %v1265_v37 }
 0x1a5   : > { %2056 = vmatprep.mubr.msk.f32.mxu1 %vm2298_vm1, %v2299_v4  ;;  %2139 = vmatpush3.bf16.msra.mxu1 %v2138_v33 }
 0x1a6   : > { %2054 = vmatprep.subr.mxu1 %v2299_v4 }
 0x204   : > { %v1249_v39 = vpop.f32.mrb[4].mxu0 }
 0x205   : > { %v2611_v40 = vadd.f32 %v1933_v38, %v1249_v39  ;;  %v2038_v41 = vpop.f32.mrb[5].mxu0  ;;  %v1430_v38 = vld [vmem:[%s2851_s14 + $0x10] sm:$0xff] }
 0x206   : > { %2055 = vmatpush3.msra.mxu1 %v1430_v38 }
 0x207   : > { %v1339_v42 = vsel %vm1338_vm7, %v2611_v40, 0.0  ;;  %2140 = vmatprep.subr.bf16.mxu1 %v2297_v2 }
 0x208   : > { %v1340_v43 = vrot.slane %v1339_v42, 4 }
 0x20a   : > { %v1341_v24 = vadd.f32 %v1340_v43, %v1339_v42  ;;  %v1580_v42 = vld [vmem:[%s2808_s16] sm:$0xff]  ;;  %v1581_v43 = vld [vmem:[%s2808_s16 + $0x8] sm:$0xff] }
 0x20c   : > { %v1342_v44 = vrot.slane %v1341_v24, 2 }
 0x20e   : > { %v1343_v45 = vadd.f32 %v1342_v44, %v1341_v24  ;;  %v2144_v24 = vpack.c.bf16 %v1581_v43, %v1580_v42 }
 0x210   : > { %v1344_v46 = vrot.slane %v1343_v45, 1  ;;  %2145 = vmatpush3.bf16.msra.mxu0 %v2144_v24 }
 0x211   : > { %2146 = vmatprep.subr.bf16.mxu0 %v2297_v2 }
 0x212   : > { %v1345_v48 = vadd.f32 %v1344_v46, %v1343_v45 }
 0x214   : > { %v1347_v47 = vmul.f32 0.25, %v1345_v48  ;;  %v1421_v48 = vld [vmem:[%s2803_s11] sm:$0x1] }
 0x216   : > { %v1357_v49 = vsel %vm1356_vm8, %v1347_v47, 0.0 }
 0x217   : > { %1358 = vadd.xlane.f32.xlu0 %v1357_v49  ;;  %v1425_v49 = vld [vmem:[%s2805_s13] sm:$0xff] }
 0x277   : > { %v1334_v51 = vpop.f32.mrb[4].mxu1 }
 0x278   : > { %v2619_v52 = vadd.f32 %v1935_v50, %v1334_v51  ;;  %v2049_v53 = vpop.f32.mrb[5].mxu1  ;;  %v1426_v50 = vld [vmem:[%s2805_s13 + $0x8] sm:$0xff]  ;;  %v1423_v51 = vld [vmem:[%s2804_s12] sm:$0x1] }
 0x27a   : > { %v1348_v54 = vsel %vm1338_vm7, %v2619_v52, 0.0 }
 0x27b   : > { %v1349_v55 = vrot.slane %v1348_v54, 4 }
 0x27d   : > { %v1350_v58 = vadd.f32 %v1349_v55, %v1348_v54  ;;  %v1416_v55 = vld [vmem:[%s2801_s9] sm:$0x1] }
 0x27f   : > { %v1351_v59 = vrot.slane %v1350_v58, 2 }
 0x281   : > { %v1352_v60 = vadd.f32 %v1351_v59, %v1350_v58  ;;  %v2141_v58 = vpack.c.bf16 %v1426_v50, %v1425_v49 }
 0x283   : > { %v1353_v61 = vrot.slane %v1352_v60, 1 }
 0x285   : > { %v1354_v62 = vadd.f32 %v1353_v61, %v1352_v60  ;;  %v1418_v61 = vld [vmem:[%s2802_s10] sm:$0x1] }
 0x287   : > { %v1355_v56 = vmul.f32 0.25, %v1354_v62  ;;  %v1427_v62 = vld [vmem:[%s2805_s13 + $0x10] sm:$0xff] }
 0x289   : > { %v1367_v63 = vsel %vm1356_vm8, %v1355_v56, 0.0 }
 0x28a   : > { %1368 = vadd.xlane.f32.xlu1 %v1367_v63  ;;  %v1582_v63 = vld [vmem:[%s2808_s16 + $0x10] sm:$0xff] }
 0x2a4   : > { %v1359_v0 = vpop.xlane.xlu0 %1358 }
 0x2a5   : > { %v1360_v1 = vrot.slane %v1359_v0, 4 }
 0x2a7   : > { %v1361_v3 = vadd.f32 %v1360_v1, %v1359_v0  ;;  %v1583_v0 = vld [vmem:[%s2808_s16 + $0x18] sm:$0xff] }
 0x2a8   : > { %v2147_v1 = vpack.c.bf16 %v1583_v0, %v1582_v63 }
 0x2a9   : > { %v1362_v5 = vrot.slane %v1361_v3, 2 }
 0x2aa   : > { %2148 = vmatpush3.bf16.msra.mxu0 %v2147_v1 }
 0x2ab   : > { %v1363_v6 = vadd.f32 %v1362_v5, %v1361_v3  ;;  %2149 = vmatprep.subr.bf16.mxu0 %v2297_v2  ;;  %v1584_v3 = vld [vmem:[%s2808_s16 + $0x20] sm:$0xff]  ;;  %v1585_v5 = vld [vmem:[%s2808_s16 + $0x28] sm:$0xff] }
 0x2ad   : > { %v1364_v7 = vrot.slane %v1363_v6, 1 }
 0x2af   : > { %v1365_v8 = vadd.f32 %v1364_v7, %v1363_v6  ;;  %v2150_v6 = vpack.c.bf16 %v1585_v5, %v1584_v3  ;;  %v1661_v7 = vld [vmem:[%s2810_s18] sm:$0xff] }
 0x2b1   : > { %2170 = vpush %v1365_v8  ;;  %2151 = vmatpush3.bf16.msra.mxu0 %v2150_v6  ;;  %v1662_v8 = vld [vmem:[%s2810_s18 + $0x8] sm:$0xff] }
 0x2b2   : > { %2161 = vmatprep.subr.bf16.mxu0 %v2297_v2 }
 0x2e2   : > { %s2171_s27 = spop %2170 }
 0x317   : > { %v1369_v9 = vpop.xlane.xlu1 %1368 }
 0x318   : > { %v1370_v10 = vrot.slane %v1369_v9, 4 }
 0x31a   : > { %v1371_v11 = vadd.f32 %v1370_v10, %v1369_v9  ;;  %v2153_v9 = vpack.c.bf16 %v1662_v8, %v1661_v7  ;;  %v1663_v10 = vld [vmem:[%s2810_s18 + $0x10] sm:$0xff] }
 0x31c   : > { %v1372_v12 = vrot.slane %v1371_v11, 2 }
 0x31e   : > { %v1373_v13 = vadd.f32 %v1372_v12, %v1371_v11  ;;  %v1664_v11 = vld [vmem:[%s2810_s18 + $0x18] sm:$0xff] }
 0x31f   : > { %v2156_v12 = vpack.c.bf16 %v1664_v11, %v1663_v10 }
 0x320   : > { %v1374_v57 = vrot.slane %v1373_v13, 1 }
 0x322   : > { %v1375_v14 = vadd.f32 %v1374_v57, %v1373_v13 }
 0x324   : > { %2172 = vpush %v1375_v14  ;;  %v1747_v14 = vld [vmem:[%s2812_s20] sm:$0xff] }
 0x355   : > { %s2173_s5 = spop %2172 }
 0x356   : > { %s1377_s2 = sadd.f32 %s2173_s5, %s2171_s27 }
 0x358   : > { %s1380_s0 = smul.f32 0.020833334, %s1377_s2 }
 0x35a   : > { %v1381_v15 = vstv %s1380_s0 }
 0x35b   : > { %v1382_v16 = vsub.f32 %v1347_v47, %v1381_v15  ;;  %v1394_v17 = vsub.f32 %v1355_v56, %v1381_v15  ;;  %v1748_v15 = vld [vmem:[%s2812_s20 + $0x8] sm:$0xff] }
 0x35d   : > { %v1383_v18 = vmul.f32 %v1382_v16, %v1382_v16  ;;  %v1395_v20 = vmul.f32 %v1394_v17, %v1394_v17 }
 0x35f   : > { %v1384_v19 = vsel %vm1356_vm8, %v1383_v18, 0.0  ;;  %v1396_v21 = vsel %vm1356_vm8, %v1395_v20, 0.0  ;;  %v2162_v20 = vpack.c.bf16 %v1748_v15, %v1747_v14 }
 0x360   : > { %1385 = vadd.xlane.f32.xlu1 %v1384_v19 }
 0x364   : > { %1397 = vadd.xlane.f32.xlu1 %v1396_v21 }
 0x3ed   : > { %v1386_v22 = vpop.xlane.xlu1 %1385 }
 0x3ee   : > { %v1387_v23 = vrot.slane %v1386_v22, 4 }
 0x3f0   : > { %v1388_v25 = vadd.f32 %v1387_v23, %v1386_v22  ;;  %v1749_v22 = vld [vmem:[%s2812_s20 + $0x10] sm:$0xff]  ;;  %v1750_v23 = vld [vmem:[%s2812_s20 + $0x18] sm:$0xff] }
 0x3f1   : > { %v1398_v26 = vpop.xlane.xlu1 %1397 }
 0x3f2   : > { %v1389_v27 = vrot.slane %v1388_v25, 2  ;;  %v1399_v28 = vrot.slane %v1398_v26, 4 }
 0x3f4   : > { %v1400_v29 = vadd.f32 %v1399_v28, %v1398_v26  ;;  %v1390_v30 = vadd.f32 %v1389_v27, %v1388_v25  ;;  %v2165_v25 = vpack.c.bf16 %v1750_v23, %v1749_v22  ;;  %v1665_v26 = vld [vmem:[%s2810_s18 + $0x20] sm:$0xff]  ;;  %v1666_v27 = vld [vmem:[%s2810_s18 + $0x28] sm:$0xff] }
 0x3f5   : > { %v1751_v28 = vld [vmem:[%s2812_s20 + $0x20] sm:$0xff] }
 0x3f6   : > { %v1401_v34 = vrot.slane %v1400_v29, 2  ;;  %v1391_v35 = vrot.slane %v1390_v30, 1 }
 0x3f8   : > { %v1402_v36 = vadd.f32 %v1401_v34, %v1400_v29  ;;  %v1392_v37 = vadd.f32 %v1391_v35, %v1390_v30  ;;  %v2159_v29 = vpack.c.bf16 %v1666_v27, %v1665_v26  ;;  %v1667_v34 = vld [vmem:[%s2811_s19] sm:$0x1] }
 0x3f9   : > { %v1753_v35 = vld [vmem:[%s2813_s21] sm:$0x1] }
 0x3fa   : > { %2174 = vpush %v1392_v37  ;;  %v1403_v39 = vrot.slane %v1402_v36, 1 }
 0x3fc   : > { %v1404_v41 = vadd.f32 %v1403_v39, %v1402_v36 }
 0x3fe   : > { %2176 = vpush %v1404_v41 }
 0x42b   : > { %s2175_s29 = spop %2174 }
 0x42f   : > { %s2177_s23 = spop %2176 }
 0x430   : > { %s1406_s27 = sadd.f32 %s2177_s23, %s2175_s29  ;;  %s674_s29 = sand.u32 1, %s2287_s28  }
 0x431   : > { %s1843_s2 = scalar_lea.sflag [#allocation5], %s674_s29 }
 0x432   : > { %s1409_s5 = smul.f32 0.020833334, %s1406_s27 }
 0x434   : > { %s1410_s1 = sadd.f32 1e-05, %s1409_s5 }
 0x436   : > { %v1411_v44 = vstv %s1410_s1  ;;  %s1919_s1 = sshll.u32 %s674_s29, 2 }
 0x437   : > { %2223 = vrsqrt.f32 %v1411_v44  ;;  %s676_s23 = scalar_lea.vmem [#allocation4], %s1919_s1 }
 0x438   : > { %s1856_s27 = sshll.u32 %s676_s23, 4  ;;  %s2751_s27 = int_to_ptr.vmem [resolvable:$true] %s1856_s27 }
 0x439   : > { %s2233_s0 = scalar_lea.vmem %s2751_s27, 64 }
 0x43a   : > { %p2234_p11 = scmp.ne.s32.totalorder %s2751_s27, %s2233_s0 }
 0x43c   : > { %p2235_p12 = pnand %p2234_p11, %p2455_p5 }
 0x43e   : > { %p2236_p13 = pneg %p2235_p12 }
 0x441   : > { %v2224_v45 = vpop.eup %2223 }
 0x442   : > { %2178 = vpush %v2224_v45 }
 0x473   : > { %s2179_s7 = spop %2178 }
 0x474   : > { %v1414_v46 = vstv %s2179_s7  ;;  %s1945_s7 = sshll.u32 %s2438_s4, 6  ;;  %s2301_s4 = smov [#allocation4]  }
 0x475   : > { %v1420_v47 = vmul.f32 %v1414_v46, %v1394_v17  ;;  %v1415_v53 = vmul.f32 %v1414_v46, %v1382_v16  ;;  %v1578_v17 = vld [vmem:[%s2807_s15] sm:$0x1]  ;;  %s2749_s14 = scalar_lea.hbm %s2814_s22, %s1945_s7  ;;  %s2237_s25 = sshll.u32 %s2301_s4, 4  ;;  %s2238_s25 = int_to_ptr.vmem [resolvable:$false] %s2237_s25 }
 0x476   : > { %s2239_s26 = scalar_lea.vmem %s2238_s25, 128  ;;  %p2240_p0 = scmp.lt.s32.totalorder %s2751_s27, %s2238_s25 }
 0x477   : > { %v1422_v54 = vmul.f32 %v1421_v48, %v1420_v47  ;;  %v1417_v60 = vmul.f32 %v1416_v55, %v1415_v53  ;;  %v1830_v47 = vlaneseq  ;;  %p2241_p1 = scmp.lt.s32.totalorder %s2239_s26, %s2233_s0 }
 0x479   : > { %v1424_v59 = vadd.f32 %v1423_v51, %v1422_v54  ;;  %v1419_v56 = vadd.f32 %v1418_v61, %v1417_v60  ;;  %v1831_v49 = vshrl.u32 %v1830_v47, 7  ;;  %p2242_p2 = por %p2241_p1, %p2240_p0 }
 0x47b   : > { %2057 = vmatmul.mubr.msk.f32.vlgmr.msra.gmra.mrb[6].mxu1 %vm1431_vm9, %v1424_v59  ;;  %v1832_v50 = vsub.s32 0, %v1831_v49  ;;  %p2243_p3 = pnand %p2242_p2, %p2236_p13 }
 0x47c   : > { %2142 = vmatpush3.bf16.msra.mxu1 %v2141_v58  ;;  %2065 = vmatprep.mubr.msk.f32.mxu1 %vm2298_vm1, %v2299_v4 }
 0x47d   : > { %2063 = vmatprep.subr.mxu1 %v2299_v4 }
 0x480   : > { %2064 = vmatpush3.msra.mxu1 %v1427_v62 }
 0x481   : > { %2066 = vmatmul.mubr.msk.f32.vlgmr.msra.gmra.mrb[8].mxu1 %vm1431_vm9, %v1419_v56  ;;  %2152 = vmatprep.subr.bf16.mxu1 %v2297_v2 }
 0x482   : > { %2095 = vmatprep.mubr.msk.f32.mxu1 %vm2298_vm1, %v2299_v4  ;;  %2154 = vmatpush3.bf16.msra.mxu1 %v2153_v9 }
 0x483   : > { %2155 = vmatprep.subr.bf16.mxu1 %v2297_v2 }
 0x486   : > { %2157 = vmatpush3.bf16.msra.mxu1 %v2156_v12 }
 0x487   : > { %2158 = vmatprep.subr.bf16.mxu1 %v2297_v2 }
 0x48a   : > { %2160 = vmatpush3.bf16.msra.mxu1 %v2159_v29 }
 0x54e   : > { %v1501_v13 = vpop.f32.mrb[6].mxu1 }
 0x54f   : > { %v2058_v57 = vpop.f32.mrb[7].mxu1 }
 0x554   : > { %v1574_v16 = vpop.f32.mrb[8].mxu1 }
 0x555   : > { %v1575_v18 = vadd.f32 %v1574_v16, %v1501_v13  ;;  %v2067_v19 = vpop.f32.mrb[9].mxu1 }
 0x557   : > { %v1579_v21 = vadd.f32 %v1578_v17, %v1575_v18 }
 0x559   : > { %2081 = vmatmul.mubr.msk.f32.vlgmr.msra.gmra.mrb[6].mxu0 %vm1587_vm10, %v1579_v21 }
 0x55a   : > { %2163 = vmatpush3.bf16.msra.mxu0 %v2162_v20  ;;  %2110 = vmatprep.mubr.msk.f32.mxu0 %vm2298_vm1, %v2299_v4  ;;  %v1752_v4 = vld [vmem:[%s2812_s20 + $0x28] sm:$0xff] }
 0x55b   : > { %2164 = vmatprep.subr.bf16.mxu0 %v2297_v2  ;;  %v2168_v30 = vpack.c.bf16 %v1752_v4, %v1751_v28 }
 0x55e   : > { %2166 = vmatpush3.bf16.msra.mxu0 %v2165_v25 }
 0x55f   : > { %2167 = vmatprep.subr.bf16.mxu0 %v2297_v2  ;;  %v1586_v2 = vld [vmem:[%s2809_s17] sm:$0x1] }
 0x562   : > { %2169 = vmatpush3.bf16.msra.mxu0 %v2168_v30 }
 0x62c   : > { %v1657_v31 = vpop.f32.mrb[6].mxu0 }
 0x62d   : > { %v1658_v32 = vadd.f32 %v1657_v31, %v1586_v2  ;;  %v2082_v33 = vpop.f32.mrb[7].mxu0 }
 0x62f   : > { %2096 = vmatmul.mubr.msk.f32.vlgmr.msra.gmra.mrb[10].mxu1 %vm1587_vm10, %v1658_v32  ;;  %2111 = vmatmul.mubr.msk.f32.vlgmr.msra.gmra.mrb[8].mxu0 %vm1587_vm10, %v1658_v32 }
 0x702   : > { %v1737_v36 = vpop.f32.mrb[10].mxu1  ;;  %v1820_v37 = vpop.f32.mrb[8].mxu0 }
 0x703   : > { %v1738_v38 = vadd.f32 %v1737_v36, %v1667_v34  ;;  %v1821_v39 = vadd.f32 %v1820_v37, %v1753_v35  ;;  %v2097_v41 = vpop.f32.mrb[11].mxu1  ;;  %v2112_v42 = vpop.f32.mrb[9].mxu0 }
 0x705   : > { %v1941_v43 = vmul.f32 -1.442695, %v1738_v38  ;;  %v1943_v24 = vmul.f32 -1.442695, %v1821_v39 }
 0x707   : > { %2225 = vpow2.f32 %v1941_v43 }
 0x708   : > { %2227 = vpow2.f32 %v1943_v24 }
 0x711   : > { %v2226_v44 = vpop.eup %2225 }
 0x712   : > { %v2228_v45 = vpop.eup %2227  ;;  %v1744_v46 = vadd.f32 1.0, %v2226_v44 }
 0x713   : > { %v1827_v48 = vadd.f32 1.0, %v2228_v45 }
 0x714   : > { %2229 = vrcp.f32 %v1744_v46 }
 0x715   : > { %2231 = vrcp.f32 %v1827_v48 }
 0x71e   : > { %v2230_v51 = vpop.eup %2229 }
 0x71f   : > { %v2232_v53 = vpop.eup %2231  ;;  %v1833_v54 = vrot.slane %v2230_v51, %v1832_v50 }
 0x720   : > { %v1838_v55 = vrot.slane %v2232_v53, %v1832_v50 }
 0x721   : > { %v1834_v58 = vmul.f32 %v1833_v54, %v2611_v40 }
 0x722   : > { %v1839_v59 = vmul.f32 %v1838_v55, %v2619_v52 }
 0x724   : > { %v1840_v60 = vadd.f32 %v1839_v59, %v1834_v58 }
 0x726   : > { %1841 = vst.msk [vmem:[%s676_s23] sm:$0xf] %vm1338_vm7, %v1840_v60 }
 0x727   : > { %2246 = shalt.err (!%p2243_p3)
}
 0x728   : > { %s2247_s29 = scalar_lea.hbm %s2749_s14, 64  ;;  %s2251_s23 = scalar_lea.hbm %s2814_s22, 128 }
 0x729   : > { %p2248_p4 = scmp.ne.s32.totalorder %s2749_s14, %s2247_s29  ;;  %p2252_p9 = scmp.lt.u32.totalorder %s2749_s14, %s2814_s22 }
 0x72a   : > { %p2253_p10 = scmp.lt.u32.totalorder %s2251_s23, %s2247_s29  ;;  %p2255_p12 = scmp.lt.u32.totalorder %s2247_s29, %s2749_s14 }
 0x72b   : > { %p2249_p7 = pnand %p2248_p4, %p2455_p5 }
 0x72c   : > { %p2254_p11 = por %p2253_p10, %p2252_p9 }
 0x72d   : > { %p2250_p8 = pneg %p2249_p7 }
 0x72e   : > { %p2256_p13 = por %p2255_p12, %p2254_p11 }
 0x730   : > { %p2257_p0 = pnand %p2256_p13, %p2250_p8 }
 0x732   : > { %2260 = shalt.err (!%p2257_p0)
}
 0x733   : > { %2180 = dma.vmem_to_hbm [thread:$0]  (%p2455_p5), %s2751_s27, 64, %s2749_s14, %s1843_s2  }
 0x734 PF: > { %p2186_p1 = scmp.ge.s32.totalorder %s2295_s30, 2  ;;  %s1868_s4 = sand.u32 1, %s2283_s3  }
 0x735   : > { %s1869_s25 = scalar_lea.sflag [#allocation5], %s1868_s4 }
 0x736   : > { %p2183_p2 = pnand %p2186_p1, %p2459_p6 }
 0x738   : > { %2278 = dma.done.wait (!%p2183_p2), %s1869_s25, 64  }
 0x739   : > { %2280 = vsyncadd (!%p2183_p2), %s1869_s25, 4294967232  ;;  %s2853_s30 = sld [smem:[#allocation8_spill]]  ;;  %s2854_s26 = sld [smem:[#allocation7_spill]] }
 0x73a   : > { %s2855_s29 = sld [smem:[#allocation9_spill]]  ;;  %s2856_s3 = smov %s2287_s28 }
 0x73f   : > { %p32_p3 = scmp.ge.s32.totalorder %s2853_s30, 4   ;;  %s2857_s28 = smov %s2854_s26 }
 0x741   :  { %34 = sbr.rel (!%p32_p3) target bundleno = 14 (0xe), region = 150 }
 0x748   :  { %1874 = vsyncpa [#allocation5], 1 }
 0x749   :  { %1876 = vsyncpa [#allocation5 + $0x1], 1 }

// kernel: _lambda_.8
= control target key start
LH: loop header
LB: loop body
LE: loop exit
PB: predicated region body
PF: predicated region fallthrough
CT: control target
= control target key end

     0   :  { %s5090_s0 = inlined_call_operand.vmem [shape: f32[2,6,6,16], index: 0, kind: input, shape index: {}]   ;;  %s5091_s1 = inlined_call_operand.vmem [shape: f32[9,2,16], index: 1, kind: input, shape index: {}]   ;;  %s5092_s2 = inlined_call_operand.vmem [shape: f32[2,16], index: 2, kind: input, shape index: {}]   ;;  %s5093_s3 = inlined_call_operand.vmem [shape: f32[16,32], index: 3, kind: input, shape index: {}]   ;;  %s5094_s4 = inlined_call_operand.hbm [shape: f32[1,32], index: 4, kind: input, shape index: {}]   ;;  %s5095_s5 = inlined_call_operand.vmem [shape: f32[16,32], index: 5, kind: input, shape index: {}]   ;;  %s5096_s6 = inlined_call_operand.hbm [shape: f32[1,32], index: 6, kind: input, shape index: {}]   ;;  %s5097_s7 = inlined_call_operand.vmem [shape: f32[5,5,64], index: 7, kind: input, shape index: {}]   ;;  %s5098_s8 = inlined_call_operand.hbm [shape: f32[1,64], index: 8, kind: input, shape index: {}]   ;;  %s5099_s9 = inlined_call_operand.vmem [shape: f32[32,16], index: 9, kind: input, shape index: {}]   ;;  %s5100_s10 = inlined_call_operand.hbm [shape: f32[1,16], index: 10, kind: input, shape index: {}]   ;;  %s5101_s11 = inlined_call_operand.vmem [shape: f32[32,16], index: 11, kind: input, shape index: {}]   ;;  %s5102_s12 = inlined_call_operand.hbm [shape: f32[1,16], index: 12, kind: input, shape index: {}]   ;;  %s5103_s13 = inlined_call_operand.hbm [shape: f32[1,16], index: 13, kind: input, shape index: {}]   ;;  %s5104_s14 = inlined_call_operand.hbm [shape: f32[1,16], index: 14, kind: input, shape index: {}]   ;;  %s5105_s15 = inlined_call_operand.vmem [shape: f32[1,16], index: 15, kind: input, shape index: {}]   ;;  %s5106_s16 = inlined_call_operand.vmem [shape: f32[1,16], index: 16, kind: input, shape index: {}]   ;;  %s5107_s17 = inlined_call_operand.vmem [shape: f32[16,32], index: 17, kind: input, shape index: {}]   ;;  %s5108_s18 = inlined_call_operand.vmem [shape: f32[16,32], index: 18, kind: input, shape index: {}]   ;;  %s5109_s19 = inlined_call_operand.vmem [shape: f32[1,32], index: 19, kind: input, shape index: {}]   ;;  %s5110_s20 = inlined_call_operand.vmem [shape: f32[32,32], index: 20, kind: input, shape index: {}]   ;;  %s5111_s21 = inlined_call_operand.vmem [shape: f32[1,32], index: 21, kind: input, shape index: {}]   ;;  %s5112_s22 = inlined_call_operand.vmem [shape: f32[32,16], index: 22, kind: input, shape index: {}]   ;;  %s5113_s23 = inlined_call_operand.vmem [shape: f32[1,16], index: 23, kind: input, shape index: {}]   ;;  %s5114_s24 = inlined_call_operand.vmem [shape: f32[32,16], index: 24, kind: input, shape index: {}]   ;;  %s5115_s25 = inlined_call_operand.vmem [shape: f32[1,16], index: 25, kind: input, shape index: {}]   ;;  %s5116_s26 = inlined_call_operand.vmem [shape: f32[2,16,16], index: 26, kind: input, shape index: {}]   ;;  %s5117_s27 = inlined_call_operand.vmem [shape: f32[2,16,16], index: 27, kind: output, shape index: {}]  }
   0x1   :  { %5147 = sst [smem:[#allocation26_spill]] %s5090_s0 }
   0x2   :  { %5148 = sst [smem:[#allocation27_spill]] %s5091_s1 }
   0x3   :  { %5149 = sst [smem:[#allocation28_spill]] %s5092_s2 }
   0x4   :  { %5150 = sst [smem:[#allocation29_spill]] %s5093_s3 }
   0x5   :  { %5151 = sst [smem:[#allocation30_spill]] %s5094_s4 }
   0x6   :  { %5152 = sst [smem:[#allocation31_spill]] %s5095_s5 }
   0x7   :  { %5153 = sst [smem:[#allocation32_spill]] %s5096_s6 }
   0x8   :  { %5154 = sst [smem:[#allocation33_spill]] %s5097_s7 }
   0x9   :  { %5155 = sst [smem:[#allocation34_spill]] %s5098_s8 }
   0xa   :  { %5156 = sst [smem:[#allocation35_spill]] %s5099_s9 }
   0xb   :  { %5157 = sst [smem:[#allocation36_spill]] %s5100_s10 }
   0xc   :  { %5158 = sst [smem:[#allocation37_spill]] %s5101_s11 }
   0xd   :  { %5159 = sst [smem:[#allocation38_spill]] %s5113_s23 }
   0xe   :  { %5160 = sst [smem:[#allocation39_spill]] %s5115_s25 }
   0xf   :  { %5161 = sst [smem:[#allocation40_spill]] %s5116_s26 }
  0x10   :  { %5162 = sst [smem:[#allocation41_spill]] %s5117_s27 }
  0x11   :  { %32 = vsyncpa [#allocation5], 0 }
  0x12   :  { %33 = vsyncpa [#allocation7], 0 }
  0x13   :  { %34 = vsyncpa [#allocation10], 0 }
  0x14   :  { %35 = vsyncpa [#allocation13], 0  ;;  %s4077_s7 = smov 0  }
  0x15 LB: > { %5163 = sst [smem:[#allocation19_spill]] %s3923_s7  ;;  %s3925_s4 = smov [#allocation6]   ;;  %s3923_s7 = sphi %s4077_s7, %s41_s7  }
  0x16   : > { %s685_s8 = sshll.u32 %s3925_s4, 4  ;;  %s4083_s30 = sadd.s32 4294967295, %s3923_s7   ;;  %s4088_s8 = int_to_ptr.vmem [resolvable:$true] %s685_s8 }
  0x17   : > { %p3193_p0 = scmp.ge.s32.totalorder %s3923_s7, 1  ;;  %p649_p1 = scmp.lt.s32.totalorder %s3923_s7, 3 }
  0x18   : > { %p5132_p2 = scmp.eq.s32.totalorder %s4083_s30, 0  ;;  %s3926_s5 = smov [#allocation9]  }
  0x19   : > { %p4090_p3 = pnand %p3193_p0, %p649_p1  ;;  %s713_s28 = sshll.u32 %s3926_s5, 4  ;;  %s4096_s28 = int_to_ptr.vmem [resolvable:$true] %s713_s28 }
  0x1a   : > { %s3927_s0 = smov [#allocation12]   ;;  %s3928_s1 = smov [#allocation4]  }
  0x1b   : > { %s5164_s9 = scalar_select %p4090_p3, 1, 0 }
  0x1c   : > { %p3639_p4 = pneg %p4090_p3  ;;  %s738_s10 = sshll.u32 %s3927_s0, 4  ;;  %s4104_s10 = int_to_ptr.vmem [resolvable:$true] %s738_s10 }
  0x1d   : > { %s671_s6 = sshll.u32 %s3928_s1, 4  ;;  %s5166_s3 = sld [smem:[#allocation32_spill]]  ;;  %s4106_s6 = int_to_ptr.vmem [resolvable:$true] %s671_s6 }
  0x1e   : > { %p4100_p5 = pnand %p5132_p2, %p3639_p4 }
  0x20   : > { %p4116_p7 = pneg %p4100_p5 }
  0x23   : > { %s3705_s4 = scalar_lea.hbm %s5166_s3, 16 }
  0x24   : > { %p3706_p6 = scmp.ne.s32.totalorder %s5166_s3, %s3705_s4  ;;  %p3712_p10 = scmp.lt.u32.totalorder %s3705_s4, %s5166_s3 }
  0x26   : > { %p3708_p8 = pnand %p4116_p7, %p3706_p6 }
  0x28   : > { %p3709_p9 = pneg %p3708_p8 }
  0x2a   : > { %p3714_p11 = pnand %p3712_p10, %p3709_p9 }
  0x2c   : > { %3717 = shalt.err (!%p3714_p11)
}
  0x2d   : > { %s3718_s7 = scalar_lea.vmem %s4088_s8, 16  ;;  %s3725_s11 = scalar_lea.vmem %s4088_s8, 32 }
  0x2e   : > { %p3719_p12 = scmp.ne.s32.totalorder %s4088_s8, %s3718_s7  ;;  %p3726_p1 = scmp.lt.s32.totalorder %s4088_s8, %s4088_s8 }
  0x2f   : > { %p3727_p4 = scmp.lt.s32.totalorder %s3725_s11, %s3718_s7 }
  0x30   : > { %p3721_p13 = pnand %p3719_p12, %p4116_p7 }
  0x31   : > { %p3728_p6 = por %p3727_p4, %p3726_p1 }
  0x32   : > { %p3722_p0 = pneg %p3721_p13 }
  0x34   : > { %p3729_p8 = pnand %p3728_p6, %p3722_p0 }
  0x36   : > { %3732 = shalt.err (!%p3729_p8)
}
  0x37   : > { %3645 = dma.hbm_to_vmem [thread:$0]  (!%p4100_p5), %s5166_s3, 16, %s4088_s8, [#allocation7]  }
  0x38   : > { %s5168_s1 = sld [smem:[#allocation36_spill]] }
  0x3e   : > { %s3733_s26 = scalar_lea.hbm %s5168_s1, 16 }
  0x3f   : > { %p3734_p9 = scmp.ne.s32.totalorder %s5168_s1, %s3733_s26  ;;  %p3740_p12 = scmp.lt.u32.totalorder %s3733_s26, %s5168_s1 }
  0x41   : > { %p3736_p10 = pnand %p3734_p9, %p4116_p7 }
  0x43   : > { %p3737_p11 = pneg %p3736_p10 }
  0x45   : > { %p3742_p13 = pnand %p3740_p12, %p3737_p11 }
  0x47   : > { %3745 = shalt.err (!%p3742_p13)
}
  0x48   : > { %s3746_s8 = scalar_lea.vmem %s4096_s28, 16  ;;  %s3753_s23 = scalar_lea.vmem %s4096_s28, 32 }
  0x49   : > { %p3747_p0 = scmp.ne.s32.totalorder %s4096_s28, %s3746_s8  ;;  %p3754_p6 = scmp.lt.s32.totalorder %s4096_s28, %s4096_s28 }
  0x4a   : > { %p3755_p8 = scmp.lt.s32.totalorder %s3753_s23, %s3746_s8 }
  0x4b   : > { %p3749_p1 = pnand %p3747_p0, %p4116_p7 }
  0x4c   : > { %p3756_p9 = por %p3755_p8, %p3754_p6 }
  0x4d   : > { %p3750_p4 = pneg %p3749_p1 }
  0x4f   : > { %p3757_p10 = pnand %p3756_p9, %p3750_p4 }
  0x51   : > { %3760 = shalt.err (!%p3757_p10)
}
  0x52   : > { %3651 = dma.hbm_to_vmem [thread:$0]  (!%p4100_p5), %s5168_s1, 16, %s4096_s28, [#allocation10]  }
  0x53   : > { %s3761_s4 = scalar_lea.hbm %s5103_s13, 16 }
  0x54   : > { %p3762_p11 = scmp.ne.s32.totalorder %s5103_s13, %s3761_s4  ;;  %p3768_p0 = scmp.lt.u32.totalorder %s3761_s4, %s5103_s13 }
  0x56   : > { %p3764_p12 = pnand %p3762_p11, %p4116_p7 }
  0x58   : > { %p3765_p13 = pneg %p3764_p12 }
  0x5a   : > { %p3770_p1 = pnand %p3768_p0, %p3765_p13 }
  0x5c   : > { %3773 = shalt.err (!%p3770_p1)
}
  0x5d   : > { %s3774_s28 = scalar_lea.vmem %s4104_s10, 16  ;;  %s3781_s23 = scalar_lea.vmem %s4104_s10, 32 }
  0x5e   : > { %p3775_p4 = scmp.ne.s32.totalorder %s4104_s10, %s3774_s28  ;;  %p3782_p9 = scmp.lt.s32.totalorder %s4104_s10, %s4104_s10 }
  0x5f   : > { %p3783_p10 = scmp.lt.s32.totalorder %s3781_s23, %s3774_s28 }
  0x60   : > { %p3777_p6 = pnand %p3775_p4, %p4116_p7 }
  0x61   : > { %p3784_p11 = por %p3783_p10, %p3782_p9 }
  0x62   : > { %p3778_p8 = pneg %p3777_p6 }
  0x64   : > { %p3785_p12 = pnand %p3784_p11, %p3778_p8 }
  0x66   : > { %3788 = shalt.err (!%p3785_p12)
}
  0x67   : > { %3657 = dma.hbm_to_vmem [thread:$0]  (!%p4100_p5), %s5103_s13, 16, %s4104_s10, [#allocation13]  }
  0x68   : > { %s5169_s4 = sld [smem:[#allocation30_spill]] }
  0x6e   : > { %s3789_s5 = scalar_lea.hbm %s5169_s4, 16 }
  0x6f   : > { %p3790_p13 = scmp.ne.s32.totalorder %s5169_s4, %s3789_s5  ;;  %p3796_p4 = scmp.lt.u32.totalorder %s3789_s5, %s5169_s4 }
  0x71   : > { %p3792_p0 = pnand %p3790_p13, %p4116_p7 }
  0x73   : > { %p3793_p1 = pneg %p3792_p0 }
  0x75   : > { %p3798_p6 = pnand %p3796_p4, %p3793_p1 }
  0x77   : > { %3801 = shalt.err (!%p3798_p6)
}
  0x78   : > { %s3802_s10 = scalar_lea.vmem %s4106_s6, 16  ;;  %s3809_s23 = scalar_lea.vmem %s4106_s6, 32 }
  0x79   : > { %p3803_p8 = scmp.ne.s32.totalorder %s4106_s6, %s3802_s10  ;;  %p3810_p11 = scmp.lt.s32.totalorder %s4106_s6, %s4106_s6 }
  0x7a   : > { %p3811_p12 = scmp.lt.s32.totalorder %s3809_s23, %s3802_s10 }
  0x7b   : > { %p3805_p9 = pnand %p3803_p8, %p4116_p7 }
  0x7c   : > { %p3812_p13 = por %p3811_p12, %p3810_p11 }
  0x7d   : > { %p3806_p10 = pneg %p3805_p9 }
  0x7f   : > { %p3813_p0 = pnand %p3812_p13, %p3806_p10 }
  0x81   : > { %3816 = shalt.err (!%p3813_p0)
}
  0x82   : > { %3642 = dma.hbm_to_vmem [thread:$0]  (!%p4100_p5), %s5169_s4, 16, %s4106_s6, [#allocation5]  }
  0x83   : > { %s3929_s27 = smov [#allocation8]   ;;  %s3930_s5 = smov [#allocation11]  }
  0x84   : > { %s699_s2 = sshll.u32 %s3929_s27, 4  ;;  %s727_s7 = sshll.u32 %s3930_s5, 4  ;;  %s700_s2 = int_to_ptr.vmem [resolvable:$true] %s699_s2  ;;  %s728_s7 = int_to_ptr.vmem [resolvable:$true] %s727_s7 }
  0x85   : > { %s5170_s28 = sld [smem:[#allocation34_spill]] }
  0x8b   : > { %s3817_s10 = scalar_lea.hbm %s5170_s28, 16 }
  0x8c   : > { %p3818_p1 = scmp.ne.s32.totalorder %s5170_s28, %s3817_s10  ;;  %p3824_p8 = scmp.lt.u32.totalorder %s3817_s10, %s5170_s28 }
  0x8e   : > { %p3820_p4 = pnand %p3818_p1, %p4116_p7 }
  0x90   : > { %p3821_p6 = pneg %p3820_p4 }
  0x92   : > { %p3826_p9 = pnand %p3824_p8, %p3821_p6 }
  0x94   : > { %3829 = shalt.err (!%p3826_p9)
}
  0x95   : > { %s3830_s6 = scalar_lea.vmem %s700_s2, 16  ;;  %s3837_s26 = scalar_lea.vmem %s700_s2, 32 }
  0x96   : > { %p3831_p10 = scmp.ne.s32.totalorder %s700_s2, %s3830_s6  ;;  %p3838_p13 = scmp.lt.s32.totalorder %s700_s2, %s700_s2 }
  0x97   : > { %p3839_p0 = scmp.lt.s32.totalorder %s3837_s26, %s3830_s6 }
  0x98   : > { %p3833_p11 = pnand %p3831_p10, %p4116_p7 }
  0x99   : > { %p3840_p2 = por %p3839_p0, %p3838_p13 }
  0x9a   : > { %p3834_p12 = pneg %p3833_p11 }
  0x9c   : > { %p3841_p3 = pnand %p3840_p2, %p3834_p12 }
  0x9e   : > { %3844 = shalt.err (!%p3841_p3)
}
  0x9f   : > { %3648 = dma.hbm_to_vmem [thread:$0]  (!%p4100_p5), %s5170_s28, 16, %s700_s2, [#allocation7]  }
  0xa0   : > { %s3845_s11 = scalar_lea.hbm %s5102_s12, 16 }
  0xa1   : > { %p3846_p1 = scmp.ne.s32.totalorder %s5102_s12, %s3845_s11  ;;  %p3852_p3 = scmp.lt.u32.totalorder %s3845_s11, %s5102_s12 }
  0xa3   : > { %p3848_p4 = pnand %p3846_p1, %p4116_p7 }
  0xa5   : > { %p3849_p2 = pneg %p3848_p4 }
  0xa7   : > { %p3854_p6 = pnand %p3852_p3, %p3849_p2 }
  0xa9   : > { %3857 = shalt.err (!%p3854_p6)
}
  0xaa   : > { %s3858_s6 = scalar_lea.vmem %s728_s7, 16  ;;  %s3865_s2 = scalar_lea.vmem %s728_s7, 32 }
  0xab   : > { %p3859_p8 = scmp.ne.s32.totalorder %s728_s7, %s3858_s6  ;;  %p3866_p11 = scmp.lt.s32.totalorder %s728_s7, %s728_s7 }
  0xac   : > { %p3867_p12 = scmp.lt.s32.totalorder %s3865_s2, %s3858_s6 }
  0xad   : > { %p3861_p9 = pnand %p3859_p8, %p4116_p7 }
  0xae   : > { %p3868_p13 = por %p3867_p12, %p3866_p11 }
  0xaf   : > { %p3862_p10 = pneg %p3861_p9 }
  0xb1   : > { %p3869_p0 = pnand %p3868_p13, %p3862_p10 }
  0xb3   : > { %3872 = shalt.err (!%p3869_p0)
}
  0xb4   : > { %3654 = dma.hbm_to_vmem [thread:$0]  (!%p4100_p5), %s5102_s12, 16, %s728_s7, [#allocation10]  }
  0xb5   : > { %s3931_s27 = smov [#allocation14]   ;;  %s3873_s8 = scalar_lea.hbm %s5104_s14, 16 }
  0xb6   : > { %s749_s3 = sshll.u32 %s3931_s27, 4  ;;  %p3874_p1 = scmp.ne.s32.totalorder %s5104_s14, %s3873_s8  ;;  %s750_s3 = int_to_ptr.vmem [resolvable:$true] %s749_s3 }
  0xb7   : > { %p3880_p3 = scmp.lt.u32.totalorder %s3873_s8, %s5104_s14 }
  0xb8   : > { %p3876_p4 = pnand %p3874_p1, %p4116_p7 }
  0xba   : > { %p3877_p2 = pneg %p3876_p4 }
  0xbc   : > { %p3882_p6 = pnand %p3880_p3, %p3877_p2 }
  0xbe   : > { %3885 = shalt.err (!%p3882_p6)
}
  0xbf   : > { %s3886_s7 = scalar_lea.vmem %s750_s3, 16  ;;  %s3893_s2 = scalar_lea.vmem %s750_s3, 32 }
  0xc0   : > { %p3887_p8 = scmp.ne.s32.totalorder %s750_s3, %s3886_s7  ;;  %p3894_p11 = scmp.lt.s32.totalorder %s750_s3, %s750_s3 }
  0xc1   : > { %p3895_p12 = scmp.lt.s32.totalorder %s3893_s2, %s3886_s7 }
  0xc2   : > { %p3889_p9 = pnand %p3887_p8, %p4116_p7 }
  0xc3   : > { %p3896_p13 = por %p3895_p12, %p3894_p11 }
  0xc4   : > { %p3890_p10 = pneg %p3889_p9 }
  0xc6   : > { %p3897_p0 = pnand %p3896_p13, %p3890_p10 }
  0xc8   : > { %3900 = shalt.err (!%p3897_p0)
}
  0xc9   : > { %3660 = dma.hbm_to_vmem [thread:$0]  (!%p4100_p5), %s5104_s14, 16, %s750_s3, [#allocation13]  }
  0xca   : > { %p5171_p1 = scmp.ne.s32.totalorder %s5164_s9, 0 }
  0xcc   : > { %811 = sbr.rel (%p5171_p1) target bundleno = 2201 (0x899), region = 128 }
  0xd3   : > { %p5172_p4 = scmp.eq.s32.totalorder %s4083_s30, 0 }
  0xd5   : > { %3906 = dma.done.wait (%p5172_p4), [#allocation5], 16   ;;  %p5173_p7 = pmov %p5172_p4 }
  0xd6   : > { %p5174_p2 = pmov %p5172_p4 }
  0xd7   : > { %3908 = vsyncadd (%p5173_p7), [#allocation5], 4294967280 }
  0xd8   : > { %3910 = dma.done.wait (%p5174_p2), [#allocation7], 32   ;;  %p5175_p3 = pmov %p5174_p2 }
  0xd9   : > { %p5176_p6 = pmov %p5174_p2 }
  0xda   : > { %3912 = vsyncadd (%p5175_p3), [#allocation7], 4294967264 }
  0xdb   : > { %3914 = dma.done.wait (%p5176_p6), [#allocation10], 32   ;;  %p5177_p5 = pmov %p5174_p2 }
  0xdc   : > { %p5178_p8 = pmov %p5174_p2 }
  0xdd   : > { %3916 = vsyncadd (%p5177_p5), [#allocation10], 4294967264 }
  0xde   : > { %3918 = dma.done.wait (%p5178_p8), [#allocation13], 32   ;;  %p5179_p9 = pmov %p5174_p2 }
  0xdf   : > { %p912_p10 = scmp.lt.s32.totalorder %s4083_s30, 1  ;;  %v5134_v0 = vmov 0.0|0.0   ;;  %vm3933_vm0 = vmmov 0   ;;  %v5136_v1 = vmov 0.0   ;;  %s5180_s27 = sld [smem:[#allocation26_spill]]  ;;  %vm1235_vm1 = vcmask 130048  }
  0xe0   : > { %3920 = vsyncadd (%p5179_p9), [#allocation13], 4294967264  ;;  %3536 = vmatprep.subr.bf16.mxu1 %v5134_v0  ;;  %3415 = vmatprep.mubr.msk.f32.mxu1 %vm3933_vm0, %v5136_v1  ;;  %s5181_s8 = sld [smem:[#allocation29_spill]]  ;;  %s5183_s7 = sld [smem:[#allocation27_spill]]  ;;  %vm927_vm2 = vcmask 523264   ;;  %vm1395_vm3 = vcmask 261120  }
  0xe1   : > { %s5209_s30 = smov (!%p912_p10, %s4083_s30), 1  ;;  %3542 = vmatprep.subr.bf16.mxu0 %v5134_v0  ;;  %3429 = vmatprep.mubr.msk.f32.mxu0 %vm3933_vm0, %v5136_v1  ;;  %s5185_s25 = sld [smem:[#allocation31_spill]]  ;;  %vm1399_vm4 = vcmask 519168   ;;  %vm2571_vm5 = vcmask 122880  }
  0xe2   : > { %s3600_s9 = smul.u32 48, %s5209_s30  ;;  %s5200_s11 = sld [smem:[#allocation35_spill]] }
  0xe3   : > { %s3936_s1 = smov 96  }
  0xe5   : > { %s4296_s3 = scalar_lea.vmem %s5180_s27, %s3600_s9  ;;  %s5186_s9 = sld [smem:[#allocation28_spill]] }
  0xe6   : > { %v1226_v2 = vld [vmem:[%s5181_s8] sm:$0xff]  ;;  %v1227_v3 = vld [vmem:[%s5181_s8 + $0x8] sm:$0xff]  ;;  %s5184_s2 = smov %s5183_s7  ;;  %v3249_v36 = vld [vmem:[%s4296_s3 + $0x10] sm:$0xf]  ;;  %s5202_s27 = sld [smem:[#allocation37_spill]] }
  0xe7   : > { %v936_v4 = vld [vmem:[%s4296_s3] sm:$0xf]  ;;  %v4305_v5 = vpack.c.bf16 %v1227_v3, %v1226_v2  ;;  %v4337_v16 = vld [vmem:[%s5184_s2 + $0x4] ss:$0 sm:$0xff]  ;;  %v4342_v17 = vld [vmem:[%s5184_s2 + $0x5] ss:$0 sm:$0xff] }
  0xe8   : > { %v4310_v6 = vld [vmem:[%s5183_s7] ss:$0 sm:$0xff]  ;;  %v4315_v7 = vld [vmem:[%s5184_s2 + $0x1] ss:$0 sm:$0xff]  ;;  %v4323_v11 = vld [vmem:[%s5184_s2 + $0x2] ss:$0 sm:$0xff] }
  0xe9   : > { %5182 = vst [vmem:[#allocation20_spill] sm:$0xff] %v4305_v5  ;;  %v958_v8 = vld [vmem:[%s4296_s3 + $0x1] sm:$0xf]  ;;  %v945_v9 = vmul.f32 %v4310_v6, %v936_v4  ;;  %v954_v10 = vmul.f32 %v4315_v7, %v936_v4  ;;  %3538 = vmatpush3.bf16.msra.mxu1 %v4305_v5  ;;  %v3225_v18 = vld [vmem:[%s4296_s3 + $0x8] sm:$0xf]  ;;  %3544 = vmatpush3.bf16.msra.mxu0 %v4305_v5 }
  0xea   : > { %v4328_v12 = vld [vmem:[%s5184_s2 + $0x3] ss:$0 sm:$0xff]  ;;  %v968_v14 = vmul.f32 %v4323_v11, %v958_v8  ;;  %3539 = vmatprep.subr.bf16.mxu1 %v5134_v0  ;;  %v4352_v21 = vld [vmem:[%s5184_s2 + $0x6] ss:$0 sm:$0xff]  ;;  %v4357_v22 = vld [vmem:[%s5184_s2 + $0x7] ss:$0 sm:$0xff]  ;;  %3548 = vmatprep.subr.bf16.mxu0 %v5134_v0 }
  0xeb   : > { %v989_v13 = vld [vmem:[%s4296_s3 + $0x2] sm:$0xf]  ;;  %v977_v15 = vmul.f32 %v4328_v12, %v958_v8  ;;  %v3233_v23 = vld [vmem:[%s4296_s3 + $0x9] sm:$0xf]  ;;  %v1031_v25 = vmul.f32 %v4352_v21, %v3225_v18  ;;  %v1040_v26 = vmul.f32 %v4357_v22, %v3225_v18  ;;  %v4366_v27 = vld [vmem:[%s5184_s2 + $0x8] ss:$0 sm:$0xff] }
  0xec   : > { %v999_v19 = vmul.f32 %v4337_v16, %v989_v13  ;;  %v1008_v20 = vmul.f32 %v4342_v17, %v989_v13  ;;  %v981_v24 = vadd.f32 %v968_v14, %v945_v9  ;;  %v4371_v28 = vld [vmem:[%s5184_s2 + $0x9] ss:$0 sm:$0xff]  ;;  %v3241_v30 = vld [vmem:[%s4296_s3 + $0xa] sm:$0xf]  ;;  %v1062_v34 = vmul.f32 %v4366_v27, %v3233_v23  ;;  %v3257_v40 = vld [vmem:[%s4296_s3 + $0x11] sm:$0xf] }
  0xed   : > { %v985_v29 = vadd.f32 %v977_v15, %v954_v10  ;;  %v4377_v31 = vld [vmem:[%s5184_s2 + $0xa] ss:$0 sm:$0xff]  ;;  %v4382_v32 = vld [vmem:[%s5184_s2 + $0xb] ss:$0 sm:$0xff]  ;;  %v1071_v35 = vmul.f32 %v4371_v28, %v3233_v23  ;;  %v4390_v37 = vld [vmem:[%s5184_s2 + $0xc] ss:$0 sm:$0xff] }
  0xee   : > { %v1012_v33 = vadd.f32 %v999_v19, %v981_v24  ;;  %v4395_v39 = vld [vmem:[%s5184_s2 + $0xd] ss:$0 sm:$0xff]  ;;  %v4401_v41 = vld [vmem:[%s5184_s2 + $0xe] ss:$0 sm:$0xff]  ;;  %v1093_v43 = vmul.f32 %v4377_v31, %v3241_v30  ;;  %v1102_v44 = vmul.f32 %v4382_v32, %v3241_v30  ;;  %v4408_v45 = vld [vmem:[%s5184_s2 + $0xf] ss:$0 sm:$0xff]  ;;  %v1125_v49 = vmul.f32 %v4390_v37, %v3249_v36 }
  0xef   : > { %v1016_v38 = vadd.f32 %v1008_v20, %v985_v29  ;;  %v3265_v46 = vld [vmem:[%s4296_s3 + $0x12] sm:$0xf]  ;;  %v4414_v47 = vld [vmem:[%s5184_s2 + $0x10] ss:$0 sm:$0xff]  ;;  %v4420_v50 = vld [vmem:[%s5184_s2 + $0x11] ss:$0 sm:$0xff]  ;;  %v1134_v54 = vmul.f32 %v4395_v39, %v3249_v36  ;;  %v1156_v55 = vmul.f32 %v4401_v41, %v3257_v40  ;;  %v1165_v60 = vmul.f32 %v4408_v45, %v3257_v40 }
  0xf0   : > { %v1044_v42 = vadd.f32 %v1031_v25, %v1012_v33  ;;  %v1309_v51 = vld [vmem:[%s5185_s25] sm:$0xff]  ;;  %v1310_v52 = vld [vmem:[%s5185_s25 + $0x8] sm:$0xff]  ;;  %v4444_v2 = vld [vmem:[%s4296_s3 + $0x10] sm:$0xf]  ;;  %v1187_v8 = vmul.f32 %v4414_v47, %v3265_v46  ;;  %v1196_v9 = vmul.f32 %v4420_v50, %v3265_v46  ;;  %s3352_s2 = sshll.u32 %s5209_s30, 4 }
  0xf1   : > { %v1048_v48 = vadd.f32 %v1040_v26, %v1016_v38  ;;  %v937_v57 = vld [vmem:[%s4296_s3 + $0x8] sm:$0xf]  ;;  %v4447_v3 = vld [vmem:[%s4296_s3 + $0x11] sm:$0xf]  ;;  %v4455_v14 = vld [vmem:[%s4296_s3 + $0x18] sm:$0xf]  ;;  %v4460_v18 = vpack.c.bf16 %v1310_v52, %v1309_v51  ;;  %v1041_v20 = vmul.f32 %v4357_v22, %v4444_v2 }
  0xf2   : > { %v1075_v53 = vadd.f32 %v1062_v34, %v1044_v42  ;;  %v4432_v58 = vld [vmem:[%s4296_s3 + $0x9] sm:$0xf]  ;;  %v955_v61 = vmul.f32 %v4315_v7, %v937_v57  ;;  %v4452_v13 = vld [vmem:[%s4296_s3 + $0x12] sm:$0xf]  ;;  %v4458_v15 = vld [vmem:[%s4296_s3 + $0x19] sm:$0xf]  ;;  %v946_v26 = vmul.f32 %v4310_v6, %v937_v57  ;;  %v1072_v33 = vmul.f32 %v4371_v28, %v4447_v3 }
  0xf3   : > { %v1079_v56 = vadd.f32 %v1071_v35, %v1048_v48  ;;  %v4435_v59 = vld [vmem:[%s4296_s3 + $0xa] sm:$0xf]  ;;  %v978_v62 = vmul.f32 %v4328_v12, %v4432_v58  ;;  %v4465_v23 = vld [vmem:[%s4296_s3 + $0x10] sm:$0xf]  ;;  %v4477_v34 = vld [vmem:[%s4296_s3 + $0x1a] sm:$0xf]  ;;  %v1103_v42 = vmul.f32 %v4382_v32, %v4452_v13  ;;  %v1135_v51 = vmul.f32 %v4395_v39, %v4455_v14 }
  0xf4   : > { %v1009_v63 = vmul.f32 %v4342_v17, %v4435_v59  ;;  %v1106_v4 = vadd.f32 %v1093_v43, %v1075_v53  ;;  %v4468_v24 = vld [vmem:[%s4296_s3 + $0x11] sm:$0xf]  ;;  %v956_v35 = vmul.f32 %v4315_v7, %v4465_v23  ;;  %v4482_v36 = vld [vmem:[%s4296_s3 + $0x18] sm:$0xf]  ;;  %v4487_v38 = vld [vmem:[%s5186_s9] ss:$0 sm:$0xff]  ;;  %v1166_v52 = vmul.f32 %v4408_v45, %v4458_v15 }
  0xf5   : > { %v1110_v10 = vadd.f32 %v1102_v44, %v1079_v56  ;;  %v986_v19 = vadd.f32 %v978_v62, %v955_v61  ;;  %v4471_v25 = vld [vmem:[%s4296_s3 + $0x12] sm:$0xf]  ;;  %5187 = vst [vmem:[#allocation21_spill] sm:$0xff] %v4487_v38  ;;  %v979_v43 = vmul.f32 %v4328_v12, %v4468_v24  ;;  %v4496_v46 = vld [vmem:[%s4296_s3 + $0x19] sm:$0xf]  ;;  %v1197_v61 = vmul.f32 %v4420_v50, %v4477_v34 }
  0xf6   : > { %v1138_v29 = vadd.f32 %v1125_v49, %v1106_v4  ;;  %v1010_v44 = vmul.f32 %v4342_v17, %v4471_v25  ;;  %v4503_v53 = vld [vmem:[%s4296_s3 + $0x18] sm:$0xf]  ;;  %v4522_v4 = vld [vmem:[%s4296_s3 + $0x21] sm:$0xf] }
  0xf7   : > { %v1142_v30 = vadd.f32 %v1134_v54, %v1110_v10  ;;  %v1017_v40 = vadd.f32 %v1009_v63, %v986_v19  ;;  %v4506_v54 = vld [vmem:[%s4296_s3 + $0x19] sm:$0xf]  ;;  %v4519_v63 = vld [vmem:[%s4296_s3 + $0x20] sm:$0xf]  ;;  %5189 = vst [vmem:[#allocation23_spill] sm:$0xff] %v4522_v4 }
  0xf8   : > { %v1169_v48 = vadd.f32 %v1156_v55, %v1138_v29  ;;  %v4509_v56 = vld [vmem:[%s4296_s3 + $0x1a] sm:$0xf]  ;;  %v987_v55 = vadd.f32 %v979_v43, %v956_v35  ;;  %5188 = vst [vmem:[#allocation22_spill] sm:$0xff] %v4519_v63  ;;  %v1073_v29 = vmul.f32 %v4371_v28, %v4496_v46  ;;  %v4534_v35 = vld [vmem:[%s5186_s9 + $0x1] ss:$0 sm:$0xff] }
  0xf9   : > { %v1173_v49 = vadd.f32 %v1165_v60, %v1142_v30  ;;  %v1049_v57 = vadd.f32 %v1041_v20, %v1017_v40  ;;  %v1042_v60 = vmul.f32 %v4357_v22, %v4482_v36  ;;  %v4516_v62 = vld [vmem:[%s4296_s3 + $0x1a] sm:$0xf]  ;;  %v957_v20 = vmul.f32 %v4315_v7, %v4503_v53  ;;  %v4529_v30 = vld [vmem:[%s4296_s3 + $0x20] sm:$0xf] }
  0xfa   : > { %v1200_v10 = vadd.f32 %v1187_v8, %v1169_v48  ;;  %v1018_v43 = vadd.f32 %v1010_v44, %v987_v55  ;;  %v4537_v0 = vld [vmem:[%s4296_s3 + $0x22] sm:$0xf]  ;;  %v980_v8 = vmul.f32 %v4328_v12, %v4506_v54  ;;  %v1167_v44 = vmul.f32 %v4408_v45, %v4522_v4  ;;  %v4565_v4 = vld [vmem:[%s4296_s3 + $0x28] sm:$0xf] }
  0xfb   : > { %v1204_v19 = vadd.f32 %v1196_v9, %v1173_v49  ;;  %v1080_v40 = vadd.f32 %v1072_v33, %v1049_v57  ;;  %5190 = vst [vmem:[#allocation24_spill] sm:$0xff] %v4537_v0  ;;  %v1011_v9 = vmul.f32 %v4342_v17, %v4509_v56  ;;  %v4544_v7 = vld [vmem:[%s4296_s3 + $0x21] sm:$0xf]  ;;  %v1104_v49 = vmul.f32 %v4382_v32, %v4516_v62 }
  0xfc   : > { %5191 = vst [vmem:[#allocation25_spill] sm:$0xff] %v4544_v7  ;;  %v1213_v48 = vadd.f32 %v4487_v38, %v1200_v10  ;;  %v1136_v33 = vmul.f32 %v4395_v39, %v4519_v63  ;;  %v1050_v12 = vadd.f32 %v1042_v60, %v1018_v43  ;;  %v988_v55 = vadd.f32 %v980_v8, %v957_v20  ;;  %v4556_v1 = vld [vmem:[%s4296_s3 + $0x22] sm:$0xf] }
  0xfd   : > { %v1111_v57 = vadd.f32 %v1103_v42, %v1080_v40  ;;  %v1043_v17 = vmul.f32 %v4357_v22, %v4529_v30  ;;  %v1222_v10 = vadd.f32 %v4534_v35, %v1204_v19  ;;  %v1198_v5 = vmul.f32 %v4420_v50, %v4537_v0  ;;  %v4573_v40 = vld [vmem:[%s4296_s3 + $0x29] sm:$0xf] }
  0xfe   : > { %3416 = vmatmul.mubr.msk.f32.vlgmr.msra.gmra.mrb[0].mxu1 %vm1235_vm1, %v1213_v48  ;;  %v1074_v38 = vmul.f32 %v4371_v28, %v4544_v7  ;;  %v969_v42 = vmul.f32 %v4323_v11, %v4432_v58  ;;  %v5192_v22 = vmov 0.0   ;;  %v1081_v20 = vadd.f32 %v1073_v29, %v1050_v12 }
  0xff   : > { %3541 = vmatpush3.bf16.msra.mxu1 %v4460_v18  ;;  %3422 = vmatprep.mubr.msk.f32.mxu1 %vm3933_vm0, %v5192_v22  ;;  %v1143_v60 = vadd.f32 %v1135_v51, %v1111_v57  ;;  %v1019_v19 = vadd.f32 %v1011_v9, %v988_v55  ;;  %v5193_v43 = vmov 0.0|0.0   ;;  %v1105_v28 = vmul.f32 %v4382_v32, %v4556_v1  ;;  %v4588_v9 = vld [vmem:[%s4296_s3 + $0x2a] sm:$0xf]  ;;  %s3935_s3 = smov 32  }
 0x100   : > { %3545 = vmatprep.subr.bf16.mxu1 %v5193_v43  ;;  %v982_v8 = vadd.f32 %v969_v42, %v946_v26  ;;  %v1000_v58 = vmul.f32 %v4337_v16, %v4435_v59  ;;  %v1032_v48 = vmul.f32 %v4352_v21, %v4444_v2  ;;  %v1112_v7 = vadd.f32 %v1104_v49, %v1081_v20 }
 0x101   : > { %v1174_v0 = vadd.f32 %v1166_v52, %v1143_v60  ;;  %v1051_v63 = vadd.f32 %v1043_v17, %v1019_v19  ;;  %v1137_v51 = vmul.f32 %v4395_v39, %v4565_v4  ;;  %v1168_v29 = vmul.f32 %v4408_v45, %v4573_v40  ;;  %928 = vst.msk [vmem:[#allocation2] sm:$0xff] %vm927_vm2, %v5192_v22 }
 0x102   : > { %3423 = vmatmul.mubr.msk.f32.vlgmr.msra.gmra.mrb[2].mxu1 %vm1235_vm1, %v1222_v10  ;;  %v1013_v32 = vadd.f32 %v1000_v58, %v982_v8  ;;  %v1063_v59 = vmul.f32 %v4366_v27, %v4447_v3  ;;  %v1094_v2 = vmul.f32 %v4377_v31, %v4452_v13  ;;  %v1144_v26 = vadd.f32 %v1136_v33, %v1112_v7 }
 0x103   : > { %3547 = vmatpush3.bf16.msra.mxu1 %v4460_v18  ;;  %3436 = vmatprep.mubr.msk.f32.mxu1 %vm3933_vm0, %v5192_v22  ;;  %v1205_v39 = vadd.f32 %v1197_v61, %v1174_v0  ;;  %v1082_v52 = vadd.f32 %v1074_v38, %v1051_v63  ;;  %v947_v49 = vmul.f32 %v4310_v6, %v4465_v23 }
 0x104   : > { %3551 = vmatprep.subr.bf16.mxu1 %v5193_v43  ;;  %v1045_v45 = vadd.f32 %v1032_v48, %v1013_v32  ;;  %v970_v3 = vmul.f32 %v4323_v11, %v4468_v24  ;;  %v1001_v13 = vmul.f32 %v4337_v16, %v4471_v25  ;;  %v1175_v12 = vadd.f32 %v1167_v44, %v1144_v26  ;;  %v5196_v48 = vld [vmem:[#allocation23_spill] sm:$0xff]  ;;  %v5199_v26 = vld [vmem:[#allocation20_spill] sm:$0xff] }
 0x105   : > { %v1223_v57 = vadd.f32 %v4534_v35, %v1205_v39  ;;  %v1113_v55 = vadd.f32 %v1105_v28, %v1082_v52  ;;  %v1199_v0 = vmul.f32 %v4420_v50, %v4588_v9  ;;  %v1126_v61 = vmul.f32 %v4390_v37, %v4455_v14  ;;  %929 = vst.msk [vmem:[#allocation2 + $0x8] sm:$0xff] %vm927_vm2, %v5192_v22 }
 0x106   : > { %v1076_v38 = vadd.f32 %v1063_v59, %v1045_v45  ;;  %v983_v63 = vadd.f32 %v970_v3, %v947_v49  ;;  %v1033_v23 = vmul.f32 %v4352_v21, %v4482_v36  ;;  %v1206_v24 = vadd.f32 %v1198_v5, %v1175_v12  ;;  %v5198_v59 = vld [vmem:[#allocation24_spill] sm:$0xff]  ;;  %930 = vst.msk [vmem:[#allocation2 + $0x10] sm:$0xff] %vm927_vm2, %v5192_v22 }
 0x107   : > { %3437 = vmatmul.mubr.msk.f32.vlgmr.msra.gmra.mrb[4].mxu1 %vm1235_vm1, %v1223_v57  ;;  %v1145_v7 = vadd.f32 %v1137_v51, %v1113_v55  ;;  %v1157_v25 = vmul.f32 %v4401_v41, %v4458_v15  ;;  %v1188_v33 = vmul.f32 %v4414_v47, %v4477_v34  ;;  %v1064_v36 = vmul.f32 %v4366_v27, %v4496_v46  ;;  %v5197_v51 = vld [vmem:[#allocation21_spill] sm:$0xff] }
 0x108   : > { %3553 = vmatpush3.bf16.msra.mxu1 %v4460_v18  ;;  %3450 = vmatprep.mubr.msk.f32.mxu1 %vm3933_vm0, %v5192_v22  ;;  %v1107_v50 = vadd.f32 %v1094_v2, %v1076_v38  ;;  %v1014_v14 = vadd.f32 %v1001_v13, %v983_v63  ;;  %v1224_v44 = vadd.f32 %v4534_v35, %v1206_v24 }
 0x109   : > { %3557 = vmatprep.subr.bf16.mxu1 %v5193_v43  ;;  %v1176_v5 = vadd.f32 %v1168_v29, %v1145_v7  ;;  %v948_v15 = vmul.f32 %v4310_v6, %v4503_v53  ;;  %v971_v34 = vmul.f32 %v4323_v11, %v4506_v54  ;;  %v1095_v42 = vmul.f32 %v4377_v31, %v4516_v62  ;;  %v5194_v53 = vld [vmem:[#allocation22_spill] sm:$0xff] }
 0x10a   : > { %v1139_v17 = vadd.f32 %v1126_v61, %v1107_v50  ;;  %v1046_v10 = vadd.f32 %v1033_v23, %v1014_v14  ;;  %v1002_v60 = vmul.f32 %v4337_v16, %v4509_v56  ;;  %v1034_v19 = vmul.f32 %v4352_v21, %v4529_v30  ;;  %v5195_v56 = vld [vmem:[#allocation25_spill] sm:$0xff]  ;;  %931 = vst.msk [vmem:[#allocation2 + $0x18] sm:$0xff] %vm927_vm2, %v5192_v22 }
 0x10b   : > { %3451 = vmatmul.mubr.msk.f32.vlgmr.msra.gmra.mrb[6].mxu1 %vm1235_vm1, %v1224_v44  ;;  %v1207_v46 = vadd.f32 %v1199_v0, %v1176_v5  ;;  %v984_v20 = vadd.f32 %v971_v34, %v948_v15  ;;  %v1127_v54 = vmul.f32 %v4390_v37, %v5194_v53  ;;  %v1065_v28 = vmul.f32 %v4366_v27, %v5195_v56  ;;  %v2364_v15 = vld [vmem:[%s5200_s11] sm:$0xff]  ;;  %v2365_v34 = vld [vmem:[%s5200_s11 + $0x8] sm:$0xff] }
 0x10c   : > { %3559 = vmatpush3.bf16.msra.mxu1 %v4460_v18  ;;  %3464 = vmatprep.mubr.msk.f32.mxu1 %vm3933_vm0, %v5192_v22  ;;  %v1170_v6 = vadd.f32 %v1157_v25, %v1139_v17  ;;  %v1077_v11 = vadd.f32 %v1064_v36, %v1046_v10  ;;  %v1158_v21 = vmul.f32 %v4401_v41, %v5196_v48  ;;  %v2366_v17 = vld [vmem:[%s5200_s11 + $0x10] sm:$0xff] }
 0x10d   : > { %v1225_v62 = vadd.f32 %v4534_v35, %v1207_v46  ;;  %v1015_v16 = vadd.f32 %v1002_v60, %v984_v20  ;;  %v1096_v30 = vmul.f32 %v4377_v31, %v4556_v1  ;;  %v1189_v35 = vmul.f32 %v4414_v47, %v5198_v59  ;;  %932 = vst.msk [vmem:[#allocation2 + $0x20] sm:$0xff] %vm927_vm2, %v5192_v22  ;;  %v1918_v59 = vld [vmem:[#allocation2 + $0x8] sm:$0xf] }
 0x10e   : > { %v1201_v8 = vadd.f32 %v1188_v33, %v1170_v6  ;;  %v1108_v58 = vadd.f32 %v1095_v42, %v1077_v11  ;;  %v1128_v27 = vmul.f32 %v4390_v37, %v4565_v4  ;;  %v1159_v1 = vmul.f32 %v4401_v41, %v4573_v40  ;;  %933 = vst.msk [vmem:[#allocation2 + $0x28] sm:$0xff] %vm927_vm2, %v5192_v22  ;;  %v2367_v42 = vld [vmem:[%s5200_s11 + $0x18] sm:$0xff]  ;;  %v1930_v6 = vld [vmem:[#allocation2 + $0x1] sm:$0xf] }
 0x10f   : > { %3465 = vmatmul.mubr.msk.f32.vlgmr.msra.gmra.mrb[8].mxu1 %vm1235_vm1, %v1225_v62  ;;  %v1047_v18 = vadd.f32 %v1034_v19, %v1015_v16  ;;  %v1190_v49 = vmul.f32 %v4414_v47, %v4588_v9  ;;  %934 = vst.msk [vmem:[#allocation2 + $0x30] sm:$0xff] %vm927_vm2, %v5192_v22  ;;  %935 = vst.msk [vmem:[#allocation2 + $0x38] sm:$0xff] %vm927_vm2, %v5192_v22  ;;  %v3277_v9 = vld [vmem:[#allocation6] ss:$0 sm:$0xff]  ;;  %v3560_v10 = vpack.c.bf16 %v2365_v34, %v2364_v15  ;;  %v1917_v19 = vld [vmem:[#allocation2] sm:$0xf] }
 0x110   : > { %v1214_v29 = vadd.f32 %v5197_v51, %v1201_v8  ;;  %v1140_v32 = vadd.f32 %v1127_v54, %v1108_v58  ;;  %v3564_v60 = vpack.c.bf16 %v2367_v42, %v2366_v17  ;;  %v1947_v62 = vld [vmem:[#allocation2 + $0x2] sm:$0xf]  ;;  %v2068_v15 = vld [vmem:[#allocation2 + $0xc] sm:$0xf] }
 0x111   : > { %v1078_v2 = vadd.f32 %v1065_v28, %v1047_v18  ;;  %v1964_v8 = vld [vmem:[#allocation2 + $0x3] sm:$0xf] }
 0x112   : > { %3430 = vmatmul.mubr.msk.f32.vlgmr.msra.gmra.mrb[0].mxu0 %vm1235_vm1, %v1214_v29  ;;  %v1171_v39 = vadd.f32 %v1158_v21, %v1140_v32  ;;  %v1981_v18 = vld [vmem:[#allocation2 + $0x4] sm:$0xf]  ;;  %v1999_v32 = vld [vmem:[#allocation2 + $0x8] sm:$0xf] }
 0x113   : > { %3550 = vmatpush3.bf16.msra.mxu0 %v5199_v26  ;;  %3443 = vmatprep.mubr.msk.f32.mxu0 %vm3933_vm0, %v5192_v22  ;;  %v1109_v52 = vadd.f32 %v1096_v30, %v1078_v2 }
 0x114   : > { %v1202_v31 = vadd.f32 %v1189_v35, %v1171_v39  ;;  %3554 = vmatprep.subr.bf16.mxu0 %v5193_v43  ;;  %v1931_v35 = vld [vmem:[#allocation2 + $0x9] sm:$0xf] }
 0x115   : > { %v1141_v45 = vadd.f32 %v1128_v27, %v1109_v52 }
 0x116   : > { %v1215_v37 = vadd.f32 %v5197_v51, %v1202_v31  ;;  %v4740_v31 = vld [vmem:[#allocation4] ss:$0 sm:$0xff] }
 0x117   : > { %v1172_v4 = vadd.f32 %v1159_v1, %v1141_v45  ;;  %v1948_v45 = vld [vmem:[#allocation2 + $0xa] sm:$0xf] }
 0x118   : > { %3444 = vmatmul.mubr.msk.f32.vlgmr.msra.gmra.mrb[2].mxu0 %vm1235_vm1, %v1215_v37 }
 0x119   : > { %3556 = vmatpush3.bf16.msra.mxu0 %v5199_v26  ;;  %3457 = vmatprep.mubr.msk.f32.mxu0 %vm3933_vm0, %v5192_v22  ;;  %v1203_v3 = vadd.f32 %v1190_v49, %v1172_v4  ;;  %v2017_v26 = vld [vmem:[#allocation2 + $0x9] sm:$0xf] }
 0x11a   : > { %3561 = vmatprep.subr.bf16.mxu0 %v3560_v10 }
 0x11b   : > { %v1216_v41 = vadd.f32 %v5197_v51, %v1203_v3  ;;  %v2034_v3 = vld [vmem:[#allocation2 + $0xa] sm:$0xf] }
 0x11d   : > { %3458 = vmatmul.mubr.msk.f32.vlgmr.msra.gmra.mrb[4].mxu0 %vm1235_vm1, %v1216_v41 }
 0x11e   : > { %3563 = vmatpush3.bf16.msra.mxu0 %v3560_v10 }
 0x11f   : > { %3565 = vmatprep.subr.bf16.mxu0 %v3564_v60 }
 0x122   : > { %3567 = vmatpush3.bf16.msra.mxu0 %v3564_v60 }
 0x123   : > { %3576 = vmatprep.subr.bf16.mxu0 %v5193_v43 }
 0x1d1   : > { %v4676_v47 = vpop.f32.mrb[0].mxu1 }
 0x1d2   : > { %v3417_v40 = vpop.f32.mrb[1].mxu1  ;;  %v1306_v41 = vadd.f32 %v4740_v31, %v4676_v47 }
 0x1d5   : > { %v1387_v13 = vpop.f32.mrb[2].mxu1 }
 0x1d6   : > { %v1388_v57 = vadd.f32 %v3277_v9, %v1387_v13  ;;  %v3424_v12 = vpop.f32.mrb[3].mxu1 }
 0x1d8   : > { %1392 = vrot.lane.b32.xlu0 %v1388_v57, %s3935_s3  ;;  %v1965_v57 = vld [vmem:[#allocation2 + $0xb] sm:$0xf] }
 0x1da   : > { %v1561_v55 = vpop.f32.mrb[4].mxu1 }
 0x1db   : > { %v1562_v0 = vadd.f32 %v3277_v9, %v1561_v55  ;;  %v3438_v38 = vpop.f32.mrb[5].mxu1 }
 0x1dd   : > { %1566 = vrot.lane.b32.xlu0 %v1562_v0, %s3935_s3 }
 0x1de   : > { %v1733_v61 = vpop.f32.mrb[6].mxu1 }
 0x1df   : > { %v1734_v63 = vadd.f32 %v3277_v9, %v1733_v61  ;;  %v3452_v23 = vpop.f32.mrb[7].mxu1 }
 0x1e1   : > { %1738 = vrot.lane.b32.xlu1 %v1734_v63, %s3935_s3  ;;  %v2051_v63 = vld [vmem:[#allocation2 + $0xb] sm:$0xf] }
 0x1e2   : > { %v1905_v24 = vpop.f32.mrb[8].mxu1 }
 0x1e3   : > { %v1906_v7 = vadd.f32 %v3277_v9, %v1905_v24  ;;  %v3466_v25 = vpop.f32.mrb[9].mxu1 }
 0x1e5   : > { %1910 = vrot.lane.b32.xlu1 %v1906_v7, %s3935_s3  ;;  %v4678_v33 = vpop.f32.mrb[0].mxu0  ;;  %s5201_s3 = sld [smem:[#allocation33_spill]]  ;;  %v1982_v7 = vld [vmem:[#allocation2 + $0xc] sm:$0xf] }
 0x1e6   : > { %v3431_v50 = vpop.f32.mrb[1].mxu0  ;;  %v1480_v47 = vadd.f32 %v4740_v31, %v4678_v33 }
 0x1eb   : > { %v4680_v14 = vpop.f32.mrb[2].mxu0  ;;  %v4700_v46 = vld [vmem:[%s5201_s3] ss:$0 sm:$0xff]  ;;  %v4705_v20 = vld [vmem:[%s5201_s3 + $0x1] ss:$0 sm:$0xff] }
 0x1ec   : > { %v3445_v36 = vpop.f32.mrb[3].mxu0  ;;  %v1926_v11 = vmul.f32 %v4700_v46, %v1917_v19  ;;  %v1939_v53 = vmul.f32 %v4705_v20, %v1930_v6  ;;  %v4712_v54 = vld [vmem:[%s5201_s3 + $0x2] ss:$0 sm:$0xff]  ;;  %v4718_v28 = vld [vmem:[%s5201_s3 + $0x3] ss:$0 sm:$0xff]  ;;  %v1927_v52 = vmul.f32 %v4700_v46, %v1918_v59  ;;  %v1940_v1 = vmul.f32 %v4705_v20, %v1931_v35 }
 0x1ed   : > { %v1956_v56 = vmul.f32 %v4712_v54, %v1947_v62  ;;  %v1973_v48 = vmul.f32 %v4718_v28, %v1964_v8  ;;  %v4724_v21 = vld [vmem:[%s5201_s3 + $0x4] ss:$0 sm:$0xff]  ;;  %v4730_v29 = vld [vmem:[%s5201_s3 + $0x8] ss:$0 sm:$0xff]  ;;  %v4736_v39 = vld [vmem:[%s5201_s3 + $0x9] ss:$0 sm:$0xff]  ;;  %v1957_v9 = vmul.f32 %v4712_v54, %v1948_v45  ;;  %v1974_v24 = vmul.f32 %v4718_v28, %v1965_v57 }
 0x1ee   : > { %v1943_v16 = vadd.f32 %v1939_v53, %v1926_v11  ;;  %v1990_v51 = vmul.f32 %v4724_v21, %v1981_v18  ;;  %v2009_v27 = vmul.f32 %v4730_v29, %v1999_v32  ;;  %v2026_v37 = vmul.f32 %v4736_v39, %v2017_v26  ;;  %v4746_v4 = vld [vmem:[%s5201_s3 + $0xa] ss:$0 sm:$0xff]  ;;  %v4756_v38 = vld [vmem:[%s5201_s3 + $0xb] ss:$0 sm:$0xff]  ;;  %v4775_v62 = vld [vmem:[%s5201_s3 + $0x10] ss:$0 sm:$0xff] }
 0x1ef   : > { %v1944_v40 = vadd.f32 %v1940_v1, %v1927_v52  ;;  %v2043_v0 = vmul.f32 %v4746_v4, %v2034_v3  ;;  %v2060_v50 = vmul.f32 %v4756_v38, %v2051_v63  ;;  %v1991_v33 = vmul.f32 %v4724_v21, %v1982_v7  ;;  %v4789_v26 = vld [vmem:[%s5201_s3 + $0x12] ss:$0 sm:$0xff] }
 0x1f0   : > { %v4682_v44 = vpop.f32.mrb[4].mxu0  ;;  %v1960_v58 = vadd.f32 %v1956_v56, %v1943_v16  ;;  %v1652_v57 = vadd.f32 %v4740_v31, %v4680_v14 }
 0x1f1   : > { %v3459_v5 = vpop.f32.mrb[5].mxu0  ;;  %v1961_v23 = vadd.f32 %v1957_v9, %v1944_v40 }
 0x1f2   : > { %v1977_v30 = vadd.f32 %v1973_v48, %v1960_v58  ;;  %v4766_v5 = vld [vmem:[%s5201_s3 + $0xc] ss:$0 sm:$0xff]  ;;  %v4782_v58 = vld [vmem:[%s5201_s3 + $0x11] ss:$0 sm:$0xff] }
 0x1f3   : > { %v1978_v17 = vadd.f32 %v1974_v24, %v1961_v23  ;;  %v2077_v60 = vmul.f32 %v4766_v5, %v2068_v15 }
 0x1f4   : > { %v1994_v2 = vadd.f32 %v1990_v51, %v1977_v30 }
 0x1f5   : > { %v1995_v53 = vadd.f32 %v1991_v33, %v1978_v17 }
 0x1f6   : > { %v2013_v49 = vadd.f32 %v2009_v27, %v1994_v2 }
 0x1f8   : > { %v2030_v55 = vadd.f32 %v2026_v37, %v2013_v49 }
 0x1fa   : > { %v2047_v25 = vadd.f32 %v2043_v0, %v2030_v55 }
 0x1fc   : > { %v2064_v42 = vadd.f32 %v2060_v50, %v2047_v25 }
 0x1fe   : > { %v2081_v51 = vadd.f32 %v2077_v60, %v2064_v42  ;;  %v4811_v42 = vld [vmem:[%s5201_s3 + $0x14] ss:$0 sm:$0xff] }
 0x24a   : > { %v1393_v13 = vpop.permute.xlu0 %1392 }
 0x24b   : > { %v1396_v12 = vsel %vm1395_vm3, %v1306_v41, %v1393_v13 }
 0x24c   : > { %v1397_v61 = vmax.f32 %v1396_v12, 0.0 }
 0x24e   : > { %1400 = vst.msk [vmem:[#allocation2 + $0x12] sm:$0xf] %vm1399_vm4, %v1397_v61 }
 0x24f   : > { %v1567_v36 = vpop.permute.xlu0 %1566 }
 0x250   : > { %v1569_v34 = vsel %vm1395_vm3, %v1480_v47, %v1567_v36  ;;  %v4801_v47 = vld [vmem:[%s5201_s3 + $0x13] ss:$0 sm:$0xff] }
 0x251   : > { %v1570_v10 = vmax.f32 %v1569_v34, 0.0 }
 0x253   : > { %1572 = vst.msk [vmem:[#allocation2 + $0x1a] sm:$0xf] %vm1399_vm4, %v1570_v10  ;;  %v1739_v10 = vpop.permute.xlu1 %1738 }
 0x255   : > { %v1919_v19 = vld [vmem:[#allocation2 + $0x10] sm:$0xf]  ;;  %v1983_v52 = vld [vmem:[#allocation2 + $0x14] sm:$0xf] }
 0x256   : > { %v1932_v6 = vld [vmem:[#allocation2 + $0x11] sm:$0xf]  ;;  %v1928_v16 = vmul.f32 %v4700_v46, %v1919_v19  ;;  %v1992_v24 = vmul.f32 %v4724_v21, %v1983_v52  ;;  %v4829_v52 = vld [vmem:[%s5201_s3 + $0x19] ss:$0 sm:$0xff] }
 0x257   : > { %v1949_v11 = vld [vmem:[#allocation2 + $0x12] sm:$0xf]  ;;  %v1941_v56 = vmul.f32 %v4705_v20, %v1932_v6 }
 0x258   : > { %v2000_v8 = vld [vmem:[#allocation2 + $0x10] sm:$0xf]  ;;  %v1958_v59 = vmul.f32 %v4712_v54, %v1949_v11  ;;  %v2069_v7 = vld [vmem:[#allocation2 + $0x14] sm:$0xf] }
 0x259   : > { %v1966_v48 = vld [vmem:[#allocation2 + $0x13] sm:$0xf]  ;;  %v2010_v18 = vmul.f32 %v4730_v29, %v2000_v8  ;;  %v1945_v32 = vadd.f32 %v1941_v56, %v1928_v16 }
 0x25a   : > { %v2018_v30 = vld [vmem:[#allocation2 + $0x11] sm:$0xf]  ;;  %v1975_v41 = vmul.f32 %v4718_v28, %v1966_v48  ;;  %v1920_v9 = vld [vmem:[#allocation2 + $0x18] sm:$0xf] }
 0x25b   : > { %v2035_v35 = vld [vmem:[#allocation2 + $0x12] sm:$0xf]  ;;  %v2014_v1 = vadd.f32 %v2010_v18, %v1995_v53  ;;  %v2027_v45 = vmul.f32 %v4736_v39, %v2018_v30  ;;  %v1962_v3 = vadd.f32 %v1958_v59, %v1945_v32  ;;  %v1933_v13 = vld [vmem:[#allocation2 + $0x19] sm:$0xf]  ;;  %v1929_v50 = vmul.f32 %v4700_v46, %v1920_v9  ;;  %v4821_v18 = vld [vmem:[%s5201_s3 + $0x18] ss:$0 sm:$0xff] }
 0x25c   : > { %v2085_v2 = vld [vmem:[#allocation2 + $0x10] sm:$0xf]  ;;  %v2044_v55 = vmul.f32 %v4746_v4, %v2035_v35  ;;  %v2001_v63 = vld [vmem:[#allocation2 + $0x18] sm:$0xf]  ;;  %v1942_v14 = vmul.f32 %v4705_v20, %v1933_v13  ;;  %v2154_v19 = vld [vmem:[#allocation2 + $0x14] sm:$0xf]  ;;  %v1824_v20 = vadd.f32 %v4740_v31, %v4682_v44  ;;  %v2078_v53 = vmul.f32 %v4766_v5, %v2069_v7 }
 0x25d   : > { %v2103_v27 = vld [vmem:[#allocation2 + $0x11] sm:$0xf]  ;;  %v2095_v37 = vmul.f32 %v4775_v62, %v2085_v2  ;;  %v2031_v12 = vadd.f32 %v2027_v45, %v2014_v1  ;;  %v1979_v23 = vadd.f32 %v1975_v41, %v1962_v3  ;;  %v2019_v33 = vld [vmem:[#allocation2 + $0x19] sm:$0xf]  ;;  %v2011_v6 = vmul.f32 %v4730_v29, %v2001_v63 }
 0x25e   : > { %v2052_v49 = vld [vmem:[#allocation2 + $0x13] sm:$0xf]  ;;  %v2112_v61 = vmul.f32 %v4782_v58, %v2103_v27  ;;  %v2086_v46 = vld [vmem:[#allocation2 + $0x18] sm:$0xf]  ;;  %v1946_v30 = vadd.f32 %v1942_v14, %v1929_v50  ;;  %v2028_v32 = vmul.f32 %v4736_v39, %v2019_v33  ;;  %v1741_v44 = vsel %vm1395_vm3, %v1652_v57, %v1739_v10  ;;  %v1984_v33 = vld [vmem:[#allocation2 + $0x1c] sm:$0xf] }
 0x25f   : > { %v2120_v40 = vld [vmem:[#allocation2 + $0x12] sm:$0xf]  ;;  %v2099_v0 = vadd.f32 %v2095_v37, %v2081_v51  ;;  %v2048_v36 = vadd.f32 %v2044_v55, %v2031_v12  ;;  %v2061_v15 = vmul.f32 %v4756_v38, %v2052_v49  ;;  %v1996_v60 = vadd.f32 %v1992_v24, %v1979_v23  ;;  %v1950_v8 = vld [vmem:[#allocation2 + $0x1a] sm:$0xf] }
 0x260   : > { %v2137_v25 = vld [vmem:[#allocation2 + $0x13] sm:$0xf]  ;;  %v2129_v17 = vmul.f32 %v4789_v26, %v2120_v40  ;;  %v2036_v48 = vld [vmem:[#allocation2 + $0x1a] sm:$0xf]  ;;  %v2163_v27 = vmul.f32 %v4811_v42, %v2154_v19  ;;  %v2096_v1 = vmul.f32 %v4775_v62, %v2086_v46  ;;  %v1959_v37 = vmul.f32 %v4712_v54, %v1950_v8  ;;  %v1911_v40 = vpop.permute.xlu1 %1910 }
 0x261   : > { %v2116_v34 = vadd.f32 %v2112_v61, %v2099_v0  ;;  %v2065_v11 = vadd.f32 %v2061_v15, %v2048_v36  ;;  %v2146_v56 = vmul.f32 %v4801_v47, %v2137_v25  ;;  %v2015_v51 = vadd.f32 %v2011_v6, %v1996_v60  ;;  %v2104_v59 = vld [vmem:[#allocation2 + $0x19] sm:$0xf] }
 0x262   : > { %v2171_v35 = vld [vmem:[#allocation2 + $0x18] sm:$0xf]  ;;  %v2045_v41 = vmul.f32 %v4746_v4, %v2036_v48  ;;  %v2113_v55 = vmul.f32 %v4782_v58, %v2104_v59  ;;  %v1963_v61 = vadd.f32 %v1959_v37, %v1946_v30  ;;  %v1742_v7 = vmax.f32 %v1741_v44, 0.0  ;;  %v2155_v48 = vld [vmem:[#allocation2 + $0x1c] sm:$0xf] }
 0x263   : > { %v2133_v16 = vadd.f32 %v2129_v17, %v2116_v34  ;;  %v2082_v31 = vadd.f32 %v2078_v53, %v2065_v11  ;;  %v2121_v45 = vld [vmem:[#allocation2 + $0x1a] sm:$0xf]  ;;  %v2032_v3 = vadd.f32 %v2028_v32, %v2015_v51  ;;  %v2181_v0 = vmul.f32 %v4821_v18, %v2171_v35 }
 0x264   : > { %v2189_v49 = vld [vmem:[#allocation2 + $0x19] sm:$0xf]  ;;  %v2130_v54 = vmul.f32 %v4789_v26, %v2121_v45  ;;  %v1913_v36 = vsel %vm1395_vm3, %v1824_v20, %v1911_v40  ;;  %1744 = vst.msk [vmem:[#allocation2 + $0x22] sm:$0xf] %vm1399_vm4, %v1742_v7  ;;  %v1993_v8 = vmul.f32 %v4724_v21, %v1984_v33 }
 0x265   : > { %v2150_v2 = vadd.f32 %v2146_v56, %v2133_v16  ;;  %v4837_v13 = vld [vmem:[%s5201_s3 + $0x1a] ss:$0 sm:$0xff]  ;;  %v1967_v57 = vld [vmem:[#allocation2 + $0x1b] sm:$0xf]  ;;  %v2100_v12 = vadd.f32 %v2096_v1, %v2082_v31  ;;  %v2198_v23 = vmul.f32 %v4829_v52, %v2189_v49  ;;  %v2049_v25 = vadd.f32 %v2045_v41, %v2032_v3 }
 0x266   : > { %v2053_v63 = vld [vmem:[#allocation2 + $0x1b] sm:$0xf]  ;;  %v1976_v15 = vmul.f32 %v4718_v28, %v1967_v57  ;;  %v1914_v17 = vmax.f32 %v1913_v36, 0.0 }
 0x267   : > { %v2167_v9 = vadd.f32 %v2163_v27, %v2150_v2  ;;  %v2206_v24 = vld [vmem:[#allocation2 + $0x1a] sm:$0xf]  ;;  %v2117_v50 = vadd.f32 %v2113_v55, %v2100_v12  ;;  %v2062_v10 = vmul.f32 %v4756_v38, %v2053_v63  ;;  %v2164_v2 = vmul.f32 %v4811_v42, %v2155_v48  ;;  %v4870_v12 = vld [vmem:[%s5201_s3 + $0x20] ss:$0 sm:$0xff] }
 0x268   : > { %v2138_v34 = vld [vmem:[#allocation2 + $0x1b] sm:$0xf]  ;;  %v2215_v6 = vmul.f32 %v4837_v13, %v2206_v24  ;;  %v1980_v11 = vadd.f32 %v1976_v15, %v1963_v61  ;;  %1916 = vst.msk [vmem:[#allocation2 + $0x2a] sm:$0xf] %vm1399_vm4, %v1914_v17 }
 0x269   : > { %v2185_v14 = vadd.f32 %v2181_v0, %v2167_v9  ;;  %v2134_v60 = vadd.f32 %v2130_v54, %v2117_v50  ;;  %v4851_v46 = vld [vmem:[%s5201_s3 + $0x1b] ss:$0 sm:$0xff]  ;;  %v2070_v20 = vld [vmem:[#allocation2 + $0x1c] sm:$0xf]  ;;  %v2066_v28 = vadd.f32 %v2062_v10, %v2049_v25  ;;  %v2147_v16 = vmul.f32 %v4801_v47, %v2138_v34 }
 0x26a   : > { %v2223_v53 = vld [vmem:[#allocation2 + $0x1b] sm:$0xf]  ;;  %v2079_v30 = vmul.f32 %v4766_v5, %v2070_v20  ;;  %v1997_v35 = vadd.f32 %v1993_v8, %v1980_v11  ;;  %v4890_v8 = vld [vmem:[%s5201_s3 + $0x22] ss:$0 sm:$0xff] }
 0x26b   : > { %v2202_v19 = vadd.f32 %v2198_v23, %v2185_v14  ;;  %v2151_v51 = vadd.f32 %v2147_v16, %v2134_v60  ;;  %v2232_v32 = vmul.f32 %v4851_v46, %v2223_v53  ;;  %v4861_v59 = vld [vmem:[%s5201_s3 + $0x1c] ss:$0 sm:$0xff]  ;;  %v2002_v1 = vld [vmem:[#allocation2 + $0x20] sm:$0xf]  ;;  %v2071_v33 = vld [vmem:[#allocation2 + $0x24] sm:$0xf] }
 0x26c   : > { %v2240_v44 = vld [vmem:[#allocation2 + $0x1c] sm:$0xf]  ;;  %v2083_v31 = vadd.f32 %v2079_v30, %v2066_v28  ;;  %v2020_v45 = vld [vmem:[#allocation2 + $0x21] sm:$0xf]  ;;  %v2012_v21 = vmul.f32 %v4730_v29, %v2002_v1 }
 0x26d   : > { %v2219_v56 = vadd.f32 %v2215_v6, %v2202_v19  ;;  %v2087_v49 = vld [vmem:[#allocation2 + $0x20] sm:$0xf]  ;;  %v2168_v37 = vadd.f32 %v2164_v2, %v2151_v51  ;;  %v2249_v3 = vmul.f32 %v4861_v59, %v2240_v44  ;;  %v2029_v0 = vmul.f32 %v4736_v39, %v2020_v45  ;;  %v2156_v60 = vld [vmem:[#allocation2 + $0x24] sm:$0xf] }
 0x26e   : > { %v2037_v41 = vld [vmem:[#allocation2 + $0x22] sm:$0xf]  ;;  %v2097_v40 = vmul.f32 %v4775_v62, %v2087_v49  ;;  %v2016_v55 = vadd.f32 %v2012_v21, %v1997_v35  ;;  %v4878_v14 = vld [vmem:[%s5201_s3 + $0x21] ss:$0 sm:$0xff]  ;;  %v2165_v2 = vmul.f32 %v4811_v42, %v2156_v60 }
 0x26f   : > { %v2236_v27 = vadd.f32 %v2232_v32, %v2219_v56  ;;  %v2105_v9 = vld [vmem:[#allocation2 + $0x21] sm:$0xf]  ;;  %v2046_v15 = vmul.f32 %v4746_v4, %v2037_v41  ;;  %v2088_v20 = vld [vmem:[#allocation2 + $0x28] sm:$0xf] }
 0x270   : > { %v2122_v57 = vld [vmem:[#allocation2 + $0x22] sm:$0xf]  ;;  %v2101_v23 = vadd.f32 %v2097_v40, %v2083_v31  ;;  %v2114_v24 = vmul.f32 %v4782_v58, %v2105_v9  ;;  %v2033_v36 = vadd.f32 %v2029_v0, %v2016_v55  ;;  %v2080_v31 = vmul.f32 %v4766_v5, %v2071_v33  ;;  %v2173_v45 = vld [vmem:[#allocation2 + $0x28] sm:$0xf] }
 0x271   : > { %v2172_v61 = vld [vmem:[#allocation2 + $0x20] sm:$0xf]  ;;  %v2253_v29 = vadd.f32 %v2249_v3, %v2236_v27  ;;  %v2131_v39 = vmul.f32 %v4789_v26, %v2122_v57  ;;  %v2241_v51 = vld [vmem:[#allocation2 + $0x24] sm:$0xf]  ;;  %v2098_v1 = vmul.f32 %v4775_v62, %v2088_v20  ;;  %v2106_v40 = vld [vmem:[#allocation2 + $0x29] sm:$0xf]  ;;  %v2183_v62 = vmul.f32 %v4821_v18, %v2173_v45 }
 0x272   : > { %v2190_v63 = vld [vmem:[#allocation2 + $0x21] sm:$0xf]  ;;  %v2182_v25 = vmul.f32 %v4821_v18, %v2172_v61  ;;  %v2118_v10 = vadd.f32 %v2114_v24, %v2101_v23  ;;  %v2050_v53 = vadd.f32 %v2046_v15, %v2033_v36  ;;  %v2191_v9 = vld [vmem:[#allocation2 + $0x29] sm:$0xf]  ;;  %v2250_v55 = vmul.f32 %v4861_v59, %v2241_v51 }
 0x273   : > { %v2054_v54 = vld [vmem:[#allocation2 + $0x23] sm:$0xf]  ;;  %v2199_v6 = vmul.f32 %v4829_v52, %v2190_v63  ;;  %v2258_v0 = vld [vmem:[#allocation2 + $0x28] sm:$0xf]  ;;  %v2200_v36 = vmul.f32 %v4829_v52, %v2191_v9  ;;  %v2209_v9 = vld [vmem:[#allocation2 + $0x32] sm:$0xf] }
 0x274   : > { %v2139_v7 = vld [vmem:[#allocation2 + $0x23] sm:$0xf]  ;;  %v2186_v19 = vadd.f32 %v2182_v25, %v2168_v37  ;;  %v2063_v28 = vmul.f32 %v4756_v38, %v2054_v54  ;;  %v2135_v48 = vadd.f32 %v2131_v39, %v2118_v10  ;;  %v2208_v54 = vld [vmem:[#allocation2 + $0x2a] sm:$0xf]  ;;  %v2268_v60 = vmul.f32 %v4870_v12, %v2258_v0 }
 0x275   : > { %v2207_v50 = vld [vmem:[#allocation2 + $0x22] sm:$0xf]  ;;  %v2148_v16 = vmul.f32 %v4801_v47, %v2139_v7  ;;  %v2276_v23 = vld [vmem:[#allocation2 + $0x29] sm:$0xf] }
 0x276   : > { %v2257_v34 = vld [vmem:[#allocation2 + $0x20] sm:$0xf]  ;;  %v2216_v4 = vmul.f32 %v4837_v13, %v2207_v50  ;;  %v2203_v30 = vadd.f32 %v2199_v6, %v2186_v19  ;;  %v2067_v44 = vadd.f32 %v2063_v28, %v2050_v53  ;;  %v2326_v7 = vld [vmem:[#allocation2 + $0x24] sm:$0xf]  ;;  %v2115_v50 = vmul.f32 %v4782_v58, %v2106_v40  ;;  %v2225_v10 = vld [vmem:[#allocation2 + $0x2b] sm:$0xf] }
 0x277   : > { %v2275_v17 = vld [vmem:[#allocation2 + $0x21] sm:$0xf]  ;;  %v2267_v11 = vmul.f32 %v4870_v12, %v2257_v34  ;;  %v2152_v21 = vadd.f32 %v2148_v16, %v2135_v48  ;;  %v2140_v34 = vld [vmem:[#allocation2 + $0x2b] sm:$0xf]  ;;  %v2217_v58 = vmul.f32 %v4837_v13, %v2208_v54  ;;  %v2285_v20 = vmul.f32 %v4878_v14, %v2276_v23  ;;  %v2226_v54 = vld [vmem:[#allocation2 + $0x33] sm:$0xf] }
 0x278   : > { %v2224_v56 = vld [vmem:[#allocation2 + $0x23] sm:$0xf]  ;;  %v2284_v35 = vmul.f32 %v4878_v14, %v2275_v17  ;;  %v2220_v49 = vadd.f32 %v2216_v4, %v2203_v30  ;;  %v2084_v57 = vadd.f32 %v2080_v31, %v2067_v44  ;;  %v2174_v17 = vld [vmem:[#allocation2 + $0x30] sm:$0xf]  ;;  %v2293_v53 = vld [vmem:[#allocation2 + $0x2a] sm:$0xf] }
 0x279   : > { %v2271_v32 = vadd.f32 %v2267_v11, %v2253_v29  ;;  %v4896_v38 = vld [vmem:[%s5201_s3 + $0x23] ss:$0 sm:$0xff]  ;;  %v2233_v37 = vmul.f32 %v4851_v46, %v2224_v56  ;;  %v2169_v61 = vadd.f32 %v2165_v2, %v2152_v21  ;;  %v2123_v29 = vld [vmem:[#allocation2 + $0x2a] sm:$0xf]  ;;  %v4911_v15 = vld [vmem:[%s5201_s3 + $0x24] ss:$0 sm:$0xff]  ;;  %v2184_v44 = vmul.f32 %v4821_v18, %v2174_v17 }
 0x27a   : > { %v2292_v27 = vld [vmem:[#allocation2 + $0x22] sm:$0xf]  ;;  %v2102_v25 = vadd.f32 %v2098_v1, %v2084_v57  ;;  %v2132_v11 = vmul.f32 %v4789_v26, %v2123_v29  ;;  %v2157_v28 = vld [vmem:[#allocation2 + $0x2c] sm:$0xf]  ;;  %v2259_v56 = vld [vmem:[#allocation2 + $0x30] sm:$0xf]  ;;  %v2335_v51 = vmul.f32 %v4911_v15, %v2326_v7  ;;  %v2234_v26 = vmul.f32 %v4851_v46, %v2225_v10 }
 0x27b   : > { %v2288_v3 = vadd.f32 %v2284_v35, %v2271_v32  ;;  %v2309_v41 = vld [vmem:[#allocation2 + $0x23] sm:$0xf]  ;;  %v2237_v5 = vadd.f32 %v2233_v37, %v2220_v49  ;;  %v2301_v63 = vmul.f32 %v4890_v8, %v2292_v27  ;;  %v2187_v33 = vadd.f32 %v2183_v62, %v2169_v61  ;;  %v2242_v4 = vld [vmem:[#allocation2 + $0x2c] sm:$0xf]  ;;  %v4921_v2 = vld [vmem:[#allocation8] ss:$0 sm:$0xff] }
 0x27c   : > { %v2318_v24 = vmul.f32 %v4896_v38, %v2309_v41  ;;  %v2119_v6 = vadd.f32 %v2115_v50, %v2102_v25  ;;  %v2149_v35 = vmul.f32 %v4801_v47, %v2140_v34  ;;  %v2310_v31 = vld [vmem:[#allocation2 + $0x2b] sm:$0xf]  ;;  %v2192_v27 = vld [vmem:[#allocation2 + $0x31] sm:$0xf]  ;;  %v2302_v21 = vmul.f32 %v4890_v8, %v2293_v53 }
 0x27d   : > { %v2254_v39 = vadd.f32 %v2250_v55, %v2237_v5  ;;  %v2305_v19 = vadd.f32 %v2301_v63, %v2288_v3  ;;  %v2204_v16 = vadd.f32 %v2200_v36, %v2187_v33  ;;  %v2277_v37 = vld [vmem:[#allocation2 + $0x31] sm:$0xf]  ;;  %v2166_v41 = vmul.f32 %v4811_v42, %v2157_v28  ;;  %v2327_v18 = vld [vmem:[#allocation2 + $0x2c] sm:$0xf]  ;;  %v2459_v28 = vld [vmem:[%s5202_s27 + $0x18] sm:$0xff] }
 0x27e   : > { %v2136_v32 = vadd.f32 %v2132_v11, %v2119_v6  ;;  %v2251_v40 = vmul.f32 %v4861_v59, %v2242_v4  ;;  %v2269_v47 = vmul.f32 %v4870_v12, %v2259_v56  ;;  %v2319_v55 = vmul.f32 %v4896_v38, %v2310_v31  ;;  %v2294_v62 = vld [vmem:[#allocation2 + $0x32] sm:$0xf] }
 0x27f   : > { %v2272_v48 = vadd.f32 %v2268_v60, %v2254_v39  ;;  %v2322_v30 = vadd.f32 %v2318_v24, %v2305_v19  ;;  %v2221_v1 = vadd.f32 %v2217_v58, %v2204_v16  ;;  %v2201_v63 = vmul.f32 %v4829_v52, %v2192_v27  ;;  %v2311_v36 = vld [vmem:[#allocation2 + $0x33] sm:$0xf]  ;;  %v2456_v19 = vld [vmem:[%s5202_s27] sm:$0xff]  ;;  %v2260_v58 = vld [vmem:[#allocation2 + $0x38] sm:$0xf] }
 0x280   : > { %v2153_v3 = vadd.f32 %v2149_v35, %v2136_v32  ;;  %v2286_v29 = vmul.f32 %v4878_v14, %v2277_v37  ;;  %v2336_v24 = vmul.f32 %v4911_v15, %v2327_v18  ;;  %v2218_v25 = vmul.f32 %v4837_v13, %v2209_v9  ;;  %v2243_v39 = vld [vmem:[#allocation2 + $0x34] sm:$0xf]  ;;  %v2457_v13 = vld [vmem:[%s5202_s27 + $0x8] sm:$0xff]  ;;  %v2329_v37 = vld [vmem:[#allocation2 + $0x3c] sm:$0xf] }
 0x281   : > { %v2289_v45 = vadd.f32 %v2285_v20, %v2272_v48  ;;  %v2339_v49 = vadd.f32 %v2335_v51, %v2322_v30  ;;  %v2238_v57 = vadd.f32 %v2234_v26, %v2221_v1  ;;  %v2303_v52 = vmul.f32 %v4890_v8, %v2294_v62  ;;  %v2328_v33 = vld [vmem:[#allocation2 + $0x34] sm:$0xf]  ;;  %v2278_v30 = vld [vmem:[#allocation2 + $0x39] sm:$0xf] }
 0x282   : > { %v2170_v5 = vadd.f32 %v2166_v41, %v2153_v3  ;;  %v2235_v10 = vmul.f32 %v4851_v46, %v2226_v54  ;;  %v2458_v6 = vld [vmem:[%s5202_s27 + $0x10] sm:$0xff]  ;;  %v2320_v53 = vmul.f32 %v4896_v38, %v2311_v36  ;;  %v3568_v46 = vpack.c.bf16 %v2457_v13, %v2456_v19  ;;  %v2295_v26 = vld [vmem:[#allocation2 + $0x3a] sm:$0xf] }
 0x283   : > { %v2306_v0 = vadd.f32 %v2302_v21, %v2289_v45  ;;  %v2350_v61 = vadd.f32 %v4921_v2, %v2339_v49  ;;  %v2255_v42 = vadd.f32 %v2251_v40, %v2238_v57  ;;  %v2252_v16 = vmul.f32 %v4861_v59, %v2243_v39  ;;  %v2312_v1 = vld [vmem:[#allocation2 + $0x3b] sm:$0xf] }
 0x284   : > { %v2188_v50 = vadd.f32 %v2184_v44, %v2170_v5  ;;  %v3572_v56 = vpack.c.bf16 %v2459_v28, %v2458_v6  ;;  %v2337_v32 = vmul.f32 %v4911_v15, %v2328_v33  ;;  %3569 = vmatprep.subr.bf16.mxu1 %v3568_v46  ;;  %v2270_v44 = vmul.f32 %v4870_v12, %v2260_v58 }
 0x285   : > { %v2323_v23 = vadd.f32 %v2319_v55, %v2306_v0  ;;  %v2354_v7 = vmax.f32 %v2350_v61, 0.0  ;;  %v2273_v34 = vadd.f32 %v2269_v47, %v2255_v42  ;;  %3571 = vmatpush3.bf16.msra.mxu1 %v3568_v46  ;;  %v2287_v59 = vmul.f32 %v4878_v14, %v2278_v30 }
 0x286   : > { %v2205_v60 = vadd.f32 %v2201_v63, %v2188_v50  ;;  %3573 = vmatprep.subr.bf16.mxu1 %v3572_v56  ;;  %v2304_v49 = vmul.f32 %v4890_v8, %v2295_v26  ;;  %v2321_v41 = vmul.f32 %v4896_v38, %v2312_v1  ;;  %v2338_v9 = vmul.f32 %v4911_v15, %v2329_v37 }
 0x287   : > { %v2340_v17 = vadd.f32 %v2336_v24, %v2323_v23  ;;  %2358 = vst.msk [vmem:[#allocation3] sm:$0xf] %vm1399_vm4, %v2354_v7  ;;  %v2290_v20 = vadd.f32 %v2286_v29, %v2273_v34 }
 0x288   : > { %v2222_v4 = vadd.f32 %v2218_v25, %v2205_v60 }
 0x289   : > { %v2351_v11 = vadd.f32 %v4921_v2, %v2340_v17  ;;  %v2307_v51 = vadd.f32 %v2303_v52, %v2290_v20  ;;  %3575 = vmatpush3.bf16.msra.mxu1 %v3572_v56  ;;  %v3340_v17 = vld [vmem:[#allocation11] ss:$0 sm:$0xff] }
 0x28a   : > { %v2239_v35 = vadd.f32 %v2235_v10, %v2222_v4  ;;  %3579 = vmatprep.subr.bf16.mxu1 %v5193_v43 }
 0x28b   : > { %v2355_v48 = vmax.f32 %v2351_v11, 0.0  ;;  %v2324_v31 = vadd.f32 %v2320_v53, %v2307_v51 }
 0x28c   : > { %v2256_v27 = vadd.f32 %v2252_v16, %v2239_v35 }
 0x28d   : > { %2359 = vst.msk [vmem:[#allocation3 + $0x4] sm:$0xf] %vm1399_vm4, %v2355_v48  ;;  %v2341_v45 = vadd.f32 %v2337_v32, %v2324_v31 }
 0x28e   : > { %v2274_v21 = vadd.f32 %v2270_v44, %v2256_v27 }
 0x28f   : > { %v2352_v3 = vadd.f32 %v4921_v2, %v2341_v45 }
 0x290   : > { %v2291_v12 = vadd.f32 %v2287_v59, %v2274_v21 }
 0x291   : > { %v2356_v40 = vmax.f32 %v2352_v3, 0.0 }
 0x292   : > { %v2308_v18 = vadd.f32 %v2304_v49, %v2291_v12 }
 0x293   : > { %2360 = vst.msk [vmem:[#allocation3 + $0x8] sm:$0xf] %vm1399_vm4, %v2356_v40 }
 0x294   : > { %v2362_v47 = vld [vmem:[#allocation3] sm:$0xff]  ;;  %v2325_v14 = vadd.f32 %v2321_v41, %v2308_v18 }
 0x295   : > { %2467 = vrot.lane.b32.xlu0 %v2362_v47, %s3936_s1  ;;  %3475 = vmatprep.mubr.msk.f32.mxu0 %vm1395_vm3, %v2362_v47 }
 0x296   : > { %v2342_v8 = vadd.f32 %v2338_v9, %v2325_v14 }
 0x298   : > { %v2353_v57 = vadd.f32 %v4921_v2, %v2342_v8  ;;  %v3337_v2 = vld [vmem:[#allocation9] ss:$0 sm:$0xff] }
 0x29a   : > { %v2357_v55 = vmax.f32 %v2353_v57, 0.0 }
 0x29c   : > { %2361 = vst.msk [vmem:[#allocation3 + $0xc] sm:$0xf] %vm1399_vm4, %v2357_v55 }
 0x2a3   : > { %v2363_v0 = vld [vmem:[#allocation3 + $0x8] sm:$0xff] }
 0x2a4   : > { %2469 = vrot.lane.b32.xlu1 %v2363_v0, %s3936_s1  ;;  %3476 = vmatmul.mubr.msk.f32.vlgmr.msra.gmra.mrb[6].mxu0 %vm1395_vm3, %v2363_v0 }
 0x2a5   : > { %3493 = vmatprep.mubr.msk.f32.mxu0 %vm3933_vm0, %v5192_v22 }
 0x307   : > { %v2468_v38 = vpop.permute.xlu0 %2467 }
 0x308   : > { %3486 = vmatprep.mubr.msk.f32.mxu1 %vm1395_vm3, %v2468_v38 }
 0x316   : > { %v2470_v15 = vpop.permute.xlu1 %2469 }
 0x317   : > { %3487 = vmatmul.mubr.msk.f32.vlgmr.msra.gmra.mrb[10].mxu1 %vm1395_vm3, %v2470_v15 }
 0x318   : > { %3500 = vmatprep.mubr.msk.f32.mxu1 %vm3933_vm0, %v5192_v22 }
 0x377   : > { %v3477_v61 = vpop.f32.mrb[6].mxu0 }
 0x378   : > { %v4971_v5 = vadd.f32 %v3477_v61, %v3337_v2  ;;  %v2447_v63 = vpop.f32.mrb[7].mxu0 }
 0x379   : > { %v4973_v29 = vadd.f32 %v3337_v2, %v2447_v63 }
 0x37a   : > { %v2551_v62 = vsel %vm1235_vm1, %v4971_v5, 0.0 }
 0x37b   : > { %v2550_v54 = vsel %vm1235_vm1, %v4973_v29, 0.0 }
 0x37c   : > { %v2552_v42 = vadd.f32 %v2551_v62, %v2550_v54  ;;  %v2642_v62 = vld [vmem:[%s5108_s18] sm:$0xff] }
 0x37e   : > { %v2553_v23 = vrot.slane %v2552_v42, 4 }
 0x380   : > { %v2554_v24 = vadd.f32 %v2553_v23, %v2552_v42  ;;  %v2643_v42 = vld [vmem:[%s5108_s18 + $0x8] sm:$0xff]  ;;  %v2640_v23 = vld [vmem:[%s5107_s17] sm:$0xff] }
 0x382   : > { %v2555_v7 = vrot.slane %v2554_v24, 2 }
 0x384   : > { %v2556_v25 = vadd.f32 %v2555_v7, %v2554_v24  ;;  %v2641_v24 = vld [vmem:[%s5107_s17 + $0x8] sm:$0xff]  ;;  %v3577_v7 = vpack.c.bf16 %v2643_v42, %v2642_v62 }
 0x386   : > { %v2557_v50 = vrot.slane %v2556_v25, 1  ;;  %3578 = vmatpush3.bf16.msra.mxu0 %v3577_v7 }
 0x387   : > { %3582 = vmatprep.subr.bf16.mxu0 %v5193_v43 }
 0x388   : > { %v2558_v36 = vadd.f32 %v2557_v50, %v2556_v25  ;;  %v3580_v25 = vpack.c.bf16 %v2641_v24, %v2640_v23  ;;  %v3035_v23 = vlaneseq }
 0x38a   : > { %v2560_v39 = vmul.f32 0.0625, %v2558_v36  ;;  %3581 = vmatpush3.bf16.msra.mxu1 %v3580_v25  ;;  %v3036_v7 = vshrl.u32 %v3035_v23, 7 }
 0x38b   : > { %3588 = vmatprep.subr.bf16.mxu1 %v5193_v43 }
 0x38c   : > { %v2572_v34 = vsel %vm2571_vm5, %v2560_v39, 0.0  ;;  %v3037_v25 = vsub.s32 0, %v3036_v7 }
 0x38d   : > { %2573 = vadd.xlane.f32.xlu0 %v2572_v34 }
 0x3ea   : > { %v3488_v52 = vpop.f32.mrb[10].mxu1 }
 0x3eb   : > { %v4980_v33 = vadd.f32 %v3488_v52, %v3340_v17  ;;  %v2541_v10 = vpop.f32.mrb[11].mxu1  ;;  %v2636_v52 = vld [vmem:[%s5105_s15] sm:$0x1] }
 0x3ec   : > { %v4982_v60 = vadd.f32 %v3340_v17, %v2541_v10  ;;  %v2631_v17 = vld [vmem:[#allocation12] sm:$0x1] }
 0x3ed   : > { %v2562_v19 = vsel %vm1235_vm1, %v4980_v33, 0.0 }
 0x3ee   : > { %v2561_v13 = vsel %vm1235_vm1, %v4982_v60, 0.0 }
 0x3ef   : > { %v2563_v6 = vadd.f32 %v2562_v19, %v2561_v13  ;;  %v2792_v13 = vld [vmem:[%s5110_s20] sm:$0xff] }
 0x3f1   : > { %v2564_v11 = vrot.slane %v2563_v6, 4 }
 0x3f3   : > { %v2565_v58 = vadd.f32 %v2564_v11, %v2563_v6  ;;  %v2793_v6 = vld [vmem:[%s5110_s20 + $0x8] sm:$0xff]  ;;  %v2633_v11 = vld [vmem:[#allocation14] sm:$0x1] }
 0x3f5   : > { %v2566_v20 = vrot.slane %v2565_v58, 2 }
 0x3f7   : > { %v2567_v53 = vadd.f32 %v2566_v20, %v2565_v58  ;;  %v2638_v58 = vld [vmem:[%s5106_s16] sm:$0x1] }
 0x3f9   : > { %v2568_v46 = vrot.slane %v2567_v53, 1 }
 0x3fb   : > { %v2569_v28 = vadd.f32 %v2568_v46, %v2567_v53  ;;  %v3583_v46 = vpack.c.bf16 %v2793_v6, %v2792_v13 }
 0x3fd   : > { %v2570_v16 = vmul.f32 0.0625, %v2569_v28 }
 0x3ff   : > { %v2582_v4 = vsel %vm2571_vm5, %v2570_v16, 0.0 }
 0x400   : > { %2583 = vadd.xlane.f32.xlu1 %v2582_v4  ;;  %v2794_v4 = vld [vmem:[%s5110_s20 + $0x10] sm:$0xff] }
 0x41a   : > { %v2574_v56 = vpop.xlane.xlu0 %2573 }
 0x41b   : > { %v2575_v48 = vrot.slane %v2574_v56, 4 }
 0x41d   : > { %v2576_v30 = vadd.f32 %v2575_v48, %v2574_v56  ;;  %v2795_v56 = vld [vmem:[%s5110_s20 + $0x18] sm:$0xff] }
 0x41e   : > { %v3586_v48 = vpack.c.bf16 %v2795_v56, %v2794_v4 }
 0x41f   : > { %v2577_v51 = vrot.slane %v2576_v30, 2 }
 0x421   : > { %v2578_v32 = vadd.f32 %v2577_v51, %v2576_v30  ;;  %v2870_v30 = vld [vmem:[%s5112_s22] sm:$0xff]  ;;  %v2871_v51 = vld [vmem:[%s5112_s22 + $0x8] sm:$0xff] }
 0x423   : > { %v2579_v35 = vrot.slane %v2578_v32, 1 }
 0x425   : > { %v2580_v44 = vadd.f32 %v2579_v35, %v2578_v32  ;;  %v3589_v32 = vpack.c.bf16 %v2871_v51, %v2870_v30  ;;  %v2954_v35 = vld [vmem:[%s5114_s24] sm:$0xff] }
 0x427   : > { %3601 = vpush %v2580_v44  ;;  %v2955_v44 = vld [vmem:[%s5114_s24 + $0x8] sm:$0xff] }
 0x458   : > { %s3602_s29 = spop %3601 }
 0x48d   : > { %v2584_v26 = vpop.xlane.xlu1 %2583 }
 0x48e   : > { %v2585_v31 = vrot.slane %v2584_v26, 4 }
 0x490   : > { %v2586_v27 = vadd.f32 %v2585_v31, %v2584_v26 }
 0x492   : > { %v2587_v59 = vrot.slane %v2586_v27, 2 }
 0x494   : > { %v2588_v1 = vadd.f32 %v2587_v59, %v2586_v27  ;;  %v2790_v27 = vld [vmem:[%s5109_s19] sm:$0x1] }
 0x496   : > { %v2589_v45 = vrot.slane %v2588_v1, 1 }
 0x498   : > { %v2590_v21 = vadd.f32 %v2589_v45, %v2588_v1 }
 0x49a   : > { %3603 = vpush %v2590_v21  ;;  %v3595_v21 = vpack.c.bf16 %v2955_v44, %v2954_v35 }
 0x4cb   : > { %s3604_s0 = spop %3603 }
 0x4cc   : > { %s2592_s5 = sadd.f32 %s3604_s0, %s3602_s29  ;;  %s5205_s29 = sld [smem:[#allocation40_spill]] }
 0x4ce   : > { %s2595_s10 = smul.f32 0.03125, %s2592_s5 }
 0x4d0   : > { %v2596_v49 = vstv %s2595_s10 }
 0x4d1   : > { %v2597_v37 = vsub.f32 %v2560_v39, %v2596_v49  ;;  %v2609_v3 = vsub.f32 %v2570_v16, %v2596_v49 }
 0x4d2   : > { %s921_s0 = scalar_lea.vmem %s5205_s29, %s3352_s2 }
 0x4d3   : > { %v2598_v12 = vmul.f32 %v2597_v37, %v2597_v37  ;;  %v2610_v40 = vmul.f32 %v2609_v3, %v2609_v3  ;;  %v3049_v13 = vld [vmem:[%s921_s0] sm:$0xff]  ;;  %v3050_v6 = vld [vmem:[%s921_s0 + $0x8] sm:$0xff] }
 0x4d5   : > { %v2599_v41 = vsel %vm2571_vm5, %v2598_v12, 0.0  ;;  %v2611_v47 = vsel %vm2571_vm5, %v2610_v40, 0.0  ;;  %v2956_v12 = vld [vmem:[%s5114_s24 + $0x10] sm:$0xff]  ;;  %v2957_v40 = vld [vmem:[%s5114_s24 + $0x18] sm:$0xff] }
 0x4d6   : > { %2600 = vadd.xlane.f32.xlu0 %v2599_v41 }
 0x4da   : > { %2612 = vadd.xlane.f32.xlu0 %v2611_v47 }
 0x563   : > { %v2601_v18 = vpop.xlane.xlu0 %2600 }
 0x564   : > { %v2602_v9 = vrot.slane %v2601_v18, 4 }
 0x566   : > { %v2603_v14 = vadd.f32 %v2602_v9, %v2601_v18 }
 0x567   : > { %v2613_v8 = vpop.xlane.xlu0 %2612 }
 0x568   : > { %v2604_v57 = vrot.slane %v2603_v14, 2  ;;  %v2614_v55 = vrot.slane %v2613_v8, 4 }
 0x56a   : > { %v2615_v0 = vadd.f32 %v2614_v55, %v2613_v8  ;;  %v2605_v38 = vadd.f32 %v2604_v57, %v2603_v14 }
 0x56c   : > { %v2616_v15 = vrot.slane %v2615_v0, 2  ;;  %v2606_v2 = vrot.slane %v2605_v38, 1 }
 0x56e   : > { %v2617_v61 = vadd.f32 %v2616_v15, %v2615_v0  ;;  %v2607_v63 = vadd.f32 %v2606_v2, %v2605_v38 }
 0x570   : > { %3605 = vpush %v2607_v63  ;;  %v2618_v54 = vrot.slane %v2617_v61, 1 }
 0x572   : > { %v2619_v50 = vadd.f32 %v2618_v54, %v2617_v61 }
 0x574   : > { %3607 = vpush %v2619_v50 }
 0x5a1   : > { %s3606_s10 = spop %3605 }
 0x5a5   : > { %s3608_s23 = spop %3607 }
 0x5a6   : > { %s2621_s6 = sadd.f32 %s3608_s23, %s3606_s10  ;;  %s5203_s10 = sld [smem:[#allocation38_spill]] }
 0x5a8   : > { %s2624_s7 = smul.f32 0.03125, %s2621_s6 }
 0x5aa   : > { %s2625_s26 = sadd.f32 1e-05, %s2624_s7  ;;  %s5204_s7 = sld [smem:[#allocation39_spill]] }
 0x5ac   : > { %v2626_v36 = vstv %s2625_s26  ;;  %v2874_v14 = vld [vmem:[%s5203_s10] sm:$0x1]  ;;  %s5206_s10 = sld [smem:[#allocation41_spill]] }
 0x5ad   : > { %3695 = vrsqrt.f32 %v2626_v36 }
 0x5b0   : > { %v2958_v8 = vld [vmem:[%s5204_s7] sm:$0x1] }
 0x5b2   : > { %s926_s23 = scalar_lea.vmem %s5206_s10, %s3352_s2 }
 0x5b7   : > { %v3696_v39 = vpop.eup %3695 }
 0x5b8   : > { %3609 = vpush %v3696_v39 }
 0x5e9   : > { %s3610_s1 = spop %3609 }
 0x5ea   : > { %v2629_v34 = vstv %s3610_s1 }
 0x5eb   : > { %v2630_v10 = vmul.f32 %v2629_v34, %v2597_v37  ;;  %v2635_v19 = vmul.f32 %v2629_v34, %v2609_v3  ;;  %v2872_v37 = vld [vmem:[%s5112_s22 + $0x10] sm:$0xff]  ;;  %v2873_v3 = vld [vmem:[%s5112_s22 + $0x18] sm:$0xff] }
 0x5ec   : > { %v3592_v41 = vpack.c.bf16 %v2873_v3, %v2872_v37 }
 0x5ed   : > { %v2632_v20 = vmul.f32 %v2631_v17, %v2630_v10  ;;  %v2637_v53 = vmul.f32 %v2636_v52, %v2635_v19 }
 0x5ef   : > { %v2634_v28 = vadd.f32 %v2633_v11, %v2632_v20  ;;  %v2639_v16 = vadd.f32 %v2638_v58, %v2637_v53 }
 0x5f1   : > { %3494 = vmatmul.mubr.msk.f32.vlgmr.msra.gmra.mrb[8].mxu0 %vm1235_vm1, %v2639_v16  ;;  %3501 = vmatmul.mubr.msk.f32.vlgmr.msra.gmra.mrb[12].mxu1 %vm1235_vm1, %v2634_v28 }
 0x5f2   : > { %3584 = vmatpush3.bf16.msra.mxu0 %v3583_v46  ;;  %3511 = vmatprep.mubr.msk.f32.mxu0 %vm3933_vm0, %v5192_v22 }
 0x5f3   : > { %3585 = vmatprep.subr.bf16.mxu0 %v5193_v43  ;;  %3522 = vmatprep.mubr.msk.f32.mxu1 %vm3933_vm0, %v5192_v22 }
 0x5f4   : > { %3590 = vmatpush3.bf16.msra.mxu1 %v3589_v32 }
 0x5f5   : > { %3591 = vmatprep.subr.bf16.mxu1 %v5193_v43 }
 0x5f6   : > { %3587 = vmatpush3.bf16.msra.mxu0 %v3586_v48 }
 0x5f7   : > { %3594 = vmatprep.subr.bf16.mxu0 %v5193_v43 }
 0x5f8   : > { %3593 = vmatpush3.bf16.msra.mxu1 %v3592_v41 }
 0x6c4   : > { %v2713_v26 = vpop.f32.mrb[8].mxu0  ;;  %v2786_v31 = vpop.f32.mrb[12].mxu1 }
 0x6c5   : > { %v2787_v59 = vadd.f32 %v2786_v31, %v2713_v26  ;;  %v3495_v1 = vpop.f32.mrb[9].mxu0  ;;  %v3502_v45 = vpop.f32.mrb[13].mxu1 }
 0x6c7   : > { %v2791_v49 = vadd.f32 %v2790_v27, %v2787_v59 }
 0x6c9   : > { %3512 = vmatmul.mubr.msk.f32.vlgmr.msra.gmra.mrb[10].mxu0 %vm1395_vm3, %v2791_v49 }
 0x6ca   : > { %3596 = vmatpush3.bf16.msra.mxu0 %v3595_v21  ;;  %3533 = vmatprep.mubr.msk.f32.mxu0 %vm3933_vm0, %v5192_v22  ;;  %v3598_v22 = vpack.c.bf16 %v2957_v40, %v2956_v12 }
 0x6cb   : > { %3597 = vmatprep.subr.bf16.mxu0 %v5193_v43  ;;  %v2796_v43 = vld [vmem:[%s5111_s21] sm:$0x1] }
 0x6ce   : > { %3599 = vmatpush3.bf16.msra.mxu0 %v3598_v22 }
 0x79c   : > { %v2866_v47 = vpop.f32.mrb[10].mxu0 }
 0x79d   : > { %v2867_v18 = vadd.f32 %v2866_v47, %v2796_v43  ;;  %v3513_v9 = vpop.f32.mrb[11].mxu0 }
 0x79f   : > { %3523 = vmatmul.mubr.msk.f32.vlgmr.msra.gmra.mrb[14].mxu1 %vm1395_vm3, %v2867_v18  ;;  %3534 = vmatmul.mubr.msk.f32.vlgmr.msra.gmra.mrb[12].mxu0 %vm1395_vm3, %v2867_v18 }
 0x872   : > { %v2944_v57 = vpop.f32.mrb[14].mxu1  ;;  %v3025_v55 = vpop.f32.mrb[12].mxu0 }
 0x873   : > { %v2945_v0 = vadd.f32 %v2944_v57, %v2874_v14  ;;  %v3026_v38 = vadd.f32 %v3025_v55, %v2958_v8  ;;  %v3524_v15 = vpop.f32.mrb[15].mxu1  ;;  %v3535_v2 = vpop.f32.mrb[13].mxu0 }
 0x875   : > { %v3347_v61 = vmul.f32 -1.442695, %v2945_v0  ;;  %v3349_v63 = vmul.f32 -1.442695, %v3026_v38 }
 0x877   : > { %3697 = vpow2.f32 %v3347_v61 }
 0x878   : > { %3699 = vpow2.f32 %v3349_v63 }
 0x881   : > { %v3698_v62 = vpop.eup %3697 }
 0x882   : > { %v3700_v54 = vpop.eup %3699  ;;  %v2951_v42 = vadd.f32 1.0, %v3698_v62 }
 0x883   : > { %v3032_v24 = vadd.f32 1.0, %v3700_v54 }
 0x884   : > { %3701 = vrcp.f32 %v2951_v42 }
 0x885   : > { %3703 = vrcp.f32 %v3032_v24 }
 0x88e   : > { %v3702_v50 = vpop.eup %3701 }
 0x88f   : > { %v3704_v36 = vpop.eup %3703  ;;  %v3038_v39 = vrot.slane %v3702_v50, %v3037_v25 }
 0x890   : > { %v3044_v34 = vrot.slane %v3704_v36, %v3037_v25 }
 0x891   : > { %v3039_v17 = vmul.f32 %v3038_v39, %v4973_v29  ;;  %v3040_v52 = vmul.f32 %v3038_v39, %v4971_v5 }
 0x892   : > { %v3045_v10 = vmul.f32 %v3044_v34, %v4982_v60  ;;  %v3046_v19 = vmul.f32 %v3044_v34, %v4980_v33 }
 0x894   : > { %v3047_v11 = vadd.f32 %v3045_v10, %v3039_v17  ;;  %v3048_v58 = vadd.f32 %v3046_v19, %v3040_v52 }
 0x896   : > { %v3051_v20 = vadd.f32 %v3049_v13, %v3047_v11  ;;  %v3052_v53 = vadd.f32 %v3050_v6, %v3048_v58 }
 0x898   : > { %3053 = vst.msk [vmem:[%s926_s23] sm:$0xff] %vm1235_vm1, %v3051_v20  ;;  %3054 = vst.msk [vmem:[%s926_s23 + $0x8] sm:$0xff] %vm1235_vm1, %v3052_v53 }
 0x899 PF: > { %s5207_s6 = sld [smem:[#allocation19_spill]] }
 0x89f   : > { %s41_s7 = sadd.s32 1, %s5207_s6  }
 0x8a0   : > { %p38_p11 = scmp.ge.s32.totalorder %s41_s7, 4  }
 0x8a2   :  { %40 = sbr.rel (!%p38_p11) target bundleno = 21 (0x15), region = 209 }
 0x8a9   :  { %3076 = vsyncpa [#allocation5], 1 }
 0x8aa   :  { %3078 = vsyncpa [#allocation5 + $0x1], 1 }
 0x8ab   :  { %3079 = vsyncpa [#allocation7], 1 }
 0x8ac   :  { %3080 = vsyncpa [#allocation10], 1 }
 0x8ad   :  { %3081 = vsyncpa [#allocation13], 1 }

</bundles_post_ra>
